<compile_context>
chip_gen: v5e
topology: v5e:2x2
jax: 0.10.0
libtpu: 0.0.40
codegen_flags: <defaults>
</compile_context>

<pallas_src>
import functools

import jax
import jax.numpy as jnp
from jax import lax
from jax.experimental import pallas as pl
from jax.experimental.pallas import tpu as pltpu

_I32_MAX_POS = 0x7FFFFFFF                 #  2147483647
_I32_MIN = -2147483648
_KEY_POS_INF = 0x7F800000                 # key(+inf)
_KEY_NEG_INF = _I32_MIN + 0x007FFFFF      # key(-inf)

_LANES = 128
_CHUNK_ROWS = 128                         # 64 KiB of f32 per fused-count chunk
_RADIX4_MAX_ELEMS = 1 << 19               # <= 512K elems -> latency-bound -> radix-4


def _kwta_kernel(x_ref, o_ref, *, k, radix4, chunk_rows, num_chunks):
    """x_ref: (rows, 128) f32 slab in VMEM.  o_ref: (rows, 128) mask (x dtype)."""
    k_s = jnp.int32(k)
    single = num_chunks == 1

    # Hoist the slab once on the single-chunk path: every pass and the final
    # mask reuse the same loaded value.
    x = x_ref[...] if single else None

    def splat(v):
        return jnp.full((1, _LANES), v, dtype=jnp.int32)

    def thr_from_key(kb):
        # float32 threshold whose bit pattern is key^{-1}(kb); kb: (1,128) i32.
        fb = jnp.where(kb < 0, kb ^ jnp.int32(_I32_MAX_POS), kb)
        return pltpu.bitcast(fb, jnp.float32)

    def fused_counts(thrs):
        # ONE traversal of the slab for all candidate thresholds of this pass:
        # per-lane i32 accumulators, one cross-lane reduce per candidate.
        def add_chunk(chunk, accs):
            return tuple(
                a + jnp.sum((chunk >= th).astype(jnp.int32), axis=0, keepdims=True)
                for a, th in zip(accs, thrs))

        zeros = tuple(jnp.zeros((1, _LANES), jnp.int32) for _ in thrs)
        if single:
            partials = add_chunk(x, zeros)
        else:
            def body(i, accs):
                start = pl.multiple_of(i * chunk_rows, chunk_rows)
                return add_chunk(x_ref[pl.ds(start, chunk_rows), :], accs)
            partials = lax.fori_loop(0, num_chunks, body, zeros)
        # Totals kept in the vector domain as (1,1) arrays (no sreg round trip).
        return tuple(jnp.sum(p, axis=-1, keepdims=True) for p in partials)

    def preds(kbs):
        # Monotone predicates [K* >= kb] for ASCENDING candidate keys `kbs`
        # (NaN-free data).  Candidates whose bit pattern falls in the NaN
        # ranges of key space get explicit clauses to keep the search monotone.
        tots = fused_counts(tuple(thr_from_key(kb) for kb in kbs))
        return tuple(
            (((tot >= k_s) & (kb <= jnp.int32(_KEY_POS_INF)))
             | (kb < jnp.int32(_KEY_NEG_INF))).astype(jnp.int32)
            for kb, tot in zip(kbs, tots))

    if radix4:
        # --- Pass 0: sign + bit 30 (3 ascending boundary keys). -------------
        p1, p2, p3 = preds((splat(_I32_MIN + (1 << 30)), splat(0), splat(1 << 30)))
        digit = p1 + p2 + p3                          # {0..3}, lane-replicated
        base = jnp.where(digit >= 2, jnp.int32(0), jnp.int32(_I32_MIN))
        t = jnp.left_shift(digit & 1, 30)
        # --- Passes 1..15: remaining 30 magnitude bits, 2 per pass. ----------
        for i in range(15):
            s = 28 - 2 * i
            q1, q2, q3 = preds(tuple(base + (t | jnp.int32(m << s))
                                     for m in (1, 2, 3)))
            digit = q1 + q2 + q3
            t = t | jnp.left_shift(digit, s)
    else:
        # --- Radix-2: pass 0 resolves the sign, then 31 single-bit passes. ---
        (p0,) = preds((splat(0),))
        base = jnp.where(p0 > 0, jnp.int32(0), jnp.int32(_I32_MIN))
        t = jnp.zeros((1, _LANES), jnp.int32)
        for s in range(30, -1, -1):
            (q,) = preds((base + (t | jnp.int32(1 << s)),))
            t = t | jnp.left_shift(q, s)

    # --- Final mask, emitted directly in the caller's dtype. -----------------
    thr = thr_from_key(base + t)
    src = x if single else x_ref[...]
    o_ref[...] = (src >= thr).astype(o_ref.dtype)


def kwta_mask(x, n_pick):
    """JAX/Pallas equivalent of KWTAMask(n_pick)(x)."""
    if not jnp.issubdtype(x.dtype, jnp.floating):
        raise TypeError(f"kwta_mask expects a floating dtype, got {x.dtype}")
    # TODO(synk): float64 inputs are narrowed to float32 (lossy); bf16/f16 widen exactly.
    x_shape = x.shape
    out_dtype = x.dtype

    xf = x if x.dtype == jnp.float32 else x.astype(jnp.float32)
    flat = xf.reshape(-1)                    # C-order flatten, like torch
    n = flat.shape[0]
    n_pick = int(n_pick)
    assert 1 <= n_pick <= n, "n_pick must be in [1, numel(x)]"

    # Static pass structure: single-shot + radix-4 when latency-bound, chunked
    # fused counts (and radix-2) once the slab is throughput-bound.
    single_shot = n <= _CHUNK_ROWS * _LANES
    radix4 = n <= _RADIX4_MAX_ELEMS
    pad_to = (8 * _LANES) if single_shot else (_CHUNK_ROWS * _LANES)
    padded_n = ((n + pad_to - 1) // pad_to) * pad_to
    pad = padded_n - n
    # Pad with NaN: NaN fails every ">= threshold" compare, so padded slots are
    # never counted and their mask entries are 0 (and sliced off below).
    if pad:
        flat = jnp.pad(flat, (0, pad), constant_values=jnp.nan)
    rows = padded_n // _LANES
    x2d = flat.reshape(rows, _LANES)
    num_chunks = 1 if single_shot else rows // _CHUNK_ROWS
    chunk_rows = rows if single_shot else _CHUNK_ROWS

    # VMEM budget from the actual hardware (v7x: 64 MiB/core, v5e/v6e: 128 MiB).
    try:
        vmem_cap = int(pltpu.get_tpu_info().vmem_capacity_bytes)
    except Exception:
        vmem_cap = 64 * 1024 * 1024          # conservative fallback (v7x/core)
    slab_bytes = rows * _LANES * (4 + jnp.dtype(out_dtype).itemsize)
    assert slab_bytes <= (vmem_cap * 4) // 5, (
        "input too large for the single-block kernel; needs the streamed "
        "variant (see TODO at top of file)")
    vmem_limit = int(min(vmem_cap, max(slab_bytes + (16 << 20), 32 << 20)))

    out2d = pl.pallas_call(
        functools.partial(_kwta_kernel, k=n_pick, radix4=radix4,
                          chunk_rows=chunk_rows, num_chunks=num_chunks),
        out_shape=jax.ShapeDtypeStruct((rows, _LANES), out_dtype),
        in_specs=[pl.BlockSpec(memory_space=pltpu.MemorySpace.VMEM)],
        out_specs=pl.BlockSpec(memory_space=pltpu.MemorySpace.VMEM),
        compiler_params=pltpu.CompilerParams(vmem_limit_bytes=vmem_limit),
    )(x2d)

    if pad:
        return out2d.reshape(-1)[:n].reshape(x_shape)
    return out2d.reshape(x_shape)


def _check(key, shape, n_pick):
    x = jax.random.normal(key, shape, dtype=jnp.float32)
    out = jax.block_until_ready(kwta_mask(x, n_pick))
    # Pure-JAX reference: k-th largest value, then x >= v_k.
    v_k = jnp.sort(x.reshape(-1))[-n_pick]
    ref = (x >= v_k).astype(x.dtype)
    assert out.shape == x.shape and out.dtype == x.dtype
    assert int(jnp.sum(out)) >= n_pick
    assert bool(jnp.all(out == ref))


if __name__ == "__main__":
    # Global top-k mask over all elements of an NCHW activation tensor.
    k0, k1, k2 = jax.random.split(jax.random.PRNGKey(0), 3)
    # Primary small example (single-shot, radix-4 path).  KWTAMask(n_pick=100);
    # the module default 10000 would need >= 10000 elements.
    _check(k0, (2, 4, 16, 16), 100)
    # Chunked fused-count path (radix-4) with NaN padding.
    _check(k1, (1, 8, 48, 48), 1000)
    # Larger slab: chunked fused counts + radix-2, module-default n_pick.
    _check(k2, (1, 8, 288, 256), 10000)
    print("KERNEL_OK")
</pallas_src>

<mosaic_0001>
module attributes {stable_mosaic.version = 11 : i64} {
  func.func @_kwta_kernel(%arg0: memref<16x128xf32, #tpu.memory_space<vmem>>, %arg1: memref<16x128xf32, #tpu.memory_space<vmem>>) attributes {dimension_semantics = [], scalar_prefetch = 0 : i64, scratch_operands = 0 : i64, tpu.core_type = #tpu.core_type<tc>} {
    %c0 = arith.constant 0 : index
    %c0_0 = arith.constant 0 : index
    %0 = vector.load %arg0[%c0, %c0_0] : memref<16x128xf32, #tpu.memory_space<vmem>>, vector<16x128xf32>
    %c-1073741824_i32 = arith.constant -1073741824 : i32
    %1 = vector.broadcast %c-1073741824_i32 : i32 to vector<1x128xi32>
    %c0_i32 = arith.constant 0 : i32
    %2 = vector.broadcast %c0_i32 : i32 to vector<1x128xi32>
    %c1073741824_i32 = arith.constant 1073741824 : i32
    %3 = vector.broadcast %c1073741824_i32 : i32 to vector<1x128xi32>
    %c0_i32_1 = arith.constant 0 : i32
    %4 = vector.broadcast %c0_i32_1 : i32 to vector<1x128xi32>
    %5 = arith.cmpi slt, %1, %4 : vector<1x128xi32>
    %c2147483647_i32 = arith.constant 2147483647 : i32
    %6 = vector.broadcast %c2147483647_i32 : i32 to vector<1x128xi32>
    %7 = arith.xori %1, %6 : vector<1x128xi32>
    %8 = arith.select %5, %7, %1 : vector<1x128xi1>, vector<1x128xi32>
    %9 = tpu.bitcast %8 : vector<1x128xi32> -> vector<1x128xf32>
    %c0_i32_2 = arith.constant 0 : i32
    %10 = vector.broadcast %c0_i32_2 : i32 to vector<1x128xi32>
    %11 = arith.cmpi slt, %2, %10 : vector<1x128xi32>
    %c2147483647_i32_3 = arith.constant 2147483647 : i32
    %12 = vector.broadcast %c2147483647_i32_3 : i32 to vector<1x128xi32>
    %13 = arith.xori %2, %12 : vector<1x128xi32>
    %14 = arith.select %11, %13, %2 : vector<1x128xi1>, vector<1x128xi32>
    %15 = tpu.bitcast %14 : vector<1x128xi32> -> vector<1x128xf32>
    %c0_i32_4 = arith.constant 0 : i32
    %16 = vector.broadcast %c0_i32_4 : i32 to vector<1x128xi32>
    %17 = arith.cmpi slt, %3, %16 : vector<1x128xi32>
    %c2147483647_i32_5 = arith.constant 2147483647 : i32
    %18 = vector.broadcast %c2147483647_i32_5 : i32 to vector<1x128xi32>
    %19 = arith.xori %3, %18 : vector<1x128xi32>
    %20 = arith.select %17, %19, %3 : vector<1x128xi1>, vector<1x128xi32>
    %21 = tpu.bitcast %20 : vector<1x128xi32> -> vector<1x128xf32>
    %c0_i32_6 = arith.constant 0 : i32
    %22 = vector.broadcast %c0_i32_6 : i32 to vector<1x128xi32>
    %c0_i32_7 = arith.constant 0 : i32
    %23 = vector.broadcast %c0_i32_7 : i32 to vector<1x128xi32>
    %c0_i32_8 = arith.constant 0 : i32
    %24 = vector.broadcast %c0_i32_8 : i32 to vector<1x128xi32>
    %25 = vector.broadcast %9 : vector<1x128xf32> to vector<16x128xf32>
    %26 = arith.cmpf oge, %0, %25 : vector<16x128xf32>
    %27 = arith.extui %26 : vector<16x128xi1> to vector<16x128xi32>
    %cst = arith.constant dense<0> : vector<128xi32>
    %28 = vector.multi_reduction <add>, %27, %cst [0] : vector<16x128xi32> to vector<128xi32>
    %29 = vector.shape_cast %28 : vector<128xi32> to vector<1x128xi32>
    %30 = arith.addi %22, %29 : vector<1x128xi32>
    %31 = vector.broadcast %15 : vector<1x128xf32> to vector<16x128xf32>
    %32 = arith.cmpf oge, %0, %31 : vector<16x128xf32>
    %33 = arith.extui %32 : vector<16x128xi1> to vector<16x128xi32>
    %cst_9 = arith.constant dense<0> : vector<128xi32>
    %34 = vector.multi_reduction <add>, %33, %cst_9 [0] : vector<16x128xi32> to vector<128xi32>
    %35 = vector.shape_cast %34 : vector<128xi32> to vector<1x128xi32>
    %36 = arith.addi %23, %35 : vector<1x128xi32>
    %37 = vector.broadcast %21 : vector<1x128xf32> to vector<16x128xf32>
    %38 = arith.cmpf oge, %0, %37 : vector<16x128xf32>
    %39 = arith.extui %38 : vector<16x128xi1> to vector<16x128xi32>
    %cst_10 = arith.constant dense<0> : vector<128xi32>
    %40 = vector.multi_reduction <add>, %39, %cst_10 [0] : vector<16x128xi32> to vector<128xi32>
    %41 = vector.shape_cast %40 : vector<128xi32> to vector<1x128xi32>
    %42 = arith.addi %24, %41 : vector<1x128xi32>
    %cst_11 = arith.constant dense<0> : vector<1xi32>
    %43 = vector.multi_reduction <add>, %30, %cst_11 [1] : vector<1x128xi32> to vector<1xi32>
    %44 = vector.shape_cast %43 : vector<1xi32> to vector<1x1xi32>
    %cst_12 = arith.constant dense<0> : vector<1xi32>
    %45 = vector.multi_reduction <add>, %36, %cst_12 [1] : vector<1x128xi32> to vector<1xi32>
    %46 = vector.shape_cast %45 : vector<1xi32> to vector<1x1xi32>
    %cst_13 = arith.constant dense<0> : vector<1xi32>
    %47 = vector.multi_reduction <add>, %42, %cst_13 [1] : vector<1x128xi32> to vector<1xi32>
    %48 = vector.shape_cast %47 : vector<1xi32> to vector<1x1xi32>
    %c100_i32 = arith.constant 100 : i32
    %49 = vector.broadcast %c100_i32 : i32 to vector<1x1xi32>
    %50 = arith.cmpi sge, %44, %49 : vector<1x1xi32>
    %c2139095040_i32 = arith.constant 2139095040 : i32
    %51 = vector.broadcast %c2139095040_i32 : i32 to vector<1x128xi32>
    %52 = arith.cmpi sle, %1, %51 : vector<1x128xi32>
    %53 = vector.broadcast %50 : vector<1x1xi1> to vector<1x128xi1>
    %54 = arith.andi %53, %52 : vector<1x128xi1>
    %c-2139095041_i32 = arith.constant -2139095041 : i32
    %55 = vector.broadcast %c-2139095041_i32 : i32 to vector<1x128xi32>
    %56 = arith.cmpi slt, %1, %55 : vector<1x128xi32>
    %57 = arith.ori %54, %56 : vector<1x128xi1>
    %58 = arith.extui %57 : vector<1x128xi1> to vector<1x128xi32>
    %c100_i32_14 = arith.constant 100 : i32
    %59 = vector.broadcast %c100_i32_14 : i32 to vector<1x1xi32>
    %60 = arith.cmpi sge, %46, %59 : vector<1x1xi32>
    %c2139095040_i32_15 = arith.constant 2139095040 : i32
    %61 = vector.broadcast %c2139095040_i32_15 : i32 to vector<1x128xi32>
    %62 = arith.cmpi sle, %2, %61 : vector<1x128xi32>
    %63 = vector.broadcast %60 : vector<1x1xi1> to vector<1x128xi1>
    %64 = arith.andi %63, %62 : vector<1x128xi1>
    %c-2139095041_i32_16 = arith.constant -2139095041 : i32
    %65 = vector.broadcast %c-2139095041_i32_16 : i32 to vector<1x128xi32>
    %66 = arith.cmpi slt, %2, %65 : vector<1x128xi32>
    %67 = arith.ori %64, %66 : vector<1x128xi1>
    %68 = arith.extui %67 : vector<1x128xi1> to vector<1x128xi32>
    %c100_i32_17 = arith.constant 100 : i32
    %69 = vector.broadcast %c100_i32_17 : i32 to vector<1x1xi32>
    %70 = arith.cmpi sge, %48, %69 : vector<1x1xi32>
    %c2139095040_i32_18 = arith.constant 2139095040 : i32
    %71 = vector.broadcast %c2139095040_i32_18 : i32 to vector<1x128xi32>
    %72 = arith.cmpi sle, %3, %71 : vector<1x128xi32>
    %73 = vector.broadcast %70 : vector<1x1xi1> to vector<1x128xi1>
    %74 = arith.andi %73, %72 : vector<1x128xi1>
    %c-2139095041_i32_19 = arith.constant -2139095041 : i32
    %75 = vector.broadcast %c-2139095041_i32_19 : i32 to vector<1x128xi32>
    %76 = arith.cmpi slt, %3, %75 : vector<1x128xi32>
    %77 = arith.ori %74, %76 : vector<1x128xi1>
    %78 = arith.extui %77 : vector<1x128xi1> to vector<1x128xi32>
    %79 = arith.addi %58, %68 : vector<1x128xi32>
    %80 = arith.addi %79, %78 : vector<1x128xi32>
    %c2_i32 = arith.constant 2 : i32
    %81 = vector.broadcast %c2_i32 : i32 to vector<1x128xi32>
    %82 = arith.cmpi sge, %80, %81 : vector<1x128xi32>
    %c0_i32_20 = arith.constant 0 : i32
    %c-2147483648_i32 = arith.constant -2147483648 : i32
    %83 = vector.broadcast %c0_i32_20 : i32 to vector<1x128xi32>
    %84 = vector.broadcast %c-2147483648_i32 : i32 to vector<1x128xi32>
    %85 = arith.select %82, %83, %84 : vector<1x128xi1>, vector<1x128xi32>
    %c1_i32 = arith.constant 1 : i32
    %86 = vector.broadcast %c1_i32 : i32 to vector<1x128xi32>
    %87 = arith.andi %80, %86 : vector<1x128xi32>
    %c30_i32 = arith.constant 30 : i32
    %88 = vector.broadcast %c30_i32 : i32 to vector<1x128xi32>
    %89 = arith.shli %87, %88 : vector<1x128xi32>
    %c268435456_i32 = arith.constant 268435456 : i32
    %90 = vector.broadcast %c268435456_i32 : i32 to vector<1x128xi32>
    %91 = arith.ori %89, %90 : vector<1x128xi32>
    %92 = arith.addi %85, %91 : vector<1x128xi32>
    %c536870912_i32 = arith.constant 536870912 : i32
    %93 = vector.broadcast %c536870912_i32 : i32 to vector<1x128xi32>
    %94 = arith.ori %89, %93 : vector<1x128xi32>
    %95 = arith.addi %85, %94 : vector<1x128xi32>
    %c805306368_i32 = arith.constant 805306368 : i32
    %96 = vector.broadcast %c805306368_i32 : i32 to vector<1x128xi32>
    %97 = arith.ori %89, %96 : vector<1x128xi32>
    %98 = arith.addi %85, %97 : vector<1x128xi32>
    %c0_i32_21 = arith.constant 0 : i32
    %99 = vector.broadcast %c0_i32_21 : i32 to vector<1x128xi32>
    %100 = arith.cmpi slt, %92, %99 : vector<1x128xi32>
    %c2147483647_i32_22 = arith.constant 2147483647 : i32
    %101 = vector.broadcast %c2147483647_i32_22 : i32 to vector<1x128xi32>
    %102 = arith.xori %92, %101 : vector<1x128xi32>
    %103 = arith.select %100, %102, %92 : vector<1x128xi1>, vector<1x128xi32>
    %104 = tpu.bitcast %103 : vector<1x128xi32> -> vector<1x128xf32>
    %c0_i32_23 = arith.constant 0 : i32
    %105 = vector.broadcast %c0_i32_23 : i32 to vector<1x128xi32>
    %106 = arith.cmpi slt, %95, %105 : vector<1x128xi32>
    %c2147483647_i32_24 = arith.constant 2147483647 : i32
    %107 = vector.broadcast %c2147483647_i32_24 : i32 to vector<1x128xi32>
    %108 = arith.xori %95, %107 : vector<1x128xi32>
    %109 = arith.select %106, %108, %95 : vector<1x128xi1>, vector<1x128xi32>
    %110 = tpu.bitcast %109 : vector<1x128xi32> -> vector<1x128xf32>
    %c0_i32_25 = arith.constant 0 : i32
    %111 = vector.broadcast %c0_i32_25 : i32 to vector<1x128xi32>
    %112 = arith.cmpi slt, %98, %111 : vector<1x128xi32>
    %c2147483647_i32_26 = arith.constant 2147483647 : i32
    %113 = vector.broadcast %c2147483647_i32_26 : i32 to vector<1x128xi32>
    %114 = arith.xori %98, %113 : vector<1x128xi32>
    %115 = arith.select %112, %114, %98 : vector<1x128xi1>, vector<1x128xi32>
    %116 = tpu.bitcast %115 : vector<1x128xi32> -> vector<1x128xf32>
    %c0_i32_27 = arith.constant 0 : i32
    %117 = vector.broadcast %c0_i32_27 : i32 to vector<1x128xi32>
    %c0_i32_28 = arith.constant 0 : i32
    %118 = vector.broadcast %c0_i32_28 : i32 to vector<1x128xi32>
    %c0_i32_29 = arith.constant 0 : i32
    %119 = vector.broadcast %c0_i32_29 : i32 to vector<1x128xi32>
    %120 = vector.broadcast %104 : vector<1x128xf32> to vector<16x128xf32>
    %121 = arith.cmpf oge, %0, %120 : vector<16x128xf32>
    %122 = arith.extui %121 : vector<16x128xi1> to vector<16x128xi32>
    %cst_30 = arith.constant dense<0> : vector<128xi32>
    %123 = vector.multi_reduction <add>, %122, %cst_30 [0] : vector<16x128xi32> to vector<128xi32>
    %124 = vector.shape_cast %123 : vector<128xi32> to vector<1x128xi32>
    %125 = arith.addi %117, %124 : vector<1x128xi32>
    %126 = vector.broadcast %110 : vector<1x128xf32> to vector<16x128xf32>
    %127 = arith.cmpf oge, %0, %126 : vector<16x128xf32>
    %128 = arith.extui %127 : vector<16x128xi1> to vector<16x128xi32>
    %cst_31 = arith.constant dense<0> : vector<128xi32>
    %129 = vector.multi_reduction <add>, %128, %cst_31 [0] : vector<16x128xi32> to vector<128xi32>
    %130 = vector.shape_cast %129 : vector<128xi32> to vector<1x128xi32>
    %131 = arith.addi %118, %130 : vector<1x128xi32>
    %132 = vector.broadcast %116 : vector<1x128xf32> to vector<16x128xf32>
    %133 = arith.cmpf oge, %0, %132 : vector<16x128xf32>
    %134 = arith.extui %133 : vector<16x128xi1> to vector<16x128xi32>
    %cst_32 = arith.constant dense<0> : vector<128xi32>
    %135 = vector.multi_reduction <add>, %134, %cst_32 [0] : vector<16x128xi32> to vector<128xi32>
    %136 = vector.shape_cast %135 : vector<128xi32> to vector<1x128xi32>
    %137 = arith.addi %119, %136 : vector<1x128xi32>
    %cst_33 = arith.constant dense<0> : vector<1xi32>
    %138 = vector.multi_reduction <add>, %125, %cst_33 [1] : vector<1x128xi32> to vector<1xi32>
    %139 = vector.shape_cast %138 : vector<1xi32> to vector<1x1xi32>
    %cst_34 = arith.constant dense<0> : vector<1xi32>
    %140 = vector.multi_reduction <add>, %131, %cst_34 [1] : vector<1x128xi32> to vector<1xi32>
    %141 = vector.shape_cast %140 : vector<1xi32> to vector<1x1xi32>
    %cst_35 = arith.constant dense<0> : vector<1xi32>
    %142 = vector.multi_reduction <add>, %137, %cst_35 [1] : vector<1x128xi32> to vector<1xi32>
    %143 = vector.shape_cast %142 : vector<1xi32> to vector<1x1xi32>
    %c100_i32_36 = arith.constant 100 : i32
    %144 = vector.broadcast %c100_i32_36 : i32 to vector<1x1xi32>
    %145 = arith.cmpi sge, %139, %144 : vector<1x1xi32>
    %c2139095040_i32_37 = arith.constant 2139095040 : i32
    %146 = vector.broadcast %c2139095040_i32_37 : i32 to vector<1x128xi32>
    %147 = arith.cmpi sle, %92, %146 : vector<1x128xi32>
    %148 = vector.broadcast %145 : vector<1x1xi1> to vector<1x128xi1>
    %149 = arith.andi %148, %147 : vector<1x128xi1>
    %c-2139095041_i32_38 = arith.constant -2139095041 : i32
    %150 = vector.broadcast %c-2139095041_i32_38 : i32 to vector<1x128xi32>
    %151 = arith.cmpi slt, %92, %150 : vector<1x128xi32>
    %152 = arith.ori %149, %151 : vector<1x128xi1>
    %153 = arith.extui %152 : vector<1x128xi1> to vector<1x128xi32>
    %c100_i32_39 = arith.constant 100 : i32
    %154 = vector.broadcast %c100_i32_39 : i32 to vector<1x1xi32>
    %155 = arith.cmpi sge, %141, %154 : vector<1x1xi32>
    %c2139095040_i32_40 = arith.constant 2139095040 : i32
    %156 = vector.broadcast %c2139095040_i32_40 : i32 to vector<1x128xi32>
    %157 = arith.cmpi sle, %95, %156 : vector<1x128xi32>
    %158 = vector.broadcast %155 : vector<1x1xi1> to vector<1x128xi1>
    %159 = arith.andi %158, %157 : vector<1x128xi1>
    %c-2139095041_i32_41 = arith.constant -2139095041 : i32
    %160 = vector.broadcast %c-2139095041_i32_41 : i32 to vector<1x128xi32>
    %161 = arith.cmpi slt, %95, %160 : vector<1x128xi32>
    %162 = arith.ori %159, %161 : vector<1x128xi1>
    %163 = arith.extui %162 : vector<1x128xi1> to vector<1x128xi32>
    %c100_i32_42 = arith.constant 100 : i32
    %164 = vector.broadcast %c100_i32_42 : i32 to vector<1x1xi32>
    %165 = arith.cmpi sge, %143, %164 : vector<1x1xi32>
    %c2139095040_i32_43 = arith.constant 2139095040 : i32
    %166 = vector.broadcast %c2139095040_i32_43 : i32 to vector<1x128xi32>
    %167 = arith.cmpi sle, %98, %166 : vector<1x128xi32>
    %168 = vector.broadcast %165 : vector<1x1xi1> to vector<1x128xi1>
    %169 = arith.andi %168, %167 : vector<1x128xi1>
    %c-2139095041_i32_44 = arith.constant -2139095041 : i32
    %170 = vector.broadcast %c-2139095041_i32_44 : i32 to vector<1x128xi32>
    %171 = arith.cmpi slt, %98, %170 : vector<1x128xi32>
    %172 = arith.ori %169, %171 : vector<1x128xi1>
    %173 = arith.extui %172 : vector<1x128xi1> to vector<1x128xi32>
    %174 = arith.addi %153, %163 : vector<1x128xi32>
    %175 = arith.addi %174, %173 : vector<1x128xi32>
    %c28_i32 = arith.constant 28 : i32
    %176 = vector.broadcast %c28_i32 : i32 to vector<1x128xi32>
    %177 = arith.shli %175, %176 : vector<1x128xi32>
    %178 = arith.ori %89, %177 : vector<1x128xi32>
    %c67108864_i32 = arith.constant 67108864 : i32
    %179 = vector.broadcast %c67108864_i32 : i32 to vector<1x128xi32>
    %180 = arith.ori %178, %179 : vector<1x128xi32>
    %181 = arith.addi %85, %180 : vector<1x128xi32>
    %c134217728_i32 = arith.constant 134217728 : i32
    %182 = vector.broadcast %c134217728_i32 : i32 to vector<1x128xi32>
    %183 = arith.ori %178, %182 : vector<1x128xi32>
    %184 = arith.addi %85, %183 : vector<1x128xi32>
    %c201326592_i32 = arith.constant 201326592 : i32
    %185 = vector.broadcast %c201326592_i32 : i32 to vector<1x128xi32>
    %186 = arith.ori %178, %185 : vector<1x128xi32>
    %187 = arith.addi %85, %186 : vector<1x128xi32>
    %c0_i32_45 = arith.constant 0 : i32
    %188 = vector.broadcast %c0_i32_45 : i32 to vector<1x128xi32>
    %189 = arith.cmpi slt, %181, %188 : vector<1x128xi32>
    %c2147483647_i32_46 = arith.constant 2147483647 : i32
    %190 = vector.broadcast %c2147483647_i32_46 : i32 to vector<1x128xi32>
    %191 = arith.xori %181, %190 : vector<1x128xi32>
    %192 = arith.select %189, %191, %181 : vector<1x128xi1>, vector<1x128xi32>
    %193 = tpu.bitcast %192 : vector<1x128xi32> -> vector<1x128xf32>
    %c0_i32_47 = arith.constant 0 : i32
    %194 = vector.broadcast %c0_i32_47 : i32 to vector<1x128xi32>
    %195 = arith.cmpi slt, %184, %194 : vector<1x128xi32>
    %c2147483647_i32_48 = arith.constant 2147483647 : i32
    %196 = vector.broadcast %c2147483647_i32_48 : i32 to vector<1x128xi32>
    %197 = arith.xori %184, %196 : vector<1x128xi32>
    %198 = arith.select %195, %197, %184 : vector<1x128xi1>, vector<1x128xi32>
    %199 = tpu.bitcast %198 : vector<1x128xi32> -> vector<1x128xf32>
    %c0_i32_49 = arith.constant 0 : i32
    %200 = vector.broadcast %c0_i32_49 : i32 to vector<1x128xi32>
    %201 = arith.cmpi slt, %187, %200 : vector<1x128xi32>
    %c2147483647_i32_50 = arith.constant 2147483647 : i32
    %202 = vector.broadcast %c2147483647_i32_50 : i32 to vector<1x128xi32>
    %203 = arith.xori %187, %202 : vector<1x128xi32>
    %204 = arith.select %201, %203, %187 : vector<1x128xi1>, vector<1x128xi32>
    %205 = tpu.bitcast %204 : vector<1x128xi32> -> vector<1x128xf32>
    %c0_i32_51 = arith.constant 0 : i32
    %206 = vector.broadcast %c0_i32_51 : i32 to vector<1x128xi32>
    %c0_i32_52 = arith.constant 0 : i32
    %207 = vector.broadcast %c0_i32_52 : i32 to vector<1x128xi32>
    %c0_i32_53 = arith.constant 0 : i32
    %208 = vector.broadcast %c0_i32_53 : i32 to vector<1x128xi32>
    %209 = vector.broadcast %193 : vector<1x128xf32> to vector<16x128xf32>
    %210 = arith.cmpf oge, %0, %209 : vector<16x128xf32>
    %211 = arith.extui %210 : vector<16x128xi1> to vector<16x128xi32>
    %cst_54 = arith.constant dense<0> : vector<128xi32>
    %212 = vector.multi_reduction <add>, %211, %cst_54 [0] : vector<16x128xi32> to vector<128xi32>
    %213 = vector.shape_cast %212 : vector<128xi32> to vector<1x128xi32>
    %214 = arith.addi %206, %213 : vector<1x128xi32>
    %215 = vector.broadcast %199 : vector<1x128xf32> to vector<16x128xf32>
    %216 = arith.cmpf oge, %0, %215 : vector<16x128xf32>
    %217 = arith.extui %216 : vector<16x128xi1> to vector<16x128xi32>
    %cst_55 = arith.constant dense<0> : vector<128xi32>
    %218 = vector.multi_reduction <add>, %217, %cst_55 [0] : vector<16x128xi32> to vector<128xi32>
    %219 = vector.shape_cast %218 : vector<128xi32> to vector<1x128xi32>
    %220 = arith.addi %207, %219 : vector<1x128xi32>
    %221 = vector.broadcast %205 : vector<1x128xf32> to vector<16x128xf32>
    %222 = arith.cmpf oge, %0, %221 : vector<16x128xf32>
    %223 = arith.extui %222 : vector<16x128xi1> to vector<16x128xi32>
    %cst_56 = arith.constant dense<0> : vector<128xi32>
    %224 = vector.multi_reduction <add>, %223, %cst_56 [0] : vector<16x128xi32> to vector<128xi32>
    %225 = vector.shape_cast %224 : vector<128xi32> to vector<1x128xi32>
    %226 = arith.addi %208, %225 : vector<1x128xi32>
    %cst_57 = arith.constant dense<0> : vector<1xi32>
    %227 = vector.multi_reduction <add>, %214, %cst_57 [1] : vector<1x128xi32> to vector<1xi32>
    %228 = vector.shape_cast %227 : vector<1xi32> to vector<1x1xi32>
    %cst_58 = arith.constant dense<0> : vector<1xi32>
    %229 = vector.multi_reduction <add>, %220, %cst_58 [1] : vector<1x128xi32> to vector<1xi32>
    %230 = vector.shape_cast %229 : vector<1xi32> to vector<1x1xi32>
    %cst_59 = arith.constant dense<0> : vector<1xi32>
    %231 = vector.multi_reduction <add>, %226, %cst_59 [1] : vector<1x128xi32> to vector<1xi32>
    %232 = vector.shape_cast %231 : vector<1xi32> to vector<1x1xi32>
    %c100_i32_60 = arith.constant 100 : i32
    %233 = vector.broadcast %c100_i32_60 : i32 to vector<1x1xi32>
    %234 = arith.cmpi sge, %228, %233 : vector<1x1xi32>
    %c2139095040_i32_61 = arith.constant 2139095040 : i32
    %235 = vector.broadcast %c2139095040_i32_61 : i32 to vector<1x128xi32>
    %236 = arith.cmpi sle, %181, %235 : vector<1x128xi32>
    %237 = vector.broadcast %234 : vector<1x1xi1> to vector<1x128xi1>
    %238 = arith.andi %237, %236 : vector<1x128xi1>
    %c-2139095041_i32_62 = arith.constant -2139095041 : i32
    %239 = vector.broadcast %c-2139095041_i32_62 : i32 to vector<1x128xi32>
    %240 = arith.cmpi slt, %181, %239 : vector<1x128xi32>
    %241 = arith.ori %238, %240 : vector<1x128xi1>
    %242 = arith.extui %241 : vector<1x128xi1> to vector<1x128xi32>
    %c100_i32_63 = arith.constant 100 : i32
    %243 = vector.broadcast %c100_i32_63 : i32 to vector<1x1xi32>
    %244 = arith.cmpi sge, %230, %243 : vector<1x1xi32>
    %c2139095040_i32_64 = arith.constant 2139095040 : i32
    %245 = vector.broadcast %c2139095040_i32_64 : i32 to vector<1x128xi32>
    %246 = arith.cmpi sle, %184, %245 : vector<1x128xi32>
    %247 = vector.broadcast %244 : vector<1x1xi1> to vector<1x128xi1>
    %248 = arith.andi %247, %246 : vector<1x128xi1>
    %c-2139095041_i32_65 = arith.constant -2139095041 : i32
    %249 = vector.broadcast %c-2139095041_i32_65 : i32 to vector<1x128xi32>
    %250 = arith.cmpi slt, %184, %249 : vector<1x128xi32>
    %251 = arith.ori %248, %250 : vector<1x128xi1>
    %252 = arith.extui %251 : vector<1x128xi1> to vector<1x128xi32>
    %c100_i32_66 = arith.constant 100 : i32
    %253 = vector.broadcast %c100_i32_66 : i32 to vector<1x1xi32>
    %254 = arith.cmpi sge, %232, %253 : vector<1x1xi32>
    %c2139095040_i32_67 = arith.constant 2139095040 : i32
    %255 = vector.broadcast %c2139095040_i32_67 : i32 to vector<1x128xi32>
    %256 = arith.cmpi sle, %187, %255 : vector<1x128xi32>
    %257 = vector.broadcast %254 : vector<1x1xi1> to vector<1x128xi1>
    %258 = arith.andi %257, %256 : vector<1x128xi1>
    %c-2139095041_i32_68 = arith.constant -2139095041 : i32
    %259 = vector.broadcast %c-2139095041_i32_68 : i32 to vector<1x128xi32>
    %260 = arith.cmpi slt, %187, %259 : vector<1x128xi32>
    %261 = arith.ori %258, %260 : vector<1x128xi1>
    %262 = arith.extui %261 : vector<1x128xi1> to vector<1x128xi32>
    %263 = arith.addi %242, %252 : vector<1x128xi32>
    %264 = arith.addi %263, %262 : vector<1x128xi32>
    %c26_i32 = arith.constant 26 : i32
    %265 = vector.broadcast %c26_i32 : i32 to vector<1x128xi32>
    %266 = arith.shli %264, %265 : vector<1x128xi32>
    %267 = arith.ori %178, %266 : vector<1x128xi32>
    %c16777216_i32 = arith.constant 16777216 : i32
    %268 = vector.broadcast %c16777216_i32 : i32 to vector<1x128xi32>
    %269 = arith.ori %267, %268 : vector<1x128xi32>
    %270 = arith.addi %85, %269 : vector<1x128xi32>
    %c33554432_i32 = arith.constant 33554432 : i32
    %271 = vector.broadcast %c33554432_i32 : i32 to vector<1x128xi32>
    %272 = arith.ori %267, %271 : vector<1x128xi32>
    %273 = arith.addi %85, %272 : vector<1x128xi32>
    %c50331648_i32 = arith.constant 50331648 : i32
    %274 = vector.broadcast %c50331648_i32 : i32 to vector<1x128xi32>
    %275 = arith.ori %267, %274 : vector<1x128xi32>
    %276 = arith.addi %85, %275 : vector<1x128xi32>
    %c0_i32_69 = arith.constant 0 : i32
    %277 = vector.broadcast %c0_i32_69 : i32 to vector<1x128xi32>
    %278 = arith.cmpi slt, %270, %277 : vector<1x128xi32>
    %c2147483647_i32_70 = arith.constant 2147483647 : i32
    %279 = vector.broadcast %c2147483647_i32_70 : i32 to vector<1x128xi32>
    %280 = arith.xori %270, %279 : vector<1x128xi32>
    %281 = arith.select %278, %280, %270 : vector<1x128xi1>, vector<1x128xi32>
    %282 = tpu.bitcast %281 : vector<1x128xi32> -> vector<1x128xf32>
    %c0_i32_71 = arith.constant 0 : i32
    %283 = vector.broadcast %c0_i32_71 : i32 to vector<1x128xi32>
    %284 = arith.cmpi slt, %273, %283 : vector<1x128xi32>
    %c2147483647_i32_72 = arith.constant 2147483647 : i32
    %285 = vector.broadcast %c2147483647_i32_72 : i32 to vector<1x128xi32>
    %286 = arith.xori %273, %285 : vector<1x128xi32>
    %287 = arith.select %284, %286, %273 : vector<1x128xi1>, vector<1x128xi32>
    %288 = tpu.bitcast %287 : vector<1x128xi32> -> vector<1x128xf32>
    %c0_i32_73 = arith.constant 0 : i32
    %289 = vector.broadcast %c0_i32_73 : i32 to vector<1x128xi32>
    %290 = arith.cmpi slt, %276, %289 : vector<1x128xi32>
    %c2147483647_i32_74 = arith.constant 2147483647 : i32
    %291 = vector.broadcast %c2147483647_i32_74 : i32 to vector<1x128xi32>
    %292 = arith.xori %276, %291 : vector<1x128xi32>
    %293 = arith.select %290, %292, %276 : vector<1x128xi1>, vector<1x128xi32>
    %294 = tpu.bitcast %293 : vector<1x128xi32> -> vector<1x128xf32>
    %c0_i32_75 = arith.constant 0 : i32
    %295 = vector.broadcast %c0_i32_75 : i32 to vector<1x128xi32>
    %c0_i32_76 = arith.constant 0 : i32
    %296 = vector.broadcast %c0_i32_76 : i32 to vector<1x128xi32>
    %c0_i32_77 = arith.constant 0 : i32
    %297 = vector.broadcast %c0_i32_77 : i32 to vector<1x128xi32>
    %298 = vector.broadcast %282 : vector<1x128xf32> to vector<16x128xf32>
    %299 = arith.cmpf oge, %0, %298 : vector<16x128xf32>
    %300 = arith.extui %299 : vector<16x128xi1> to vector<16x128xi32>
    %cst_78 = arith.constant dense<0> : vector<128xi32>
    %301 = vector.multi_reduction <add>, %300, %cst_78 [0] : vector<16x128xi32> to vector<128xi32>
    %302 = vector.shape_cast %301 : vector<128xi32> to vector<1x128xi32>
    %303 = arith.addi %295, %302 : vector<1x128xi32>
    %304 = vector.broadcast %288 : vector<1x128xf32> to vector<16x128xf32>
    %305 = arith.cmpf oge, %0, %304 : vector<16x128xf32>
    %306 = arith.extui %305 : vector<16x128xi1> to vector<16x128xi32>
    %cst_79 = arith.constant dense<0> : vector<128xi32>
    %307 = vector.multi_reduction <add>, %306, %cst_79 [0] : vector<16x128xi32> to vector<128xi32>
    %308 = vector.shape_cast %307 : vector<128xi32> to vector<1x128xi32>
    %309 = arith.addi %296, %308 : vector<1x128xi32>
    %310 = vector.broadcast %294 : vector<1x128xf32> to vector<16x128xf32>
    %311 = arith.cmpf oge, %0, %310 : vector<16x128xf32>
    %312 = arith.extui %311 : vector<16x128xi1> to vector<16x128xi32>
    %cst_80 = arith.constant dense<0> : vector<128xi32>
    %313 = vector.multi_reduction <add>, %312, %cst_80 [0] : vector<16x128xi32> to vector<128xi32>
    %314 = vector.shape_cast %313 : vector<128xi32> to vector<1x128xi32>
    %315 = arith.addi %297, %314 : vector<1x128xi32>
    %cst_81 = arith.constant dense<0> : vector<1xi32>
    %316 = vector.multi_reduction <add>, %303, %cst_81 [1] : vector<1x128xi32> to vector<1xi32>
    %317 = vector.shape_cast %316 : vector<1xi32> to vector<1x1xi32>
    %cst_82 = arith.constant dense<0> : vector<1xi32>
    %318 = vector.multi_reduction <add>, %309, %cst_82 [1] : vector<1x128xi32> to vector<1xi32>
    %319 = vector.shape_cast %318 : vector<1xi32> to vector<1x1xi32>
    %cst_83 = arith.constant dense<0> : vector<1xi32>
    %320 = vector.multi_reduction <add>, %315, %cst_83 [1] : vector<1x128xi32> to vector<1xi32>
    %321 = vector.shape_cast %320 : vector<1xi32> to vector<1x1xi32>
    %c100_i32_84 = arith.constant 100 : i32
    %322 = vector.broadcast %c100_i32_84 : i32 to vector<1x1xi32>
    %323 = arith.cmpi sge, %317, %322 : vector<1x1xi32>
    %c2139095040_i32_85 = arith.constant 2139095040 : i32
    %324 = vector.broadcast %c2139095040_i32_85 : i32 to vector<1x128xi32>
    %325 = arith.cmpi sle, %270, %324 : vector<1x128xi32>
    %326 = vector.broadcast %323 : vector<1x1xi1> to vector<1x128xi1>
    %327 = arith.andi %326, %325 : vector<1x128xi1>
    %c-2139095041_i32_86 = arith.constant -2139095041 : i32
    %328 = vector.broadcast %c-2139095041_i32_86 : i32 to vector<1x128xi32>
    %329 = arith.cmpi slt, %270, %328 : vector<1x128xi32>
    %330 = arith.ori %327, %329 : vector<1x128xi1>
    %331 = arith.extui %330 : vector<1x128xi1> to vector<1x128xi32>
    %c100_i32_87 = arith.constant 100 : i32
    %332 = vector.broadcast %c100_i32_87 : i32 to vector<1x1xi32>
    %333 = arith.cmpi sge, %319, %332 : vector<1x1xi32>
    %c2139095040_i32_88 = arith.constant 2139095040 : i32
    %334 = vector.broadcast %c2139095040_i32_88 : i32 to vector<1x128xi32>
    %335 = arith.cmpi sle, %273, %334 : vector<1x128xi32>
    %336 = vector.broadcast %333 : vector<1x1xi1> to vector<1x128xi1>
    %337 = arith.andi %336, %335 : vector<1x128xi1>
    %c-2139095041_i32_89 = arith.constant -2139095041 : i32
    %338 = vector.broadcast %c-2139095041_i32_89 : i32 to vector<1x128xi32>
    %339 = arith.cmpi slt, %273, %338 : vector<1x128xi32>
    %340 = arith.ori %337, %339 : vector<1x128xi1>
    %341 = arith.extui %340 : vector<1x128xi1> to vector<1x128xi32>
    %c100_i32_90 = arith.constant 100 : i32
    %342 = vector.broadcast %c100_i32_90 : i32 to vector<1x1xi32>
    %343 = arith.cmpi sge, %321, %342 : vector<1x1xi32>
    %c2139095040_i32_91 = arith.constant 2139095040 : i32
    %344 = vector.broadcast %c2139095040_i32_91 : i32 to vector<1x128xi32>
    %345 = arith.cmpi sle, %276, %344 : vector<1x128xi32>
    %346 = vector.broadcast %343 : vector<1x1xi1> to vector<1x128xi1>
    %347 = arith.andi %346, %345 : vector<1x128xi1>
    %c-2139095041_i32_92 = arith.constant -2139095041 : i32
    %348 = vector.broadcast %c-2139095041_i32_92 : i32 to vector<1x128xi32>
    %349 = arith.cmpi slt, %276, %348 : vector<1x128xi32>
    %350 = arith.ori %347, %349 : vector<1x128xi1>
    %351 = arith.extui %350 : vector<1x128xi1> to vector<1x128xi32>
    %352 = arith.addi %331, %341 : vector<1x128xi32>
    %353 = arith.addi %352, %351 : vector<1x128xi32>
    %c24_i32 = arith.constant 24 : i32
    %354 = vector.broadcast %c24_i32 : i32 to vector<1x128xi32>
    %355 = arith.shli %353, %354 : vector<1x128xi32>
    %356 = arith.ori %267, %355 : vector<1x128xi32>
    %c4194304_i32 = arith.constant 4194304 : i32
    %357 = vector.broadcast %c4194304_i32 : i32 to vector<1x128xi32>
    %358 = arith.ori %356, %357 : vector<1x128xi32>
    %359 = arith.addi %85, %358 : vector<1x128xi32>
    %c8388608_i32 = arith.constant 8388608 : i32
    %360 = vector.broadcast %c8388608_i32 : i32 to vector<1x128xi32>
    %361 = arith.ori %356, %360 : vector<1x128xi32>
    %362 = arith.addi %85, %361 : vector<1x128xi32>
    %c12582912_i32 = arith.constant 12582912 : i32
    %363 = vector.broadcast %c12582912_i32 : i32 to vector<1x128xi32>
    %364 = arith.ori %356, %363 : vector<1x128xi32>
    %365 = arith.addi %85, %364 : vector<1x128xi32>
    %c0_i32_93 = arith.constant 0 : i32
    %366 = vector.broadcast %c0_i32_93 : i32 to vector<1x128xi32>
    %367 = arith.cmpi slt, %359, %366 : vector<1x128xi32>
    %c2147483647_i32_94 = arith.constant 2147483647 : i32
    %368 = vector.broadcast %c2147483647_i32_94 : i32 to vector<1x128xi32>
    %369 = arith.xori %359, %368 : vector<1x128xi32>
    %370 = arith.select %367, %369, %359 : vector<1x128xi1>, vector<1x128xi32>
    %371 = tpu.bitcast %370 : vector<1x128xi32> -> vector<1x128xf32>
    %c0_i32_95 = arith.constant 0 : i32
    %372 = vector.broadcast %c0_i32_95 : i32 to vector<1x128xi32>
    %373 = arith.cmpi slt, %362, %372 : vector<1x128xi32>
    %c2147483647_i32_96 = arith.constant 2147483647 : i32
    %374 = vector.broadcast %c2147483647_i32_96 : i32 to vector<1x128xi32>
    %375 = arith.xori %362, %374 : vector<1x128xi32>
    %376 = arith.select %373, %375, %362 : vector<1x128xi1>, vector<1x128xi32>
    %377 = tpu.bitcast %376 : vector<1x128xi32> -> vector<1x128xf32>
    %c0_i32_97 = arith.constant 0 : i32
    %378 = vector.broadcast %c0_i32_97 : i32 to vector<1x128xi32>
    %379 = arith.cmpi slt, %365, %378 : vector<1x128xi32>
    %c2147483647_i32_98 = arith.constant 2147483647 : i32
    %380 = vector.broadcast %c2147483647_i32_98 : i32 to vector<1x128xi32>
    %381 = arith.xori %365, %380 : vector<1x128xi32>
    %382 = arith.select %379, %381, %365 : vector<1x128xi1>, vector<1x128xi32>
    %383 = tpu.bitcast %382 : vector<1x128xi32> -> vector<1x128xf32>
    %c0_i32_99 = arith.constant 0 : i32
    %384 = vector.broadcast %c0_i32_99 : i32 to vector<1x128xi32>
    %c0_i32_100 = arith.constant 0 : i32
    %385 = vector.broadcast %c0_i32_100 : i32 to vector<1x128xi32>
    %c0_i32_101 = arith.constant 0 : i32
    %386 = vector.broadcast %c0_i32_101 : i32 to vector<1x128xi32>
    %387 = vector.broadcast %371 : vector<1x128xf32> to vector<16x128xf32>
    %388 = arith.cmpf oge, %0, %387 : vector<16x128xf32>
    %389 = arith.extui %388 : vector<16x128xi1> to vector<16x128xi32>
    %cst_102 = arith.constant dense<0> : vector<128xi32>
    %390 = vector.multi_reduction <add>, %389, %cst_102 [0] : vector<16x128xi32> to vector<128xi32>
    %391 = vector.shape_cast %390 : vector<128xi32> to vector<1x128xi32>
    %392 = arith.addi %384, %391 : vector<1x128xi32>
    %393 = vector.broadcast %377 : vector<1x128xf32> to vector<16x128xf32>
    %394 = arith.cmpf oge, %0, %393 : vector<16x128xf32>
    %395 = arith.extui %394 : vector<16x128xi1> to vector<16x128xi32>
    %cst_103 = arith.constant dense<0> : vector<128xi32>
    %396 = vector.multi_reduction <add>, %395, %cst_103 [0] : vector<16x128xi32> to vector<128xi32>
    %397 = vector.shape_cast %396 : vector<128xi32> to vector<1x128xi32>
    %398 = arith.addi %385, %397 : vector<1x128xi32>
    %399 = vector.broadcast %383 : vector<1x128xf32> to vector<16x128xf32>
    %400 = arith.cmpf oge, %0, %399 : vector<16x128xf32>
    %401 = arith.extui %400 : vector<16x128xi1> to vector<16x128xi32>
    %cst_104 = arith.constant dense<0> : vector<128xi32>
    %402 = vector.multi_reduction <add>, %401, %cst_104 [0] : vector<16x128xi32> to vector<128xi32>
    %403 = vector.shape_cast %402 : vector<128xi32> to vector<1x128xi32>
    %404 = arith.addi %386, %403 : vector<1x128xi32>
    %cst_105 = arith.constant dense<0> : vector<1xi32>
    %405 = vector.multi_reduction <add>, %392, %cst_105 [1] : vector<1x128xi32> to vector<1xi32>
    %406 = vector.shape_cast %405 : vector<1xi32> to vector<1x1xi32>
    %cst_106 = arith.constant dense<0> : vector<1xi32>
    %407 = vector.multi_reduction <add>, %398, %cst_106 [1] : vector<1x128xi32> to vector<1xi32>
    %408 = vector.shape_cast %407 : vector<1xi32> to vector<1x1xi32>
    %cst_107 = arith.constant dense<0> : vector<1xi32>
    %409 = vector.multi_reduction <add>, %404, %cst_107 [1] : vector<1x128xi32> to vector<1xi32>
    %410 = vector.shape_cast %409 : vector<1xi32> to vector<1x1xi32>
    %c100_i32_108 = arith.constant 100 : i32
    %411 = vector.broadcast %c100_i32_108 : i32 to vector<1x1xi32>
    %412 = arith.cmpi sge, %406, %411 : vector<1x1xi32>
    %c2139095040_i32_109 = arith.constant 2139095040 : i32
    %413 = vector.broadcast %c2139095040_i32_109 : i32 to vector<1x128xi32>
    %414 = arith.cmpi sle, %359, %413 : vector<1x128xi32>
    %415 = vector.broadcast %412 : vector<1x1xi1> to vector<1x128xi1>
    %416 = arith.andi %415, %414 : vector<1x128xi1>
    %c-2139095041_i32_110 = arith.constant -2139095041 : i32
    %417 = vector.broadcast %c-2139095041_i32_110 : i32 to vector<1x128xi32>
    %418 = arith.cmpi slt, %359, %417 : vector<1x128xi32>
    %419 = arith.ori %416, %418 : vector<1x128xi1>
    %420 = arith.extui %419 : vector<1x128xi1> to vector<1x128xi32>
    %c100_i32_111 = arith.constant 100 : i32
    %421 = vector.broadcast %c100_i32_111 : i32 to vector<1x1xi32>
    %422 = arith.cmpi sge, %408, %421 : vector<1x1xi32>
    %c2139095040_i32_112 = arith.constant 2139095040 : i32
    %423 = vector.broadcast %c2139095040_i32_112 : i32 to vector<1x128xi32>
    %424 = arith.cmpi sle, %362, %423 : vector<1x128xi32>
    %425 = vector.broadcast %422 : vector<1x1xi1> to vector<1x128xi1>
    %426 = arith.andi %425, %424 : vector<1x128xi1>
    %c-2139095041_i32_113 = arith.constant -2139095041 : i32
    %427 = vector.broadcast %c-2139095041_i32_113 : i32 to vector<1x128xi32>
    %428 = arith.cmpi slt, %362, %427 : vector<1x128xi32>
    %429 = arith.ori %426, %428 : vector<1x128xi1>
    %430 = arith.extui %429 : vector<1x128xi1> to vector<1x128xi32>
    %c100_i32_114 = arith.constant 100 : i32
    %431 = vector.broadcast %c100_i32_114 : i32 to vector<1x1xi32>
    %432 = arith.cmpi sge, %410, %431 : vector<1x1xi32>
    %c2139095040_i32_115 = arith.constant 2139095040 : i32
    %433 = vector.broadcast %c2139095040_i32_115 : i32 to vector<1x128xi32>
    %434 = arith.cmpi sle, %365, %433 : vector<1x128xi32>
    %435 = vector.broadcast %432 : vector<1x1xi1> to vector<1x128xi1>
    %436 = arith.andi %435, %434 : vector<1x128xi1>
    %c-2139095041_i32_116 = arith.constant -2139095041 : i32
    %437 = vector.broadcast %c-2139095041_i32_116 : i32 to vector<1x128xi32>
    %438 = arith.cmpi slt, %365, %437 : vector<1x128xi32>
    %439 = arith.ori %436, %438 : vector<1x128xi1>
    %440 = arith.extui %439 : vector<1x128xi1> to vector<1x128xi32>
    %441 = arith.addi %420, %430 : vector<1x128xi32>
    %442 = arith.addi %441, %440 : vector<1x128xi32>
    %c22_i32 = arith.constant 22 : i32
    %443 = vector.broadcast %c22_i32 : i32 to vector<1x128xi32>
    %444 = arith.shli %442, %443 : vector<1x128xi32>
    %445 = arith.ori %356, %444 : vector<1x128xi32>
    %c1048576_i32 = arith.constant 1048576 : i32
    %446 = vector.broadcast %c1048576_i32 : i32 to vector<1x128xi32>
    %447 = arith.ori %445, %446 : vector<1x128xi32>
    %448 = arith.addi %85, %447 : vector<1x128xi32>
    %c2097152_i32 = arith.constant 2097152 : i32
    %449 = vector.broadcast %c2097152_i32 : i32 to vector<1x128xi32>
    %450 = arith.ori %445, %449 : vector<1x128xi32>
    %451 = arith.addi %85, %450 : vector<1x128xi32>
    %c3145728_i32 = arith.constant 3145728 : i32
    %452 = vector.broadcast %c3145728_i32 : i32 to vector<1x128xi32>
    %453 = arith.ori %445, %452 : vector<1x128xi32>
    %454 = arith.addi %85, %453 : vector<1x128xi32>
    %c0_i32_117 = arith.constant 0 : i32
    %455 = vector.broadcast %c0_i32_117 : i32 to vector<1x128xi32>
    %456 = arith.cmpi slt, %448, %455 : vector<1x128xi32>
    %c2147483647_i32_118 = arith.constant 2147483647 : i32
    %457 = vector.broadcast %c2147483647_i32_118 : i32 to vector<1x128xi32>
    %458 = arith.xori %448, %457 : vector<1x128xi32>
    %459 = arith.select %456, %458, %448 : vector<1x128xi1>, vector<1x128xi32>
    %460 = tpu.bitcast %459 : vector<1x128xi32> -> vector<1x128xf32>
    %c0_i32_119 = arith.constant 0 : i32
    %461 = vector.broadcast %c0_i32_119 : i32 to vector<1x128xi32>
    %462 = arith.cmpi slt, %451, %461 : vector<1x128xi32>
    %c2147483647_i32_120 = arith.constant 2147483647 : i32
    %463 = vector.broadcast %c2147483647_i32_120 : i32 to vector<1x128xi32>
    %464 = arith.xori %451, %463 : vector<1x128xi32>
    %465 = arith.select %462, %464, %451 : vector<1x128xi1>, vector<1x128xi32>
    %466 = tpu.bitcast %465 : vector<1x128xi32> -> vector<1x128xf32>
    %c0_i32_121 = arith.constant 0 : i32
    %467 = vector.broadcast %c0_i32_121 : i32 to vector<1x128xi32>
    %468 = arith.cmpi slt, %454, %467 : vector<1x128xi32>
    %c2147483647_i32_122 = arith.constant 2147483647 : i32
    %469 = vector.broadcast %c2147483647_i32_122 : i32 to vector<1x128xi32>
    %470 = arith.xori %454, %469 : vector<1x128xi32>
    %471 = arith.select %468, %470, %454 : vector<1x128xi1>, vector<1x128xi32>
    %472 = tpu.bitcast %471 : vector<1x128xi32> -> vector<1x128xf32>
    %c0_i32_123 = arith.constant 0 : i32
    %473 = vector.broadcast %c0_i32_123 : i32 to vector<1x128xi32>
    %c0_i32_124 = arith.constant 0 : i32
    %474 = vector.broadcast %c0_i32_124 : i32 to vector<1x128xi32>
    %c0_i32_125 = arith.constant 0 : i32
    %475 = vector.broadcast %c0_i32_125 : i32 to vector<1x128xi32>
    %476 = vector.broadcast %460 : vector<1x128xf32> to vector<16x128xf32>
    %477 = arith.cmpf oge, %0, %476 : vector<16x128xf32>
    %478 = arith.extui %477 : vector<16x128xi1> to vector<16x128xi32>
    %cst_126 = arith.constant dense<0> : vector<128xi32>
    %479 = vector.multi_reduction <add>, %478, %cst_126 [0] : vector<16x128xi32> to vector<128xi32>
    %480 = vector.shape_cast %479 : vector<128xi32> to vector<1x128xi32>
    %481 = arith.addi %473, %480 : vector<1x128xi32>
    %482 = vector.broadcast %466 : vector<1x128xf32> to vector<16x128xf32>
    %483 = arith.cmpf oge, %0, %482 : vector<16x128xf32>
    %484 = arith.extui %483 : vector<16x128xi1> to vector<16x128xi32>
    %cst_127 = arith.constant dense<0> : vector<128xi32>
    %485 = vector.multi_reduction <add>, %484, %cst_127 [0] : vector<16x128xi32> to vector<128xi32>
    %486 = vector.shape_cast %485 : vector<128xi32> to vector<1x128xi32>
    %487 = arith.addi %474, %486 : vector<1x128xi32>
    %488 = vector.broadcast %472 : vector<1x128xf32> to vector<16x128xf32>
    %489 = arith.cmpf oge, %0, %488 : vector<16x128xf32>
    %490 = arith.extui %489 : vector<16x128xi1> to vector<16x128xi32>
    %cst_128 = arith.constant dense<0> : vector<128xi32>
    %491 = vector.multi_reduction <add>, %490, %cst_128 [0] : vector<16x128xi32> to vector<128xi32>
    %492 = vector.shape_cast %491 : vector<128xi32> to vector<1x128xi32>
    %493 = arith.addi %475, %492 : vector<1x128xi32>
    %cst_129 = arith.constant dense<0> : vector<1xi32>
    %494 = vector.multi_reduction <add>, %481, %cst_129 [1] : vector<1x128xi32> to vector<1xi32>
    %495 = vector.shape_cast %494 : vector<1xi32> to vector<1x1xi32>
    %cst_130 = arith.constant dense<0> : vector<1xi32>
    %496 = vector.multi_reduction <add>, %487, %cst_130 [1] : vector<1x128xi32> to vector<1xi32>
    %497 = vector.shape_cast %496 : vector<1xi32> to vector<1x1xi32>
    %cst_131 = arith.constant dense<0> : vector<1xi32>
    %498 = vector.multi_reduction <add>, %493, %cst_131 [1] : vector<1x128xi32> to vector<1xi32>
    %499 = vector.shape_cast %498 : vector<1xi32> to vector<1x1xi32>
    %c100_i32_132 = arith.constant 100 : i32
    %500 = vector.broadcast %c100_i32_132 : i32 to vector<1x1xi32>
    %501 = arith.cmpi sge, %495, %500 : vector<1x1xi32>
    %c2139095040_i32_133 = arith.constant 2139095040 : i32
    %502 = vector.broadcast %c2139095040_i32_133 : i32 to vector<1x128xi32>
    %503 = arith.cmpi sle, %448, %502 : vector<1x128xi32>
    %504 = vector.broadcast %501 : vector<1x1xi1> to vector<1x128xi1>
    %505 = arith.andi %504, %503 : vector<1x128xi1>
    %c-2139095041_i32_134 = arith.constant -2139095041 : i32
    %506 = vector.broadcast %c-2139095041_i32_134 : i32 to vector<1x128xi32>
    %507 = arith.cmpi slt, %448, %506 : vector<1x128xi32>
    %508 = arith.ori %505, %507 : vector<1x128xi1>
    %509 = arith.extui %508 : vector<1x128xi1> to vector<1x128xi32>
    %c100_i32_135 = arith.constant 100 : i32
    %510 = vector.broadcast %c100_i32_135 : i32 to vector<1x1xi32>
    %511 = arith.cmpi sge, %497, %510 : vector<1x1xi32>
    %c2139095040_i32_136 = arith.constant 2139095040 : i32
    %512 = vector.broadcast %c2139095040_i32_136 : i32 to vector<1x128xi32>
    %513 = arith.cmpi sle, %451, %512 : vector<1x128xi32>
    %514 = vector.broadcast %511 : vector<1x1xi1> to vector<1x128xi1>
    %515 = arith.andi %514, %513 : vector<1x128xi1>
    %c-2139095041_i32_137 = arith.constant -2139095041 : i32
    %516 = vector.broadcast %c-2139095041_i32_137 : i32 to vector<1x128xi32>
    %517 = arith.cmpi slt, %451, %516 : vector<1x128xi32>
    %518 = arith.ori %515, %517 : vector<1x128xi1>
    %519 = arith.extui %518 : vector<1x128xi1> to vector<1x128xi32>
    %c100_i32_138 = arith.constant 100 : i32
    %520 = vector.broadcast %c100_i32_138 : i32 to vector<1x1xi32>
    %521 = arith.cmpi sge, %499, %520 : vector<1x1xi32>
    %c2139095040_i32_139 = arith.constant 2139095040 : i32
    %522 = vector.broadcast %c2139095040_i32_139 : i32 to vector<1x128xi32>
    %523 = arith.cmpi sle, %454, %522 : vector<1x128xi32>
    %524 = vector.broadcast %521 : vector<1x1xi1> to vector<1x128xi1>
    %525 = arith.andi %524, %523 : vector<1x128xi1>
    %c-2139095041_i32_140 = arith.constant -2139095041 : i32
    %526 = vector.broadcast %c-2139095041_i32_140 : i32 to vector<1x128xi32>
    %527 = arith.cmpi slt, %454, %526 : vector<1x128xi32>
    %528 = arith.ori %525, %527 : vector<1x128xi1>
    %529 = arith.extui %528 : vector<1x128xi1> to vector<1x128xi32>
    %530 = arith.addi %509, %519 : vector<1x128xi32>
    %531 = arith.addi %530, %529 : vector<1x128xi32>
    %c20_i32 = arith.constant 20 : i32
    %532 = vector.broadcast %c20_i32 : i32 to vector<1x128xi32>
    %533 = arith.shli %531, %532 : vector<1x128xi32>
    %534 = arith.ori %445, %533 : vector<1x128xi32>
    %c262144_i32 = arith.constant 262144 : i32
    %535 = vector.broadcast %c262144_i32 : i32 to vector<1x128xi32>
    %536 = arith.ori %534, %535 : vector<1x128xi32>
    %537 = arith.addi %85, %536 : vector<1x128xi32>
    %c524288_i32 = arith.constant 524288 : i32
    %538 = vector.broadcast %c524288_i32 : i32 to vector<1x128xi32>
    %539 = arith.ori %534, %538 : vector<1x128xi32>
    %540 = arith.addi %85, %539 : vector<1x128xi32>
    %c786432_i32 = arith.constant 786432 : i32
    %541 = vector.broadcast %c786432_i32 : i32 to vector<1x128xi32>
    %542 = arith.ori %534, %541 : vector<1x128xi32>
    %543 = arith.addi %85, %542 : vector<1x128xi32>
    %c0_i32_141 = arith.constant 0 : i32
    %544 = vector.broadcast %c0_i32_141 : i32 to vector<1x128xi32>
    %545 = arith.cmpi slt, %537, %544 : vector<1x128xi32>
    %c2147483647_i32_142 = arith.constant 2147483647 : i32
    %546 = vector.broadcast %c2147483647_i32_142 : i32 to vector<1x128xi32>
    %547 = arith.xori %537, %546 : vector<1x128xi32>
    %548 = arith.select %545, %547, %537 : vector<1x128xi1>, vector<1x128xi32>
    %549 = tpu.bitcast %548 : vector<1x128xi32> -> vector<1x128xf32>
    %c0_i32_143 = arith.constant 0 : i32
    %550 = vector.broadcast %c0_i32_143 : i32 to vector<1x128xi32>
    %551 = arith.cmpi slt, %540, %550 : vector<1x128xi32>
    %c2147483647_i32_144 = arith.constant 2147483647 : i32
    %552 = vector.broadcast %c2147483647_i32_144 : i32 to vector<1x128xi32>
    %553 = arith.xori %540, %552 : vector<1x128xi32>
    %554 = arith.select %551, %553, %540 : vector<1x128xi1>, vector<1x128xi32>
    %555 = tpu.bitcast %554 : vector<1x128xi32> -> vector<1x128xf32>
    %c0_i32_145 = arith.constant 0 : i32
    %556 = vector.broadcast %c0_i32_145 : i32 to vector<1x128xi32>
    %557 = arith.cmpi slt, %543, %556 : vector<1x128xi32>
    %c2147483647_i32_146 = arith.constant 2147483647 : i32
    %558 = vector.broadcast %c2147483647_i32_146 : i32 to vector<1x128xi32>
    %559 = arith.xori %543, %558 : vector<1x128xi32>
    %560 = arith.select %557, %559, %543 : vector<1x128xi1>, vector<1x128xi32>
    %561 = tpu.bitcast %560 : vector<1x128xi32> -> vector<1x128xf32>
    %c0_i32_147 = arith.constant 0 : i32
    %562 = vector.broadcast %c0_i32_147 : i32 to vector<1x128xi32>
    %c0_i32_148 = arith.constant 0 : i32
    %563 = vector.broadcast %c0_i32_148 : i32 to vector<1x128xi32>
    %c0_i32_149 = arith.constant 0 : i32
    %564 = vector.broadcast %c0_i32_149 : i32 to vector<1x128xi32>
    %565 = vector.broadcast %549 : vector<1x128xf32> to vector<16x128xf32>
    %566 = arith.cmpf oge, %0, %565 : vector<16x128xf32>
    %567 = arith.extui %566 : vector<16x128xi1> to vector<16x128xi32>
    %cst_150 = arith.constant dense<0> : vector<128xi32>
    %568 = vector.multi_reduction <add>, %567, %cst_150 [0] : vector<16x128xi32> to vector<128xi32>
    %569 = vector.shape_cast %568 : vector<128xi32> to vector<1x128xi32>
    %570 = arith.addi %562, %569 : vector<1x128xi32>
    %571 = vector.broadcast %555 : vector<1x128xf32> to vector<16x128xf32>
    %572 = arith.cmpf oge, %0, %571 : vector<16x128xf32>
    %573 = arith.extui %572 : vector<16x128xi1> to vector<16x128xi32>
    %cst_151 = arith.constant dense<0> : vector<128xi32>
    %574 = vector.multi_reduction <add>, %573, %cst_151 [0] : vector<16x128xi32> to vector<128xi32>
    %575 = vector.shape_cast %574 : vector<128xi32> to vector<1x128xi32>
    %576 = arith.addi %563, %575 : vector<1x128xi32>
    %577 = vector.broadcast %561 : vector<1x128xf32> to vector<16x128xf32>
    %578 = arith.cmpf oge, %0, %577 : vector<16x128xf32>
    %579 = arith.extui %578 : vector<16x128xi1> to vector<16x128xi32>
    %cst_152 = arith.constant dense<0> : vector<128xi32>
    %580 = vector.multi_reduction <add>, %579, %cst_152 [0] : vector<16x128xi32> to vector<128xi32>
    %581 = vector.shape_cast %580 : vector<128xi32> to vector<1x128xi32>
    %582 = arith.addi %564, %581 : vector<1x128xi32>
    %cst_153 = arith.constant dense<0> : vector<1xi32>
    %583 = vector.multi_reduction <add>, %570, %cst_153 [1] : vector<1x128xi32> to vector<1xi32>
    %584 = vector.shape_cast %583 : vector<1xi32> to vector<1x1xi32>
    %cst_154 = arith.constant dense<0> : vector<1xi32>
    %585 = vector.multi_reduction <add>, %576, %cst_154 [1] : vector<1x128xi32> to vector<1xi32>
    %586 = vector.shape_cast %585 : vector<1xi32> to vector<1x1xi32>
    %cst_155 = arith.constant dense<0> : vector<1xi32>
    %587 = vector.multi_reduction <add>, %582, %cst_155 [1] : vector<1x128xi32> to vector<1xi32>
    %588 = vector.shape_cast %587 : vector<1xi32> to vector<1x1xi32>
    %c100_i32_156 = arith.constant 100 : i32
    %589 = vector.broadcast %c100_i32_156 : i32 to vector<1x1xi32>
    %590 = arith.cmpi sge, %584, %589 : vector<1x1xi32>
    %c2139095040_i32_157 = arith.constant 2139095040 : i32
    %591 = vector.broadcast %c2139095040_i32_157 : i32 to vector<1x128xi32>
    %592 = arith.cmpi sle, %537, %591 : vector<1x128xi32>
    %593 = vector.broadcast %590 : vector<1x1xi1> to vector<1x128xi1>
    %594 = arith.andi %593, %592 : vector<1x128xi1>
    %c-2139095041_i32_158 = arith.constant -2139095041 : i32
    %595 = vector.broadcast %c-2139095041_i32_158 : i32 to vector<1x128xi32>
    %596 = arith.cmpi slt, %537, %595 : vector<1x128xi32>
    %597 = arith.ori %594, %596 : vector<1x128xi1>
    %598 = arith.extui %597 : vector<1x128xi1> to vector<1x128xi32>
    %c100_i32_159 = arith.constant 100 : i32
    %599 = vector.broadcast %c100_i32_159 : i32 to vector<1x1xi32>
    %600 = arith.cmpi sge, %586, %599 : vector<1x1xi32>
    %c2139095040_i32_160 = arith.constant 2139095040 : i32
    %601 = vector.broadcast %c2139095040_i32_160 : i32 to vector<1x128xi32>
    %602 = arith.cmpi sle, %540, %601 : vector<1x128xi32>
    %603 = vector.broadcast %600 : vector<1x1xi1> to vector<1x128xi1>
    %604 = arith.andi %603, %602 : vector<1x128xi1>
    %c-2139095041_i32_161 = arith.constant -2139095041 : i32
    %605 = vector.broadcast %c-2139095041_i32_161 : i32 to vector<1x128xi32>
    %606 = arith.cmpi slt, %540, %605 : vector<1x128xi32>
    %607 = arith.ori %604, %606 : vector<1x128xi1>
    %608 = arith.extui %607 : vector<1x128xi1> to vector<1x128xi32>
    %c100_i32_162 = arith.constant 100 : i32
    %609 = vector.broadcast %c100_i32_162 : i32 to vector<1x1xi32>
    %610 = arith.cmpi sge, %588, %609 : vector<1x1xi32>
    %c2139095040_i32_163 = arith.constant 2139095040 : i32
    %611 = vector.broadcast %c2139095040_i32_163 : i32 to vector<1x128xi32>
    %612 = arith.cmpi sle, %543, %611 : vector<1x128xi32>
    %613 = vector.broadcast %610 : vector<1x1xi1> to vector<1x128xi1>
    %614 = arith.andi %613, %612 : vector<1x128xi1>
    %c-2139095041_i32_164 = arith.constant -2139095041 : i32
    %615 = vector.broadcast %c-2139095041_i32_164 : i32 to vector<1x128xi32>
    %616 = arith.cmpi slt, %543, %615 : vector<1x128xi32>
    %617 = arith.ori %614, %616 : vector<1x128xi1>
    %618 = arith.extui %617 : vector<1x128xi1> to vector<1x128xi32>
    %619 = arith.addi %598, %608 : vector<1x128xi32>
    %620 = arith.addi %619, %618 : vector<1x128xi32>
    %c18_i32 = arith.constant 18 : i32
    %621 = vector.broadcast %c18_i32 : i32 to vector<1x128xi32>
    %622 = arith.shli %620, %621 : vector<1x128xi32>
    %623 = arith.ori %534, %622 : vector<1x128xi32>
    %c65536_i32 = arith.constant 65536 : i32
    %624 = vector.broadcast %c65536_i32 : i32 to vector<1x128xi32>
    %625 = arith.ori %623, %624 : vector<1x128xi32>
    %626 = arith.addi %85, %625 : vector<1x128xi32>
    %c131072_i32 = arith.constant 131072 : i32
    %627 = vector.broadcast %c131072_i32 : i32 to vector<1x128xi32>
    %628 = arith.ori %623, %627 : vector<1x128xi32>
    %629 = arith.addi %85, %628 : vector<1x128xi32>
    %c196608_i32 = arith.constant 196608 : i32
    %630 = vector.broadcast %c196608_i32 : i32 to vector<1x128xi32>
    %631 = arith.ori %623, %630 : vector<1x128xi32>
    %632 = arith.addi %85, %631 : vector<1x128xi32>
    %c0_i32_165 = arith.constant 0 : i32
    %633 = vector.broadcast %c0_i32_165 : i32 to vector<1x128xi32>
    %634 = arith.cmpi slt, %626, %633 : vector<1x128xi32>
    %c2147483647_i32_166 = arith.constant 2147483647 : i32
    %635 = vector.broadcast %c2147483647_i32_166 : i32 to vector<1x128xi32>
    %636 = arith.xori %626, %635 : vector<1x128xi32>
    %637 = arith.select %634, %636, %626 : vector<1x128xi1>, vector<1x128xi32>
    %638 = tpu.bitcast %637 : vector<1x128xi32> -> vector<1x128xf32>
    %c0_i32_167 = arith.constant 0 : i32
    %639 = vector.broadcast %c0_i32_167 : i32 to vector<1x128xi32>
    %640 = arith.cmpi slt, %629, %639 : vector<1x128xi32>
    %c2147483647_i32_168 = arith.constant 2147483647 : i32
    %641 = vector.broadcast %c2147483647_i32_168 : i32 to vector<1x128xi32>
    %642 = arith.xori %629, %641 : vector<1x128xi32>
    %643 = arith.select %640, %642, %629 : vector<1x128xi1>, vector<1x128xi32>
    %644 = tpu.bitcast %643 : vector<1x128xi32> -> vector<1x128xf32>
    %c0_i32_169 = arith.constant 0 : i32
    %645 = vector.broadcast %c0_i32_169 : i32 to vector<1x128xi32>
    %646 = arith.cmpi slt, %632, %645 : vector<1x128xi32>
    %c2147483647_i32_170 = arith.constant 2147483647 : i32
    %647 = vector.broadcast %c2147483647_i32_170 : i32 to vector<1x128xi32>
    %648 = arith.xori %632, %647 : vector<1x128xi32>
    %649 = arith.select %646, %648, %632 : vector<1x128xi1>, vector<1x128xi32>
    %650 = tpu.bitcast %649 : vector<1x128xi32> -> vector<1x128xf32>
    %c0_i32_171 = arith.constant 0 : i32
    %651 = vector.broadcast %c0_i32_171 : i32 to vector<1x128xi32>
    %c0_i32_172 = arith.constant 0 : i32
    %652 = vector.broadcast %c0_i32_172 : i32 to vector<1x128xi32>
    %c0_i32_173 = arith.constant 0 : i32
    %653 = vector.broadcast %c0_i32_173 : i32 to vector<1x128xi32>
    %654 = vector.broadcast %638 : vector<1x128xf32> to vector<16x128xf32>
    %655 = arith.cmpf oge, %0, %654 : vector<16x128xf32>
    %656 = arith.extui %655 : vector<16x128xi1> to vector<16x128xi32>
    %cst_174 = arith.constant dense<0> : vector<128xi32>
    %657 = vector.multi_reduction <add>, %656, %cst_174 [0] : vector<16x128xi32> to vector<128xi32>
    %658 = vector.shape_cast %657 : vector<128xi32> to vector<1x128xi32>
    %659 = arith.addi %651, %658 : vector<1x128xi32>
    %660 = vector.broadcast %644 : vector<1x128xf32> to vector<16x128xf32>
    %661 = arith.cmpf oge, %0, %660 : vector<16x128xf32>
    %662 = arith.extui %661 : vector<16x128xi1> to vector<16x128xi32>
    %cst_175 = arith.constant dense<0> : vector<128xi32>
    %663 = vector.multi_reduction <add>, %662, %cst_175 [0] : vector<16x128xi32> to vector<128xi32>
    %664 = vector.shape_cast %663 : vector<128xi32> to vector<1x128xi32>
    %665 = arith.addi %652, %664 : vector<1x128xi32>
    %666 = vector.broadcast %650 : vector<1x128xf32> to vector<16x128xf32>
    %667 = arith.cmpf oge, %0, %666 : vector<16x128xf32>
    %668 = arith.extui %667 : vector<16x128xi1> to vector<16x128xi32>
    %cst_176 = arith.constant dense<0> : vector<128xi32>
    %669 = vector.multi_reduction <add>, %668, %cst_176 [0] : vector<16x128xi32> to vector<128xi32>
    %670 = vector.shape_cast %669 : vector<128xi32> to vector<1x128xi32>
    %671 = arith.addi %653, %670 : vector<1x128xi32>
    %cst_177 = arith.constant dense<0> : vector<1xi32>
    %672 = vector.multi_reduction <add>, %659, %cst_177 [1] : vector<1x128xi32> to vector<1xi32>
    %673 = vector.shape_cast %672 : vector<1xi32> to vector<1x1xi32>
    %cst_178 = arith.constant dense<0> : vector<1xi32>
    %674 = vector.multi_reduction <add>, %665, %cst_178 [1] : vector<1x128xi32> to vector<1xi32>
    %675 = vector.shape_cast %674 : vector<1xi32> to vector<1x1xi32>
    %cst_179 = arith.constant dense<0> : vector<1xi32>
    %676 = vector.multi_reduction <add>, %671, %cst_179 [1] : vector<1x128xi32> to vector<1xi32>
    %677 = vector.shape_cast %676 : vector<1xi32> to vector<1x1xi32>
    %c100_i32_180 = arith.constant 100 : i32
    %678 = vector.broadcast %c100_i32_180 : i32 to vector<1x1xi32>
    %679 = arith.cmpi sge, %673, %678 : vector<1x1xi32>
    %c2139095040_i32_181 = arith.constant 2139095040 : i32
    %680 = vector.broadcast %c2139095040_i32_181 : i32 to vector<1x128xi32>
    %681 = arith.cmpi sle, %626, %680 : vector<1x128xi32>
    %682 = vector.broadcast %679 : vector<1x1xi1> to vector<1x128xi1>
    %683 = arith.andi %682, %681 : vector<1x128xi1>
    %c-2139095041_i32_182 = arith.constant -2139095041 : i32
    %684 = vector.broadcast %c-2139095041_i32_182 : i32 to vector<1x128xi32>
    %685 = arith.cmpi slt, %626, %684 : vector<1x128xi32>
    %686 = arith.ori %683, %685 : vector<1x128xi1>
    %687 = arith.extui %686 : vector<1x128xi1> to vector<1x128xi32>
    %c100_i32_183 = arith.constant 100 : i32
    %688 = vector.broadcast %c100_i32_183 : i32 to vector<1x1xi32>
    %689 = arith.cmpi sge, %675, %688 : vector<1x1xi32>
    %c2139095040_i32_184 = arith.constant 2139095040 : i32
    %690 = vector.broadcast %c2139095040_i32_184 : i32 to vector<1x128xi32>
    %691 = arith.cmpi sle, %629, %690 : vector<1x128xi32>
    %692 = vector.broadcast %689 : vector<1x1xi1> to vector<1x128xi1>
    %693 = arith.andi %692, %691 : vector<1x128xi1>
    %c-2139095041_i32_185 = arith.constant -2139095041 : i32
    %694 = vector.broadcast %c-2139095041_i32_185 : i32 to vector<1x128xi32>
    %695 = arith.cmpi slt, %629, %694 : vector<1x128xi32>
    %696 = arith.ori %693, %695 : vector<1x128xi1>
    %697 = arith.extui %696 : vector<1x128xi1> to vector<1x128xi32>
    %c100_i32_186 = arith.constant 100 : i32
    %698 = vector.broadcast %c100_i32_186 : i32 to vector<1x1xi32>
    %699 = arith.cmpi sge, %677, %698 : vector<1x1xi32>
    %c2139095040_i32_187 = arith.constant 2139095040 : i32
    %700 = vector.broadcast %c2139095040_i32_187 : i32 to vector<1x128xi32>
    %701 = arith.cmpi sle, %632, %700 : vector<1x128xi32>
    %702 = vector.broadcast %699 : vector<1x1xi1> to vector<1x128xi1>
    %703 = arith.andi %702, %701 : vector<1x128xi1>
    %c-2139095041_i32_188 = arith.constant -2139095041 : i32
    %704 = vector.broadcast %c-2139095041_i32_188 : i32 to vector<1x128xi32>
    %705 = arith.cmpi slt, %632, %704 : vector<1x128xi32>
    %706 = arith.ori %703, %705 : vector<1x128xi1>
    %707 = arith.extui %706 : vector<1x128xi1> to vector<1x128xi32>
    %708 = arith.addi %687, %697 : vector<1x128xi32>
    %709 = arith.addi %708, %707 : vector<1x128xi32>
    %c16_i32 = arith.constant 16 : i32
    %710 = vector.broadcast %c16_i32 : i32 to vector<1x128xi32>
    %711 = arith.shli %709, %710 : vector<1x128xi32>
    %712 = arith.ori %623, %711 : vector<1x128xi32>
    %c16384_i32 = arith.constant 16384 : i32
    %713 = vector.broadcast %c16384_i32 : i32 to vector<1x128xi32>
    %714 = arith.ori %712, %713 : vector<1x128xi32>
    %715 = arith.addi %85, %714 : vector<1x128xi32>
    %c32768_i32 = arith.constant 32768 : i32
    %716 = vector.broadcast %c32768_i32 : i32 to vector<1x128xi32>
    %717 = arith.ori %712, %716 : vector<1x128xi32>
    %718 = arith.addi %85, %717 : vector<1x128xi32>
    %c49152_i32 = arith.constant 49152 : i32
    %719 = vector.broadcast %c49152_i32 : i32 to vector<1x128xi32>
    %720 = arith.ori %712, %719 : vector<1x128xi32>
    %721 = arith.addi %85, %720 : vector<1x128xi32>
    %c0_i32_189 = arith.constant 0 : i32
    %722 = vector.broadcast %c0_i32_189 : i32 to vector<1x128xi32>
    %723 = arith.cmpi slt, %715, %722 : vector<1x128xi32>
    %c2147483647_i32_190 = arith.constant 2147483647 : i32
    %724 = vector.broadcast %c2147483647_i32_190 : i32 to vector<1x128xi32>
    %725 = arith.xori %715, %724 : vector<1x128xi32>
    %726 = arith.select %723, %725, %715 : vector<1x128xi1>, vector<1x128xi32>
    %727 = tpu.bitcast %726 : vector<1x128xi32> -> vector<1x128xf32>
    %c0_i32_191 = arith.constant 0 : i32
    %728 = vector.broadcast %c0_i32_191 : i32 to vector<1x128xi32>
    %729 = arith.cmpi slt, %718, %728 : vector<1x128xi32>
    %c2147483647_i32_192 = arith.constant 2147483647 : i32
    %730 = vector.broadcast %c2147483647_i32_192 : i32 to vector<1x128xi32>
    %731 = arith.xori %718, %730 : vector<1x128xi32>
    %732 = arith.select %729, %731, %718 : vector<1x128xi1>, vector<1x128xi32>
    %733 = tpu.bitcast %732 : vector<1x128xi32> -> vector<1x128xf32>
    %c0_i32_193 = arith.constant 0 : i32
    %734 = vector.broadcast %c0_i32_193 : i32 to vector<1x128xi32>
    %735 = arith.cmpi slt, %721, %734 : vector<1x128xi32>
    %c2147483647_i32_194 = arith.constant 2147483647 : i32
    %736 = vector.broadcast %c2147483647_i32_194 : i32 to vector<1x128xi32>
    %737 = arith.xori %721, %736 : vector<1x128xi32>
    %738 = arith.select %735, %737, %721 : vector<1x128xi1>, vector<1x128xi32>
    %739 = tpu.bitcast %738 : vector<1x128xi32> -> vector<1x128xf32>
    %c0_i32_195 = arith.constant 0 : i32
    %740 = vector.broadcast %c0_i32_195 : i32 to vector<1x128xi32>
    %c0_i32_196 = arith.constant 0 : i32
    %741 = vector.broadcast %c0_i32_196 : i32 to vector<1x128xi32>
    %c0_i32_197 = arith.constant 0 : i32
    %742 = vector.broadcast %c0_i32_197 : i32 to vector<1x128xi32>
    %743 = vector.broadcast %727 : vector<1x128xf32> to vector<16x128xf32>
    %744 = arith.cmpf oge, %0, %743 : vector<16x128xf32>
    %745 = arith.extui %744 : vector<16x128xi1> to vector<16x128xi32>
    %cst_198 = arith.constant dense<0> : vector<128xi32>
    %746 = vector.multi_reduction <add>, %745, %cst_198 [0] : vector<16x128xi32> to vector<128xi32>
    %747 = vector.shape_cast %746 : vector<128xi32> to vector<1x128xi32>
    %748 = arith.addi %740, %747 : vector<1x128xi32>
    %749 = vector.broadcast %733 : vector<1x128xf32> to vector<16x128xf32>
    %750 = arith.cmpf oge, %0, %749 : vector<16x128xf32>
    %751 = arith.extui %750 : vector<16x128xi1> to vector<16x128xi32>
    %cst_199 = arith.constant dense<0> : vector<128xi32>
    %752 = vector.multi_reduction <add>, %751, %cst_199 [0] : vector<16x128xi32> to vector<128xi32>
    %753 = vector.shape_cast %752 : vector<128xi32> to vector<1x128xi32>
    %754 = arith.addi %741, %753 : vector<1x128xi32>
    %755 = vector.broadcast %739 : vector<1x128xf32> to vector<16x128xf32>
    %756 = arith.cmpf oge, %0, %755 : vector<16x128xf32>
    %757 = arith.extui %756 : vector<16x128xi1> to vector<16x128xi32>
    %cst_200 = arith.constant dense<0> : vector<128xi32>
    %758 = vector.multi_reduction <add>, %757, %cst_200 [0] : vector<16x128xi32> to vector<128xi32>
    %759 = vector.shape_cast %758 : vector<128xi32> to vector<1x128xi32>
    %760 = arith.addi %742, %759 : vector<1x128xi32>
    %cst_201 = arith.constant dense<0> : vector<1xi32>
    %761 = vector.multi_reduction <add>, %748, %cst_201 [1] : vector<1x128xi32> to vector<1xi32>
    %762 = vector.shape_cast %761 : vector<1xi32> to vector<1x1xi32>
    %cst_202 = arith.constant dense<0> : vector<1xi32>
    %763 = vector.multi_reduction <add>, %754, %cst_202 [1] : vector<1x128xi32> to vector<1xi32>
    %764 = vector.shape_cast %763 : vector<1xi32> to vector<1x1xi32>
    %cst_203 = arith.constant dense<0> : vector<1xi32>
    %765 = vector.multi_reduction <add>, %760, %cst_203 [1] : vector<1x128xi32> to vector<1xi32>
    %766 = vector.shape_cast %765 : vector<1xi32> to vector<1x1xi32>
    %c100_i32_204 = arith.constant 100 : i32
    %767 = vector.broadcast %c100_i32_204 : i32 to vector<1x1xi32>
    %768 = arith.cmpi sge, %762, %767 : vector<1x1xi32>
    %c2139095040_i32_205 = arith.constant 2139095040 : i32
    %769 = vector.broadcast %c2139095040_i32_205 : i32 to vector<1x128xi32>
    %770 = arith.cmpi sle, %715, %769 : vector<1x128xi32>
    %771 = vector.broadcast %768 : vector<1x1xi1> to vector<1x128xi1>
    %772 = arith.andi %771, %770 : vector<1x128xi1>
    %c-2139095041_i32_206 = arith.constant -2139095041 : i32
    %773 = vector.broadcast %c-2139095041_i32_206 : i32 to vector<1x128xi32>
    %774 = arith.cmpi slt, %715, %773 : vector<1x128xi32>
    %775 = arith.ori %772, %774 : vector<1x128xi1>
    %776 = arith.extui %775 : vector<1x128xi1> to vector<1x128xi32>
    %c100_i32_207 = arith.constant 100 : i32
    %777 = vector.broadcast %c100_i32_207 : i32 to vector<1x1xi32>
    %778 = arith.cmpi sge, %764, %777 : vector<1x1xi32>
    %c2139095040_i32_208 = arith.constant 2139095040 : i32
    %779 = vector.broadcast %c2139095040_i32_208 : i32 to vector<1x128xi32>
    %780 = arith.cmpi sle, %718, %779 : vector<1x128xi32>
    %781 = vector.broadcast %778 : vector<1x1xi1> to vector<1x128xi1>
    %782 = arith.andi %781, %780 : vector<1x128xi1>
    %c-2139095041_i32_209 = arith.constant -2139095041 : i32
    %783 = vector.broadcast %c-2139095041_i32_209 : i32 to vector<1x128xi32>
    %784 = arith.cmpi slt, %718, %783 : vector<1x128xi32>
    %785 = arith.ori %782, %784 : vector<1x128xi1>
    %786 = arith.extui %785 : vector<1x128xi1> to vector<1x128xi32>
    %c100_i32_210 = arith.constant 100 : i32
    %787 = vector.broadcast %c100_i32_210 : i32 to vector<1x1xi32>
    %788 = arith.cmpi sge, %766, %787 : vector<1x1xi32>
    %c2139095040_i32_211 = arith.constant 2139095040 : i32
    %789 = vector.broadcast %c2139095040_i32_211 : i32 to vector<1x128xi32>
    %790 = arith.cmpi sle, %721, %789 : vector<1x128xi32>
    %791 = vector.broadcast %788 : vector<1x1xi1> to vector<1x128xi1>
    %792 = arith.andi %791, %790 : vector<1x128xi1>
    %c-2139095041_i32_212 = arith.constant -2139095041 : i32
    %793 = vector.broadcast %c-2139095041_i32_212 : i32 to vector<1x128xi32>
    %794 = arith.cmpi slt, %721, %793 : vector<1x128xi32>
    %795 = arith.ori %792, %794 : vector<1x128xi1>
    %796 = arith.extui %795 : vector<1x128xi1> to vector<1x128xi32>
    %797 = arith.addi %776, %786 : vector<1x128xi32>
    %798 = arith.addi %797, %796 : vector<1x128xi32>
    %c14_i32 = arith.constant 14 : i32
    %799 = vector.broadcast %c14_i32 : i32 to vector<1x128xi32>
    %800 = arith.shli %798, %799 : vector<1x128xi32>
    %801 = arith.ori %712, %800 : vector<1x128xi32>
    %c4096_i32 = arith.constant 4096 : i32
    %802 = vector.broadcast %c4096_i32 : i32 to vector<1x128xi32>
    %803 = arith.ori %801, %802 : vector<1x128xi32>
    %804 = arith.addi %85, %803 : vector<1x128xi32>
    %c8192_i32 = arith.constant 8192 : i32
    %805 = vector.broadcast %c8192_i32 : i32 to vector<1x128xi32>
    %806 = arith.ori %801, %805 : vector<1x128xi32>
    %807 = arith.addi %85, %806 : vector<1x128xi32>
    %c12288_i32 = arith.constant 12288 : i32
    %808 = vector.broadcast %c12288_i32 : i32 to vector<1x128xi32>
    %809 = arith.ori %801, %808 : vector<1x128xi32>
    %810 = arith.addi %85, %809 : vector<1x128xi32>
    %c0_i32_213 = arith.constant 0 : i32
    %811 = vector.broadcast %c0_i32_213 : i32 to vector<1x128xi32>
    %812 = arith.cmpi slt, %804, %811 : vector<1x128xi32>
    %c2147483647_i32_214 = arith.constant 2147483647 : i32
    %813 = vector.broadcast %c2147483647_i32_214 : i32 to vector<1x128xi32>
    %814 = arith.xori %804, %813 : vector<1x128xi32>
    %815 = arith.select %812, %814, %804 : vector<1x128xi1>, vector<1x128xi32>
    %816 = tpu.bitcast %815 : vector<1x128xi32> -> vector<1x128xf32>
    %c0_i32_215 = arith.constant 0 : i32
    %817 = vector.broadcast %c0_i32_215 : i32 to vector<1x128xi32>
    %818 = arith.cmpi slt, %807, %817 : vector<1x128xi32>
    %c2147483647_i32_216 = arith.constant 2147483647 : i32
    %819 = vector.broadcast %c2147483647_i32_216 : i32 to vector<1x128xi32>
    %820 = arith.xori %807, %819 : vector<1x128xi32>
    %821 = arith.select %818, %820, %807 : vector<1x128xi1>, vector<1x128xi32>
    %822 = tpu.bitcast %821 : vector<1x128xi32> -> vector<1x128xf32>
    %c0_i32_217 = arith.constant 0 : i32
    %823 = vector.broadcast %c0_i32_217 : i32 to vector<1x128xi32>
    %824 = arith.cmpi slt, %810, %823 : vector<1x128xi32>
    %c2147483647_i32_218 = arith.constant 2147483647 : i32
    %825 = vector.broadcast %c2147483647_i32_218 : i32 to vector<1x128xi32>
    %826 = arith.xori %810, %825 : vector<1x128xi32>
    %827 = arith.select %824, %826, %810 : vector<1x128xi1>, vector<1x128xi32>
    %828 = tpu.bitcast %827 : vector<1x128xi32> -> vector<1x128xf32>
    %c0_i32_219 = arith.constant 0 : i32
    %829 = vector.broadcast %c0_i32_219 : i32 to vector<1x128xi32>
    %c0_i32_220 = arith.constant 0 : i32
    %830 = vector.broadcast %c0_i32_220 : i32 to vector<1x128xi32>
    %c0_i32_221 = arith.constant 0 : i32
    %831 = vector.broadcast %c0_i32_221 : i32 to vector<1x128xi32>
    %832 = vector.broadcast %816 : vector<1x128xf32> to vector<16x128xf32>
    %833 = arith.cmpf oge, %0, %832 : vector<16x128xf32>
    %834 = arith.extui %833 : vector<16x128xi1> to vector<16x128xi32>
    %cst_222 = arith.constant dense<0> : vector<128xi32>
    %835 = vector.multi_reduction <add>, %834, %cst_222 [0] : vector<16x128xi32> to vector<128xi32>
    %836 = vector.shape_cast %835 : vector<128xi32> to vector<1x128xi32>
    %837 = arith.addi %829, %836 : vector<1x128xi32>
    %838 = vector.broadcast %822 : vector<1x128xf32> to vector<16x128xf32>
    %839 = arith.cmpf oge, %0, %838 : vector<16x128xf32>
    %840 = arith.extui %839 : vector<16x128xi1> to vector<16x128xi32>
    %cst_223 = arith.constant dense<0> : vector<128xi32>
    %841 = vector.multi_reduction <add>, %840, %cst_223 [0] : vector<16x128xi32> to vector<128xi32>
    %842 = vector.shape_cast %841 : vector<128xi32> to vector<1x128xi32>
    %843 = arith.addi %830, %842 : vector<1x128xi32>
    %844 = vector.broadcast %828 : vector<1x128xf32> to vector<16x128xf32>
    %845 = arith.cmpf oge, %0, %844 : vector<16x128xf32>
    %846 = arith.extui %845 : vector<16x128xi1> to vector<16x128xi32>
    %cst_224 = arith.constant dense<0> : vector<128xi32>
    %847 = vector.multi_reduction <add>, %846, %cst_224 [0] : vector<16x128xi32> to vector<128xi32>
    %848 = vector.shape_cast %847 : vector<128xi32> to vector<1x128xi32>
    %849 = arith.addi %831, %848 : vector<1x128xi32>
    %cst_225 = arith.constant dense<0> : vector<1xi32>
    %850 = vector.multi_reduction <add>, %837, %cst_225 [1] : vector<1x128xi32> to vector<1xi32>
    %851 = vector.shape_cast %850 : vector<1xi32> to vector<1x1xi32>
    %cst_226 = arith.constant dense<0> : vector<1xi32>
    %852 = vector.multi_reduction <add>, %843, %cst_226 [1] : vector<1x128xi32> to vector<1xi32>
    %853 = vector.shape_cast %852 : vector<1xi32> to vector<1x1xi32>
    %cst_227 = arith.constant dense<0> : vector<1xi32>
    %854 = vector.multi_reduction <add>, %849, %cst_227 [1] : vector<1x128xi32> to vector<1xi32>
    %855 = vector.shape_cast %854 : vector<1xi32> to vector<1x1xi32>
    %c100_i32_228 = arith.constant 100 : i32
    %856 = vector.broadcast %c100_i32_228 : i32 to vector<1x1xi32>
    %857 = arith.cmpi sge, %851, %856 : vector<1x1xi32>
    %c2139095040_i32_229 = arith.constant 2139095040 : i32
    %858 = vector.broadcast %c2139095040_i32_229 : i32 to vector<1x128xi32>
    %859 = arith.cmpi sle, %804, %858 : vector<1x128xi32>
    %860 = vector.broadcast %857 : vector<1x1xi1> to vector<1x128xi1>
    %861 = arith.andi %860, %859 : vector<1x128xi1>
    %c-2139095041_i32_230 = arith.constant -2139095041 : i32
    %862 = vector.broadcast %c-2139095041_i32_230 : i32 to vector<1x128xi32>
    %863 = arith.cmpi slt, %804, %862 : vector<1x128xi32>
    %864 = arith.ori %861, %863 : vector<1x128xi1>
    %865 = arith.extui %864 : vector<1x128xi1> to vector<1x128xi32>
    %c100_i32_231 = arith.constant 100 : i32
    %866 = vector.broadcast %c100_i32_231 : i32 to vector<1x1xi32>
    %867 = arith.cmpi sge, %853, %866 : vector<1x1xi32>
    %c2139095040_i32_232 = arith.constant 2139095040 : i32
    %868 = vector.broadcast %c2139095040_i32_232 : i32 to vector<1x128xi32>
    %869 = arith.cmpi sle, %807, %868 : vector<1x128xi32>
    %870 = vector.broadcast %867 : vector<1x1xi1> to vector<1x128xi1>
    %871 = arith.andi %870, %869 : vector<1x128xi1>
    %c-2139095041_i32_233 = arith.constant -2139095041 : i32
    %872 = vector.broadcast %c-2139095041_i32_233 : i32 to vector<1x128xi32>
    %873 = arith.cmpi slt, %807, %872 : vector<1x128xi32>
    %874 = arith.ori %871, %873 : vector<1x128xi1>
    %875 = arith.extui %874 : vector<1x128xi1> to vector<1x128xi32>
    %c100_i32_234 = arith.constant 100 : i32
    %876 = vector.broadcast %c100_i32_234 : i32 to vector<1x1xi32>
    %877 = arith.cmpi sge, %855, %876 : vector<1x1xi32>
    %c2139095040_i32_235 = arith.constant 2139095040 : i32
    %878 = vector.broadcast %c2139095040_i32_235 : i32 to vector<1x128xi32>
    %879 = arith.cmpi sle, %810, %878 : vector<1x128xi32>
    %880 = vector.broadcast %877 : vector<1x1xi1> to vector<1x128xi1>
    %881 = arith.andi %880, %879 : vector<1x128xi1>
    %c-2139095041_i32_236 = arith.constant -2139095041 : i32
    %882 = vector.broadcast %c-2139095041_i32_236 : i32 to vector<1x128xi32>
    %883 = arith.cmpi slt, %810, %882 : vector<1x128xi32>
    %884 = arith.ori %881, %883 : vector<1x128xi1>
    %885 = arith.extui %884 : vector<1x128xi1> to vector<1x128xi32>
    %886 = arith.addi %865, %875 : vector<1x128xi32>
    %887 = arith.addi %886, %885 : vector<1x128xi32>
    %c12_i32 = arith.constant 12 : i32
    %888 = vector.broadcast %c12_i32 : i32 to vector<1x128xi32>
    %889 = arith.shli %887, %888 : vector<1x128xi32>
    %890 = arith.ori %801, %889 : vector<1x128xi32>
    %c1024_i32 = arith.constant 1024 : i32
    %891 = vector.broadcast %c1024_i32 : i32 to vector<1x128xi32>
    %892 = arith.ori %890, %891 : vector<1x128xi32>
    %893 = arith.addi %85, %892 : vector<1x128xi32>
    %c2048_i32 = arith.constant 2048 : i32
    %894 = vector.broadcast %c2048_i32 : i32 to vector<1x128xi32>
    %895 = arith.ori %890, %894 : vector<1x128xi32>
    %896 = arith.addi %85, %895 : vector<1x128xi32>
    %c3072_i32 = arith.constant 3072 : i32
    %897 = vector.broadcast %c3072_i32 : i32 to vector<1x128xi32>
    %898 = arith.ori %890, %897 : vector<1x128xi32>
    %899 = arith.addi %85, %898 : vector<1x128xi32>
    %c0_i32_237 = arith.constant 0 : i32
    %900 = vector.broadcast %c0_i32_237 : i32 to vector<1x128xi32>
    %901 = arith.cmpi slt, %893, %900 : vector<1x128xi32>
    %c2147483647_i32_238 = arith.constant 2147483647 : i32
    %902 = vector.broadcast %c2147483647_i32_238 : i32 to vector<1x128xi32>
    %903 = arith.xori %893, %902 : vector<1x128xi32>
    %904 = arith.select %901, %903, %893 : vector<1x128xi1>, vector<1x128xi32>
    %905 = tpu.bitcast %904 : vector<1x128xi32> -> vector<1x128xf32>
    %c0_i32_239 = arith.constant 0 : i32
    %906 = vector.broadcast %c0_i32_239 : i32 to vector<1x128xi32>
    %907 = arith.cmpi slt, %896, %906 : vector<1x128xi32>
    %c2147483647_i32_240 = arith.constant 2147483647 : i32
    %908 = vector.broadcast %c2147483647_i32_240 : i32 to vector<1x128xi32>
    %909 = arith.xori %896, %908 : vector<1x128xi32>
    %910 = arith.select %907, %909, %896 : vector<1x128xi1>, vector<1x128xi32>
    %911 = tpu.bitcast %910 : vector<1x128xi32> -> vector<1x128xf32>
    %c0_i32_241 = arith.constant 0 : i32
    %912 = vector.broadcast %c0_i32_241 : i32 to vector<1x128xi32>
    %913 = arith.cmpi slt, %899, %912 : vector<1x128xi32>
    %c2147483647_i32_242 = arith.constant 2147483647 : i32
    %914 = vector.broadcast %c2147483647_i32_242 : i32 to vector<1x128xi32>
    %915 = arith.xori %899, %914 : vector<1x128xi32>
    %916 = arith.select %913, %915, %899 : vector<1x128xi1>, vector<1x128xi32>
    %917 = tpu.bitcast %916 : vector<1x128xi32> -> vector<1x128xf32>
    %c0_i32_243 = arith.constant 0 : i32
    %918 = vector.broadcast %c0_i32_243 : i32 to vector<1x128xi32>
    %c0_i32_244 = arith.constant 0 : i32
    %919 = vector.broadcast %c0_i32_244 : i32 to vector<1x128xi32>
    %c0_i32_245 = arith.constant 0 : i32
    %920 = vector.broadcast %c0_i32_245 : i32 to vector<1x128xi32>
    %921 = vector.broadcast %905 : vector<1x128xf32> to vector<16x128xf32>
    %922 = arith.cmpf oge, %0, %921 : vector<16x128xf32>
    %923 = arith.extui %922 : vector<16x128xi1> to vector<16x128xi32>
    %cst_246 = arith.constant dense<0> : vector<128xi32>
    %924 = vector.multi_reduction <add>, %923, %cst_246 [0] : vector<16x128xi32> to vector<128xi32>
    %925 = vector.shape_cast %924 : vector<128xi32> to vector<1x128xi32>
    %926 = arith.addi %918, %925 : vector<1x128xi32>
    %927 = vector.broadcast %911 : vector<1x128xf32> to vector<16x128xf32>
    %928 = arith.cmpf oge, %0, %927 : vector<16x128xf32>
    %929 = arith.extui %928 : vector<16x128xi1> to vector<16x128xi32>
    %cst_247 = arith.constant dense<0> : vector<128xi32>
    %930 = vector.multi_reduction <add>, %929, %cst_247 [0] : vector<16x128xi32> to vector<128xi32>
    %931 = vector.shape_cast %930 : vector<128xi32> to vector<1x128xi32>
    %932 = arith.addi %919, %931 : vector<1x128xi32>
    %933 = vector.broadcast %917 : vector<1x128xf32> to vector<16x128xf32>
    %934 = arith.cmpf oge, %0, %933 : vector<16x128xf32>
    %935 = arith.extui %934 : vector<16x128xi1> to vector<16x128xi32>
    %cst_248 = arith.constant dense<0> : vector<128xi32>
    %936 = vector.multi_reduction <add>, %935, %cst_248 [0] : vector<16x128xi32> to vector<128xi32>
    %937 = vector.shape_cast %936 : vector<128xi32> to vector<1x128xi32>
    %938 = arith.addi %920, %937 : vector<1x128xi32>
    %cst_249 = arith.constant dense<0> : vector<1xi32>
    %939 = vector.multi_reduction <add>, %926, %cst_249 [1] : vector<1x128xi32> to vector<1xi32>
    %940 = vector.shape_cast %939 : vector<1xi32> to vector<1x1xi32>
    %cst_250 = arith.constant dense<0> : vector<1xi32>
    %941 = vector.multi_reduction <add>, %932, %cst_250 [1] : vector<1x128xi32> to vector<1xi32>
    %942 = vector.shape_cast %941 : vector<1xi32> to vector<1x1xi32>
    %cst_251 = arith.constant dense<0> : vector<1xi32>
    %943 = vector.multi_reduction <add>, %938, %cst_251 [1] : vector<1x128xi32> to vector<1xi32>
    %944 = vector.shape_cast %943 : vector<1xi32> to vector<1x1xi32>
    %c100_i32_252 = arith.constant 100 : i32
    %945 = vector.broadcast %c100_i32_252 : i32 to vector<1x1xi32>
    %946 = arith.cmpi sge, %940, %945 : vector<1x1xi32>
    %c2139095040_i32_253 = arith.constant 2139095040 : i32
    %947 = vector.broadcast %c2139095040_i32_253 : i32 to vector<1x128xi32>
    %948 = arith.cmpi sle, %893, %947 : vector<1x128xi32>
    %949 = vector.broadcast %946 : vector<1x1xi1> to vector<1x128xi1>
    %950 = arith.andi %949, %948 : vector<1x128xi1>
    %c-2139095041_i32_254 = arith.constant -2139095041 : i32
    %951 = vector.broadcast %c-2139095041_i32_254 : i32 to vector<1x128xi32>
    %952 = arith.cmpi slt, %893, %951 : vector<1x128xi32>
    %953 = arith.ori %950, %952 : vector<1x128xi1>
    %954 = arith.extui %953 : vector<1x128xi1> to vector<1x128xi32>
    %c100_i32_255 = arith.constant 100 : i32
    %955 = vector.broadcast %c100_i32_255 : i32 to vector<1x1xi32>
    %956 = arith.cmpi sge, %942, %955 : vector<1x1xi32>
    %c2139095040_i32_256 = arith.constant 2139095040 : i32
    %957 = vector.broadcast %c2139095040_i32_256 : i32 to vector<1x128xi32>
    %958 = arith.cmpi sle, %896, %957 : vector<1x128xi32>
    %959 = vector.broadcast %956 : vector<1x1xi1> to vector<1x128xi1>
    %960 = arith.andi %959, %958 : vector<1x128xi1>
    %c-2139095041_i32_257 = arith.constant -2139095041 : i32
    %961 = vector.broadcast %c-2139095041_i32_257 : i32 to vector<1x128xi32>
    %962 = arith.cmpi slt, %896, %961 : vector<1x128xi32>
    %963 = arith.ori %960, %962 : vector<1x128xi1>
    %964 = arith.extui %963 : vector<1x128xi1> to vector<1x128xi32>
    %c100_i32_258 = arith.constant 100 : i32
    %965 = vector.broadcast %c100_i32_258 : i32 to vector<1x1xi32>
    %966 = arith.cmpi sge, %944, %965 : vector<1x1xi32>
    %c2139095040_i32_259 = arith.constant 2139095040 : i32
    %967 = vector.broadcast %c2139095040_i32_259 : i32 to vector<1x128xi32>
    %968 = arith.cmpi sle, %899, %967 : vector<1x128xi32>
    %969 = vector.broadcast %966 : vector<1x1xi1> to vector<1x128xi1>
    %970 = arith.andi %969, %968 : vector<1x128xi1>
    %c-2139095041_i32_260 = arith.constant -2139095041 : i32
    %971 = vector.broadcast %c-2139095041_i32_260 : i32 to vector<1x128xi32>
    %972 = arith.cmpi slt, %899, %971 : vector<1x128xi32>
    %973 = arith.ori %970, %972 : vector<1x128xi1>
    %974 = arith.extui %973 : vector<1x128xi1> to vector<1x128xi32>
    %975 = arith.addi %954, %964 : vector<1x128xi32>
    %976 = arith.addi %975, %974 : vector<1x128xi32>
    %c10_i32 = arith.constant 10 : i32
    %977 = vector.broadcast %c10_i32 : i32 to vector<1x128xi32>
    %978 = arith.shli %976, %977 : vector<1x128xi32>
    %979 = arith.ori %890, %978 : vector<1x128xi32>
    %c256_i32 = arith.constant 256 : i32
    %980 = vector.broadcast %c256_i32 : i32 to vector<1x128xi32>
    %981 = arith.ori %979, %980 : vector<1x128xi32>
    %982 = arith.addi %85, %981 : vector<1x128xi32>
    %c512_i32 = arith.constant 512 : i32
    %983 = vector.broadcast %c512_i32 : i32 to vector<1x128xi32>
    %984 = arith.ori %979, %983 : vector<1x128xi32>
    %985 = arith.addi %85, %984 : vector<1x128xi32>
    %c768_i32 = arith.constant 768 : i32
    %986 = vector.broadcast %c768_i32 : i32 to vector<1x128xi32>
    %987 = arith.ori %979, %986 : vector<1x128xi32>
    %988 = arith.addi %85, %987 : vector<1x128xi32>
    %c0_i32_261 = arith.constant 0 : i32
    %989 = vector.broadcast %c0_i32_261 : i32 to vector<1x128xi32>
    %990 = arith.cmpi slt, %982, %989 : vector<1x128xi32>
    %c2147483647_i32_262 = arith.constant 2147483647 : i32
    %991 = vector.broadcast %c2147483647_i32_262 : i32 to vector<1x128xi32>
    %992 = arith.xori %982, %991 : vector<1x128xi32>
    %993 = arith.select %990, %992, %982 : vector<1x128xi1>, vector<1x128xi32>
    %994 = tpu.bitcast %993 : vector<1x128xi32> -> vector<1x128xf32>
    %c0_i32_263 = arith.constant 0 : i32
    %995 = vector.broadcast %c0_i32_263 : i32 to vector<1x128xi32>
    %996 = arith.cmpi slt, %985, %995 : vector<1x128xi32>
    %c2147483647_i32_264 = arith.constant 2147483647 : i32
    %997 = vector.broadcast %c2147483647_i32_264 : i32 to vector<1x128xi32>
    %998 = arith.xori %985, %997 : vector<1x128xi32>
    %999 = arith.select %996, %998, %985 : vector<1x128xi1>, vector<1x128xi32>
    %1000 = tpu.bitcast %999 : vector<1x128xi32> -> vector<1x128xf32>
    %c0_i32_265 = arith.constant 0 : i32
    %1001 = vector.broadcast %c0_i32_265 : i32 to vector<1x128xi32>
    %1002 = arith.cmpi slt, %988, %1001 : vector<1x128xi32>
    %c2147483647_i32_266 = arith.constant 2147483647 : i32
    %1003 = vector.broadcast %c2147483647_i32_266 : i32 to vector<1x128xi32>
    %1004 = arith.xori %988, %1003 : vector<1x128xi32>
    %1005 = arith.select %1002, %1004, %988 : vector<1x128xi1>, vector<1x128xi32>
    %1006 = tpu.bitcast %1005 : vector<1x128xi32> -> vector<1x128xf32>
    %c0_i32_267 = arith.constant 0 : i32
    %1007 = vector.broadcast %c0_i32_267 : i32 to vector<1x128xi32>
    %c0_i32_268 = arith.constant 0 : i32
    %1008 = vector.broadcast %c0_i32_268 : i32 to vector<1x128xi32>
    %c0_i32_269 = arith.constant 0 : i32
    %1009 = vector.broadcast %c0_i32_269 : i32 to vector<1x128xi32>
    %1010 = vector.broadcast %994 : vector<1x128xf32> to vector<16x128xf32>
    %1011 = arith.cmpf oge, %0, %1010 : vector<16x128xf32>
    %1012 = arith.extui %1011 : vector<16x128xi1> to vector<16x128xi32>
    %cst_270 = arith.constant dense<0> : vector<128xi32>
    %1013 = vector.multi_reduction <add>, %1012, %cst_270 [0] : vector<16x128xi32> to vector<128xi32>
    %1014 = vector.shape_cast %1013 : vector<128xi32> to vector<1x128xi32>
    %1015 = arith.addi %1007, %1014 : vector<1x128xi32>
    %1016 = vector.broadcast %1000 : vector<1x128xf32> to vector<16x128xf32>
    %1017 = arith.cmpf oge, %0, %1016 : vector<16x128xf32>
    %1018 = arith.extui %1017 : vector<16x128xi1> to vector<16x128xi32>
    %cst_271 = arith.constant dense<0> : vector<128xi32>
    %1019 = vector.multi_reduction <add>, %1018, %cst_271 [0] : vector<16x128xi32> to vector<128xi32>
    %1020 = vector.shape_cast %1019 : vector<128xi32> to vector<1x128xi32>
    %1021 = arith.addi %1008, %1020 : vector<1x128xi32>
    %1022 = vector.broadcast %1006 : vector<1x128xf32> to vector<16x128xf32>
    %1023 = arith.cmpf oge, %0, %1022 : vector<16x128xf32>
    %1024 = arith.extui %1023 : vector<16x128xi1> to vector<16x128xi32>
    %cst_272 = arith.constant dense<0> : vector<128xi32>
    %1025 = vector.multi_reduction <add>, %1024, %cst_272 [0] : vector<16x128xi32> to vector<128xi32>
    %1026 = vector.shape_cast %1025 : vector<128xi32> to vector<1x128xi32>
    %1027 = arith.addi %1009, %1026 : vector<1x128xi32>
    %cst_273 = arith.constant dense<0> : vector<1xi32>
    %1028 = vector.multi_reduction <add>, %1015, %cst_273 [1] : vector<1x128xi32> to vector<1xi32>
    %1029 = vector.shape_cast %1028 : vector<1xi32> to vector<1x1xi32>
    %cst_274 = arith.constant dense<0> : vector<1xi32>
    %1030 = vector.multi_reduction <add>, %1021, %cst_274 [1] : vector<1x128xi32> to vector<1xi32>
    %1031 = vector.shape_cast %1030 : vector<1xi32> to vector<1x1xi32>
    %cst_275 = arith.constant dense<0> : vector<1xi32>
    %1032 = vector.multi_reduction <add>, %1027, %cst_275 [1] : vector<1x128xi32> to vector<1xi32>
    %1033 = vector.shape_cast %1032 : vector<1xi32> to vector<1x1xi32>
    %c100_i32_276 = arith.constant 100 : i32
    %1034 = vector.broadcast %c100_i32_276 : i32 to vector<1x1xi32>
    %1035 = arith.cmpi sge, %1029, %1034 : vector<1x1xi32>
    %c2139095040_i32_277 = arith.constant 2139095040 : i32
    %1036 = vector.broadcast %c2139095040_i32_277 : i32 to vector<1x128xi32>
    %1037 = arith.cmpi sle, %982, %1036 : vector<1x128xi32>
    %1038 = vector.broadcast %1035 : vector<1x1xi1> to vector<1x128xi1>
    %1039 = arith.andi %1038, %1037 : vector<1x128xi1>
    %c-2139095041_i32_278 = arith.constant -2139095041 : i32
    %1040 = vector.broadcast %c-2139095041_i32_278 : i32 to vector<1x128xi32>
    %1041 = arith.cmpi slt, %982, %1040 : vector<1x128xi32>
    %1042 = arith.ori %1039, %1041 : vector<1x128xi1>
    %1043 = arith.extui %1042 : vector<1x128xi1> to vector<1x128xi32>
    %c100_i32_279 = arith.constant 100 : i32
    %1044 = vector.broadcast %c100_i32_279 : i32 to vector<1x1xi32>
    %1045 = arith.cmpi sge, %1031, %1044 : vector<1x1xi32>
    %c2139095040_i32_280 = arith.constant 2139095040 : i32
    %1046 = vector.broadcast %c2139095040_i32_280 : i32 to vector<1x128xi32>
    %1047 = arith.cmpi sle, %985, %1046 : vector<1x128xi32>
    %1048 = vector.broadcast %1045 : vector<1x1xi1> to vector<1x128xi1>
    %1049 = arith.andi %1048, %1047 : vector<1x128xi1>
    %c-2139095041_i32_281 = arith.constant -2139095041 : i32
    %1050 = vector.broadcast %c-2139095041_i32_281 : i32 to vector<1x128xi32>
    %1051 = arith.cmpi slt, %985, %1050 : vector<1x128xi32>
    %1052 = arith.ori %1049, %1051 : vector<1x128xi1>
    %1053 = arith.extui %1052 : vector<1x128xi1> to vector<1x128xi32>
    %c100_i32_282 = arith.constant 100 : i32
    %1054 = vector.broadcast %c100_i32_282 : i32 to vector<1x1xi32>
    %1055 = arith.cmpi sge, %1033, %1054 : vector<1x1xi32>
    %c2139095040_i32_283 = arith.constant 2139095040 : i32
    %1056 = vector.broadcast %c2139095040_i32_283 : i32 to vector<1x128xi32>
    %1057 = arith.cmpi sle, %988, %1056 : vector<1x128xi32>
    %1058 = vector.broadcast %1055 : vector<1x1xi1> to vector<1x128xi1>
    %1059 = arith.andi %1058, %1057 : vector<1x128xi1>
    %c-2139095041_i32_284 = arith.constant -2139095041 : i32
    %1060 = vector.broadcast %c-2139095041_i32_284 : i32 to vector<1x128xi32>
    %1061 = arith.cmpi slt, %988, %1060 : vector<1x128xi32>
    %1062 = arith.ori %1059, %1061 : vector<1x128xi1>
    %1063 = arith.extui %1062 : vector<1x128xi1> to vector<1x128xi32>
    %1064 = arith.addi %1043, %1053 : vector<1x128xi32>
    %1065 = arith.addi %1064, %1063 : vector<1x128xi32>
    %c8_i32 = arith.constant 8 : i32
    %1066 = vector.broadcast %c8_i32 : i32 to vector<1x128xi32>
    %1067 = arith.shli %1065, %1066 : vector<1x128xi32>
    %1068 = arith.ori %979, %1067 : vector<1x128xi32>
    %c64_i32 = arith.constant 64 : i32
    %1069 = vector.broadcast %c64_i32 : i32 to vector<1x128xi32>
    %1070 = arith.ori %1068, %1069 : vector<1x128xi32>
    %1071 = arith.addi %85, %1070 : vector<1x128xi32>
    %c128_i32 = arith.constant 128 : i32
    %1072 = vector.broadcast %c128_i32 : i32 to vector<1x128xi32>
    %1073 = arith.ori %1068, %1072 : vector<1x128xi32>
    %1074 = arith.addi %85, %1073 : vector<1x128xi32>
    %c192_i32 = arith.constant 192 : i32
    %1075 = vector.broadcast %c192_i32 : i32 to vector<1x128xi32>
    %1076 = arith.ori %1068, %1075 : vector<1x128xi32>
    %1077 = arith.addi %85, %1076 : vector<1x128xi32>
    %c0_i32_285 = arith.constant 0 : i32
    %1078 = vector.broadcast %c0_i32_285 : i32 to vector<1x128xi32>
    %1079 = arith.cmpi slt, %1071, %1078 : vector<1x128xi32>
    %c2147483647_i32_286 = arith.constant 2147483647 : i32
    %1080 = vector.broadcast %c2147483647_i32_286 : i32 to vector<1x128xi32>
    %1081 = arith.xori %1071, %1080 : vector<1x128xi32>
    %1082 = arith.select %1079, %1081, %1071 : vector<1x128xi1>, vector<1x128xi32>
    %1083 = tpu.bitcast %1082 : vector<1x128xi32> -> vector<1x128xf32>
    %c0_i32_287 = arith.constant 0 : i32
    %1084 = vector.broadcast %c0_i32_287 : i32 to vector<1x128xi32>
    %1085 = arith.cmpi slt, %1074, %1084 : vector<1x128xi32>
    %c2147483647_i32_288 = arith.constant 2147483647 : i32
    %1086 = vector.broadcast %c2147483647_i32_288 : i32 to vector<1x128xi32>
    %1087 = arith.xori %1074, %1086 : vector<1x128xi32>
    %1088 = arith.select %1085, %1087, %1074 : vector<1x128xi1>, vector<1x128xi32>
    %1089 = tpu.bitcast %1088 : vector<1x128xi32> -> vector<1x128xf32>
    %c0_i32_289 = arith.constant 0 : i32
    %1090 = vector.broadcast %c0_i32_289 : i32 to vector<1x128xi32>
    %1091 = arith.cmpi slt, %1077, %1090 : vector<1x128xi32>
    %c2147483647_i32_290 = arith.constant 2147483647 : i32
    %1092 = vector.broadcast %c2147483647_i32_290 : i32 to vector<1x128xi32>
    %1093 = arith.xori %1077, %1092 : vector<1x128xi32>
    %1094 = arith.select %1091, %1093, %1077 : vector<1x128xi1>, vector<1x128xi32>
    %1095 = tpu.bitcast %1094 : vector<1x128xi32> -> vector<1x128xf32>
    %c0_i32_291 = arith.constant 0 : i32
    %1096 = vector.broadcast %c0_i32_291 : i32 to vector<1x128xi32>
    %c0_i32_292 = arith.constant 0 : i32
    %1097 = vector.broadcast %c0_i32_292 : i32 to vector<1x128xi32>
    %c0_i32_293 = arith.constant 0 : i32
    %1098 = vector.broadcast %c0_i32_293 : i32 to vector<1x128xi32>
    %1099 = vector.broadcast %1083 : vector<1x128xf32> to vector<16x128xf32>
    %1100 = arith.cmpf oge, %0, %1099 : vector<16x128xf32>
    %1101 = arith.extui %1100 : vector<16x128xi1> to vector<16x128xi32>
    %cst_294 = arith.constant dense<0> : vector<128xi32>
    %1102 = vector.multi_reduction <add>, %1101, %cst_294 [0] : vector<16x128xi32> to vector<128xi32>
    %1103 = vector.shape_cast %1102 : vector<128xi32> to vector<1x128xi32>
    %1104 = arith.addi %1096, %1103 : vector<1x128xi32>
    %1105 = vector.broadcast %1089 : vector<1x128xf32> to vector<16x128xf32>
    %1106 = arith.cmpf oge, %0, %1105 : vector<16x128xf32>
    %1107 = arith.extui %1106 : vector<16x128xi1> to vector<16x128xi32>
    %cst_295 = arith.constant dense<0> : vector<128xi32>
    %1108 = vector.multi_reduction <add>, %1107, %cst_295 [0] : vector<16x128xi32> to vector<128xi32>
    %1109 = vector.shape_cast %1108 : vector<128xi32> to vector<1x128xi32>
    %1110 = arith.addi %1097, %1109 : vector<1x128xi32>
    %1111 = vector.broadcast %1095 : vector<1x128xf32> to vector<16x128xf32>
    %1112 = arith.cmpf oge, %0, %1111 : vector<16x128xf32>
    %1113 = arith.extui %1112 : vector<16x128xi1> to vector<16x128xi32>
    %cst_296 = arith.constant dense<0> : vector<128xi32>
    %1114 = vector.multi_reduction <add>, %1113, %cst_296 [0] : vector<16x128xi32> to vector<128xi32>
    %1115 = vector.shape_cast %1114 : vector<128xi32> to vector<1x128xi32>
    %1116 = arith.addi %1098, %1115 : vector<1x128xi32>
    %cst_297 = arith.constant dense<0> : vector<1xi32>
    %1117 = vector.multi_reduction <add>, %1104, %cst_297 [1] : vector<1x128xi32> to vector<1xi32>
    %1118 = vector.shape_cast %1117 : vector<1xi32> to vector<1x1xi32>
    %cst_298 = arith.constant dense<0> : vector<1xi32>
    %1119 = vector.multi_reduction <add>, %1110, %cst_298 [1] : vector<1x128xi32> to vector<1xi32>
    %1120 = vector.shape_cast %1119 : vector<1xi32> to vector<1x1xi32>
    %cst_299 = arith.constant dense<0> : vector<1xi32>
    %1121 = vector.multi_reduction <add>, %1116, %cst_299 [1] : vector<1x128xi32> to vector<1xi32>
    %1122 = vector.shape_cast %1121 : vector<1xi32> to vector<1x1xi32>
    %c100_i32_300 = arith.constant 100 : i32
    %1123 = vector.broadcast %c100_i32_300 : i32 to vector<1x1xi32>
    %1124 = arith.cmpi sge, %1118, %1123 : vector<1x1xi32>
    %c2139095040_i32_301 = arith.constant 2139095040 : i32
    %1125 = vector.broadcast %c2139095040_i32_301 : i32 to vector<1x128xi32>
    %1126 = arith.cmpi sle, %1071, %1125 : vector<1x128xi32>
    %1127 = vector.broadcast %1124 : vector<1x1xi1> to vector<1x128xi1>
    %1128 = arith.andi %1127, %1126 : vector<1x128xi1>
    %c-2139095041_i32_302 = arith.constant -2139095041 : i32
    %1129 = vector.broadcast %c-2139095041_i32_302 : i32 to vector<1x128xi32>
    %1130 = arith.cmpi slt, %1071, %1129 : vector<1x128xi32>
    %1131 = arith.ori %1128, %1130 : vector<1x128xi1>
    %1132 = arith.extui %1131 : vector<1x128xi1> to vector<1x128xi32>
    %c100_i32_303 = arith.constant 100 : i32
    %1133 = vector.broadcast %c100_i32_303 : i32 to vector<1x1xi32>
    %1134 = arith.cmpi sge, %1120, %1133 : vector<1x1xi32>
    %c2139095040_i32_304 = arith.constant 2139095040 : i32
    %1135 = vector.broadcast %c2139095040_i32_304 : i32 to vector<1x128xi32>
    %1136 = arith.cmpi sle, %1074, %1135 : vector<1x128xi32>
    %1137 = vector.broadcast %1134 : vector<1x1xi1> to vector<1x128xi1>
    %1138 = arith.andi %1137, %1136 : vector<1x128xi1>
    %c-2139095041_i32_305 = arith.constant -2139095041 : i32
    %1139 = vector.broadcast %c-2139095041_i32_305 : i32 to vector<1x128xi32>
    %1140 = arith.cmpi slt, %1074, %1139 : vector<1x128xi32>
    %1141 = arith.ori %1138, %1140 : vector<1x128xi1>
    %1142 = arith.extui %1141 : vector<1x128xi1> to vector<1x128xi32>
    %c100_i32_306 = arith.constant 100 : i32
    %1143 = vector.broadcast %c100_i32_306 : i32 to vector<1x1xi32>
    %1144 = arith.cmpi sge, %1122, %1143 : vector<1x1xi32>
    %c2139095040_i32_307 = arith.constant 2139095040 : i32
    %1145 = vector.broadcast %c2139095040_i32_307 : i32 to vector<1x128xi32>
    %1146 = arith.cmpi sle, %1077, %1145 : vector<1x128xi32>
    %1147 = vector.broadcast %1144 : vector<1x1xi1> to vector<1x128xi1>
    %1148 = arith.andi %1147, %1146 : vector<1x128xi1>
    %c-2139095041_i32_308 = arith.constant -2139095041 : i32
    %1149 = vector.broadcast %c-2139095041_i32_308 : i32 to vector<1x128xi32>
    %1150 = arith.cmpi slt, %1077, %1149 : vector<1x128xi32>
    %1151 = arith.ori %1148, %1150 : vector<1x128xi1>
    %1152 = arith.extui %1151 : vector<1x128xi1> to vector<1x128xi32>
    %1153 = arith.addi %1132, %1142 : vector<1x128xi32>
    %1154 = arith.addi %1153, %1152 : vector<1x128xi32>
    %c6_i32 = arith.constant 6 : i32
    %1155 = vector.broadcast %c6_i32 : i32 to vector<1x128xi32>
    %1156 = arith.shli %1154, %1155 : vector<1x128xi32>
    %1157 = arith.ori %1068, %1156 : vector<1x128xi32>
    %c16_i32_309 = arith.constant 16 : i32
    %1158 = vector.broadcast %c16_i32_309 : i32 to vector<1x128xi32>
    %1159 = arith.ori %1157, %1158 : vector<1x128xi32>
    %1160 = arith.addi %85, %1159 : vector<1x128xi32>
    %c32_i32 = arith.constant 32 : i32
    %1161 = vector.broadcast %c32_i32 : i32 to vector<1x128xi32>
    %1162 = arith.ori %1157, %1161 : vector<1x128xi32>
    %1163 = arith.addi %85, %1162 : vector<1x128xi32>
    %c48_i32 = arith.constant 48 : i32
    %1164 = vector.broadcast %c48_i32 : i32 to vector<1x128xi32>
    %1165 = arith.ori %1157, %1164 : vector<1x128xi32>
    %1166 = arith.addi %85, %1165 : vector<1x128xi32>
    %c0_i32_310 = arith.constant 0 : i32
    %1167 = vector.broadcast %c0_i32_310 : i32 to vector<1x128xi32>
    %1168 = arith.cmpi slt, %1160, %1167 : vector<1x128xi32>
    %c2147483647_i32_311 = arith.constant 2147483647 : i32
    %1169 = vector.broadcast %c2147483647_i32_311 : i32 to vector<1x128xi32>
    %1170 = arith.xori %1160, %1169 : vector<1x128xi32>
    %1171 = arith.select %1168, %1170, %1160 : vector<1x128xi1>, vector<1x128xi32>
    %1172 = tpu.bitcast %1171 : vector<1x128xi32> -> vector<1x128xf32>
    %c0_i32_312 = arith.constant 0 : i32
    %1173 = vector.broadcast %c0_i32_312 : i32 to vector<1x128xi32>
    %1174 = arith.cmpi slt, %1163, %1173 : vector<1x128xi32>
    %c2147483647_i32_313 = arith.constant 2147483647 : i32
    %1175 = vector.broadcast %c2147483647_i32_313 : i32 to vector<1x128xi32>
    %1176 = arith.xori %1163, %1175 : vector<1x128xi32>
    %1177 = arith.select %1174, %1176, %1163 : vector<1x128xi1>, vector<1x128xi32>
    %1178 = tpu.bitcast %1177 : vector<1x128xi32> -> vector<1x128xf32>
    %c0_i32_314 = arith.constant 0 : i32
    %1179 = vector.broadcast %c0_i32_314 : i32 to vector<1x128xi32>
    %1180 = arith.cmpi slt, %1166, %1179 : vector<1x128xi32>
    %c2147483647_i32_315 = arith.constant 2147483647 : i32
    %1181 = vector.broadcast %c2147483647_i32_315 : i32 to vector<1x128xi32>
    %1182 = arith.xori %1166, %1181 : vector<1x128xi32>
    %1183 = arith.select %1180, %1182, %1166 : vector<1x128xi1>, vector<1x128xi32>
    %1184 = tpu.bitcast %1183 : vector<1x128xi32> -> vector<1x128xf32>
    %c0_i32_316 = arith.constant 0 : i32
    %1185 = vector.broadcast %c0_i32_316 : i32 to vector<1x128xi32>
    %c0_i32_317 = arith.constant 0 : i32
    %1186 = vector.broadcast %c0_i32_317 : i32 to vector<1x128xi32>
    %c0_i32_318 = arith.constant 0 : i32
    %1187 = vector.broadcast %c0_i32_318 : i32 to vector<1x128xi32>
    %1188 = vector.broadcast %1172 : vector<1x128xf32> to vector<16x128xf32>
    %1189 = arith.cmpf oge, %0, %1188 : vector<16x128xf32>
    %1190 = arith.extui %1189 : vector<16x128xi1> to vector<16x128xi32>
    %cst_319 = arith.constant dense<0> : vector<128xi32>
    %1191 = vector.multi_reduction <add>, %1190, %cst_319 [0] : vector<16x128xi32> to vector<128xi32>
    %1192 = vector.shape_cast %1191 : vector<128xi32> to vector<1x128xi32>
    %1193 = arith.addi %1185, %1192 : vector<1x128xi32>
    %1194 = vector.broadcast %1178 : vector<1x128xf32> to vector<16x128xf32>
    %1195 = arith.cmpf oge, %0, %1194 : vector<16x128xf32>
    %1196 = arith.extui %1195 : vector<16x128xi1> to vector<16x128xi32>
    %cst_320 = arith.constant dense<0> : vector<128xi32>
    %1197 = vector.multi_reduction <add>, %1196, %cst_320 [0] : vector<16x128xi32> to vector<128xi32>
    %1198 = vector.shape_cast %1197 : vector<128xi32> to vector<1x128xi32>
    %1199 = arith.addi %1186, %1198 : vector<1x128xi32>
    %1200 = vector.broadcast %1184 : vector<1x128xf32> to vector<16x128xf32>
    %1201 = arith.cmpf oge, %0, %1200 : vector<16x128xf32>
    %1202 = arith.extui %1201 : vector<16x128xi1> to vector<16x128xi32>
    %cst_321 = arith.constant dense<0> : vector<128xi32>
    %1203 = vector.multi_reduction <add>, %1202, %cst_321 [0] : vector<16x128xi32> to vector<128xi32>
    %1204 = vector.shape_cast %1203 : vector<128xi32> to vector<1x128xi32>
    %1205 = arith.addi %1187, %1204 : vector<1x128xi32>
    %cst_322 = arith.constant dense<0> : vector<1xi32>
    %1206 = vector.multi_reduction <add>, %1193, %cst_322 [1] : vector<1x128xi32> to vector<1xi32>
    %1207 = vector.shape_cast %1206 : vector<1xi32> to vector<1x1xi32>
    %cst_323 = arith.constant dense<0> : vector<1xi32>
    %1208 = vector.multi_reduction <add>, %1199, %cst_323 [1] : vector<1x128xi32> to vector<1xi32>
    %1209 = vector.shape_cast %1208 : vector<1xi32> to vector<1x1xi32>
    %cst_324 = arith.constant dense<0> : vector<1xi32>
    %1210 = vector.multi_reduction <add>, %1205, %cst_324 [1] : vector<1x128xi32> to vector<1xi32>
    %1211 = vector.shape_cast %1210 : vector<1xi32> to vector<1x1xi32>
    %c100_i32_325 = arith.constant 100 : i32
    %1212 = vector.broadcast %c100_i32_325 : i32 to vector<1x1xi32>
    %1213 = arith.cmpi sge, %1207, %1212 : vector<1x1xi32>
    %c2139095040_i32_326 = arith.constant 2139095040 : i32
    %1214 = vector.broadcast %c2139095040_i32_326 : i32 to vector<1x128xi32>
    %1215 = arith.cmpi sle, %1160, %1214 : vector<1x128xi32>
    %1216 = vector.broadcast %1213 : vector<1x1xi1> to vector<1x128xi1>
    %1217 = arith.andi %1216, %1215 : vector<1x128xi1>
    %c-2139095041_i32_327 = arith.constant -2139095041 : i32
    %1218 = vector.broadcast %c-2139095041_i32_327 : i32 to vector<1x128xi32>
    %1219 = arith.cmpi slt, %1160, %1218 : vector<1x128xi32>
    %1220 = arith.ori %1217, %1219 : vector<1x128xi1>
    %1221 = arith.extui %1220 : vector<1x128xi1> to vector<1x128xi32>
    %c100_i32_328 = arith.constant 100 : i32
    %1222 = vector.broadcast %c100_i32_328 : i32 to vector<1x1xi32>
    %1223 = arith.cmpi sge, %1209, %1222 : vector<1x1xi32>
    %c2139095040_i32_329 = arith.constant 2139095040 : i32
    %1224 = vector.broadcast %c2139095040_i32_329 : i32 to vector<1x128xi32>
    %1225 = arith.cmpi sle, %1163, %1224 : vector<1x128xi32>
    %1226 = vector.broadcast %1223 : vector<1x1xi1> to vector<1x128xi1>
    %1227 = arith.andi %1226, %1225 : vector<1x128xi1>
    %c-2139095041_i32_330 = arith.constant -2139095041 : i32
    %1228 = vector.broadcast %c-2139095041_i32_330 : i32 to vector<1x128xi32>
    %1229 = arith.cmpi slt, %1163, %1228 : vector<1x128xi32>
    %1230 = arith.ori %1227, %1229 : vector<1x128xi1>
    %1231 = arith.extui %1230 : vector<1x128xi1> to vector<1x128xi32>
    %c100_i32_331 = arith.constant 100 : i32
    %1232 = vector.broadcast %c100_i32_331 : i32 to vector<1x1xi32>
    %1233 = arith.cmpi sge, %1211, %1232 : vector<1x1xi32>
    %c2139095040_i32_332 = arith.constant 2139095040 : i32
    %1234 = vector.broadcast %c2139095040_i32_332 : i32 to vector<1x128xi32>
    %1235 = arith.cmpi sle, %1166, %1234 : vector<1x128xi32>
    %1236 = vector.broadcast %1233 : vector<1x1xi1> to vector<1x128xi1>
    %1237 = arith.andi %1236, %1235 : vector<1x128xi1>
    %c-2139095041_i32_333 = arith.constant -2139095041 : i32
    %1238 = vector.broadcast %c-2139095041_i32_333 : i32 to vector<1x128xi32>
    %1239 = arith.cmpi slt, %1166, %1238 : vector<1x128xi32>
    %1240 = arith.ori %1237, %1239 : vector<1x128xi1>
    %1241 = arith.extui %1240 : vector<1x128xi1> to vector<1x128xi32>
    %1242 = arith.addi %1221, %1231 : vector<1x128xi32>
    %1243 = arith.addi %1242, %1241 : vector<1x128xi32>
    %c4_i32 = arith.constant 4 : i32
    %1244 = vector.broadcast %c4_i32 : i32 to vector<1x128xi32>
    %1245 = arith.shli %1243, %1244 : vector<1x128xi32>
    %1246 = arith.ori %1157, %1245 : vector<1x128xi32>
    %c4_i32_334 = arith.constant 4 : i32
    %1247 = vector.broadcast %c4_i32_334 : i32 to vector<1x128xi32>
    %1248 = arith.ori %1246, %1247 : vector<1x128xi32>
    %1249 = arith.addi %85, %1248 : vector<1x128xi32>
    %c8_i32_335 = arith.constant 8 : i32
    %1250 = vector.broadcast %c8_i32_335 : i32 to vector<1x128xi32>
    %1251 = arith.ori %1246, %1250 : vector<1x128xi32>
    %1252 = arith.addi %85, %1251 : vector<1x128xi32>
    %c12_i32_336 = arith.constant 12 : i32
    %1253 = vector.broadcast %c12_i32_336 : i32 to vector<1x128xi32>
    %1254 = arith.ori %1246, %1253 : vector<1x128xi32>
    %1255 = arith.addi %85, %1254 : vector<1x128xi32>
    %c0_i32_337 = arith.constant 0 : i32
    %1256 = vector.broadcast %c0_i32_337 : i32 to vector<1x128xi32>
    %1257 = arith.cmpi slt, %1249, %1256 : vector<1x128xi32>
    %c2147483647_i32_338 = arith.constant 2147483647 : i32
    %1258 = vector.broadcast %c2147483647_i32_338 : i32 to vector<1x128xi32>
    %1259 = arith.xori %1249, %1258 : vector<1x128xi32>
    %1260 = arith.select %1257, %1259, %1249 : vector<1x128xi1>, vector<1x128xi32>
    %1261 = tpu.bitcast %1260 : vector<1x128xi32> -> vector<1x128xf32>
    %c0_i32_339 = arith.constant 0 : i32
    %1262 = vector.broadcast %c0_i32_339 : i32 to vector<1x128xi32>
    %1263 = arith.cmpi slt, %1252, %1262 : vector<1x128xi32>
    %c2147483647_i32_340 = arith.constant 2147483647 : i32
    %1264 = vector.broadcast %c2147483647_i32_340 : i32 to vector<1x128xi32>
    %1265 = arith.xori %1252, %1264 : vector<1x128xi32>
    %1266 = arith.select %1263, %1265, %1252 : vector<1x128xi1>, vector<1x128xi32>
    %1267 = tpu.bitcast %1266 : vector<1x128xi32> -> vector<1x128xf32>
    %c0_i32_341 = arith.constant 0 : i32
    %1268 = vector.broadcast %c0_i32_341 : i32 to vector<1x128xi32>
    %1269 = arith.cmpi slt, %1255, %1268 : vector<1x128xi32>
    %c2147483647_i32_342 = arith.constant 2147483647 : i32
    %1270 = vector.broadcast %c2147483647_i32_342 : i32 to vector<1x128xi32>
    %1271 = arith.xori %1255, %1270 : vector<1x128xi32>
    %1272 = arith.select %1269, %1271, %1255 : vector<1x128xi1>, vector<1x128xi32>
    %1273 = tpu.bitcast %1272 : vector<1x128xi32> -> vector<1x128xf32>
    %c0_i32_343 = arith.constant 0 : i32
    %1274 = vector.broadcast %c0_i32_343 : i32 to vector<1x128xi32>
    %c0_i32_344 = arith.constant 0 : i32
    %1275 = vector.broadcast %c0_i32_344 : i32 to vector<1x128xi32>
    %c0_i32_345 = arith.constant 0 : i32
    %1276 = vector.broadcast %c0_i32_345 : i32 to vector<1x128xi32>
    %1277 = vector.broadcast %1261 : vector<1x128xf32> to vector<16x128xf32>
    %1278 = arith.cmpf oge, %0, %1277 : vector<16x128xf32>
    %1279 = arith.extui %1278 : vector<16x128xi1> to vector<16x128xi32>
    %cst_346 = arith.constant dense<0> : vector<128xi32>
    %1280 = vector.multi_reduction <add>, %1279, %cst_346 [0] : vector<16x128xi32> to vector<128xi32>
    %1281 = vector.shape_cast %1280 : vector<128xi32> to vector<1x128xi32>
    %1282 = arith.addi %1274, %1281 : vector<1x128xi32>
    %1283 = vector.broadcast %1267 : vector<1x128xf32> to vector<16x128xf32>
    %1284 = arith.cmpf oge, %0, %1283 : vector<16x128xf32>
    %1285 = arith.extui %1284 : vector<16x128xi1> to vector<16x128xi32>
    %cst_347 = arith.constant dense<0> : vector<128xi32>
    %1286 = vector.multi_reduction <add>, %1285, %cst_347 [0] : vector<16x128xi32> to vector<128xi32>
    %1287 = vector.shape_cast %1286 : vector<128xi32> to vector<1x128xi32>
    %1288 = arith.addi %1275, %1287 : vector<1x128xi32>
    %1289 = vector.broadcast %1273 : vector<1x128xf32> to vector<16x128xf32>
    %1290 = arith.cmpf oge, %0, %1289 : vector<16x128xf32>
    %1291 = arith.extui %1290 : vector<16x128xi1> to vector<16x128xi32>
    %cst_348 = arith.constant dense<0> : vector<128xi32>
    %1292 = vector.multi_reduction <add>, %1291, %cst_348 [0] : vector<16x128xi32> to vector<128xi32>
    %1293 = vector.shape_cast %1292 : vector<128xi32> to vector<1x128xi32>
    %1294 = arith.addi %1276, %1293 : vector<1x128xi32>
    %cst_349 = arith.constant dense<0> : vector<1xi32>
    %1295 = vector.multi_reduction <add>, %1282, %cst_349 [1] : vector<1x128xi32> to vector<1xi32>
    %1296 = vector.shape_cast %1295 : vector<1xi32> to vector<1x1xi32>
    %cst_350 = arith.constant dense<0> : vector<1xi32>
    %1297 = vector.multi_reduction <add>, %1288, %cst_350 [1] : vector<1x128xi32> to vector<1xi32>
    %1298 = vector.shape_cast %1297 : vector<1xi32> to vector<1x1xi32>
    %cst_351 = arith.constant dense<0> : vector<1xi32>
    %1299 = vector.multi_reduction <add>, %1294, %cst_351 [1] : vector<1x128xi32> to vector<1xi32>
    %1300 = vector.shape_cast %1299 : vector<1xi32> to vector<1x1xi32>
    %c100_i32_352 = arith.constant 100 : i32
    %1301 = vector.broadcast %c100_i32_352 : i32 to vector<1x1xi32>
    %1302 = arith.cmpi sge, %1296, %1301 : vector<1x1xi32>
    %c2139095040_i32_353 = arith.constant 2139095040 : i32
    %1303 = vector.broadcast %c2139095040_i32_353 : i32 to vector<1x128xi32>
    %1304 = arith.cmpi sle, %1249, %1303 : vector<1x128xi32>
    %1305 = vector.broadcast %1302 : vector<1x1xi1> to vector<1x128xi1>
    %1306 = arith.andi %1305, %1304 : vector<1x128xi1>
    %c-2139095041_i32_354 = arith.constant -2139095041 : i32
    %1307 = vector.broadcast %c-2139095041_i32_354 : i32 to vector<1x128xi32>
    %1308 = arith.cmpi slt, %1249, %1307 : vector<1x128xi32>
    %1309 = arith.ori %1306, %1308 : vector<1x128xi1>
    %1310 = arith.extui %1309 : vector<1x128xi1> to vector<1x128xi32>
    %c100_i32_355 = arith.constant 100 : i32
    %1311 = vector.broadcast %c100_i32_355 : i32 to vector<1x1xi32>
    %1312 = arith.cmpi sge, %1298, %1311 : vector<1x1xi32>
    %c2139095040_i32_356 = arith.constant 2139095040 : i32
    %1313 = vector.broadcast %c2139095040_i32_356 : i32 to vector<1x128xi32>
    %1314 = arith.cmpi sle, %1252, %1313 : vector<1x128xi32>
    %1315 = vector.broadcast %1312 : vector<1x1xi1> to vector<1x128xi1>
    %1316 = arith.andi %1315, %1314 : vector<1x128xi1>
    %c-2139095041_i32_357 = arith.constant -2139095041 : i32
    %1317 = vector.broadcast %c-2139095041_i32_357 : i32 to vector<1x128xi32>
    %1318 = arith.cmpi slt, %1252, %1317 : vector<1x128xi32>
    %1319 = arith.ori %1316, %1318 : vector<1x128xi1>
    %1320 = arith.extui %1319 : vector<1x128xi1> to vector<1x128xi32>
    %c100_i32_358 = arith.constant 100 : i32
    %1321 = vector.broadcast %c100_i32_358 : i32 to vector<1x1xi32>
    %1322 = arith.cmpi sge, %1300, %1321 : vector<1x1xi32>
    %c2139095040_i32_359 = arith.constant 2139095040 : i32
    %1323 = vector.broadcast %c2139095040_i32_359 : i32 to vector<1x128xi32>
    %1324 = arith.cmpi sle, %1255, %1323 : vector<1x128xi32>
    %1325 = vector.broadcast %1322 : vector<1x1xi1> to vector<1x128xi1>
    %1326 = arith.andi %1325, %1324 : vector<1x128xi1>
    %c-2139095041_i32_360 = arith.constant -2139095041 : i32
    %1327 = vector.broadcast %c-2139095041_i32_360 : i32 to vector<1x128xi32>
    %1328 = arith.cmpi slt, %1255, %1327 : vector<1x128xi32>
    %1329 = arith.ori %1326, %1328 : vector<1x128xi1>
    %1330 = arith.extui %1329 : vector<1x128xi1> to vector<1x128xi32>
    %1331 = arith.addi %1310, %1320 : vector<1x128xi32>
    %1332 = arith.addi %1331, %1330 : vector<1x128xi32>
    %c2_i32_361 = arith.constant 2 : i32
    %1333 = vector.broadcast %c2_i32_361 : i32 to vector<1x128xi32>
    %1334 = arith.shli %1332, %1333 : vector<1x128xi32>
    %1335 = arith.ori %1246, %1334 : vector<1x128xi32>
    %c1_i32_362 = arith.constant 1 : i32
    %1336 = vector.broadcast %c1_i32_362 : i32 to vector<1x128xi32>
    %1337 = arith.ori %1335, %1336 : vector<1x128xi32>
    %1338 = arith.addi %85, %1337 : vector<1x128xi32>
    %c2_i32_363 = arith.constant 2 : i32
    %1339 = vector.broadcast %c2_i32_363 : i32 to vector<1x128xi32>
    %1340 = arith.ori %1335, %1339 : vector<1x128xi32>
    %1341 = arith.addi %85, %1340 : vector<1x128xi32>
    %c3_i32 = arith.constant 3 : i32
    %1342 = vector.broadcast %c3_i32 : i32 to vector<1x128xi32>
    %1343 = arith.ori %1335, %1342 : vector<1x128xi32>
    %1344 = arith.addi %85, %1343 : vector<1x128xi32>
    %c0_i32_364 = arith.constant 0 : i32
    %1345 = vector.broadcast %c0_i32_364 : i32 to vector<1x128xi32>
    %1346 = arith.cmpi slt, %1338, %1345 : vector<1x128xi32>
    %c2147483647_i32_365 = arith.constant 2147483647 : i32
    %1347 = vector.broadcast %c2147483647_i32_365 : i32 to vector<1x128xi32>
    %1348 = arith.xori %1338, %1347 : vector<1x128xi32>
    %1349 = arith.select %1346, %1348, %1338 : vector<1x128xi1>, vector<1x128xi32>
    %1350 = tpu.bitcast %1349 : vector<1x128xi32> -> vector<1x128xf32>
    %c0_i32_366 = arith.constant 0 : i32
    %1351 = vector.broadcast %c0_i32_366 : i32 to vector<1x128xi32>
    %1352 = arith.cmpi slt, %1341, %1351 : vector<1x128xi32>
    %c2147483647_i32_367 = arith.constant 2147483647 : i32
    %1353 = vector.broadcast %c2147483647_i32_367 : i32 to vector<1x128xi32>
    %1354 = arith.xori %1341, %1353 : vector<1x128xi32>
    %1355 = arith.select %1352, %1354, %1341 : vector<1x128xi1>, vector<1x128xi32>
    %1356 = tpu.bitcast %1355 : vector<1x128xi32> -> vector<1x128xf32>
    %c0_i32_368 = arith.constant 0 : i32
    %1357 = vector.broadcast %c0_i32_368 : i32 to vector<1x128xi32>
    %1358 = arith.cmpi slt, %1344, %1357 : vector<1x128xi32>
    %c2147483647_i32_369 = arith.constant 2147483647 : i32
    %1359 = vector.broadcast %c2147483647_i32_369 : i32 to vector<1x128xi32>
    %1360 = arith.xori %1344, %1359 : vector<1x128xi32>
    %1361 = arith.select %1358, %1360, %1344 : vector<1x128xi1>, vector<1x128xi32>
    %1362 = tpu.bitcast %1361 : vector<1x128xi32> -> vector<1x128xf32>
    %c0_i32_370 = arith.constant 0 : i32
    %1363 = vector.broadcast %c0_i32_370 : i32 to vector<1x128xi32>
    %c0_i32_371 = arith.constant 0 : i32
    %1364 = vector.broadcast %c0_i32_371 : i32 to vector<1x128xi32>
    %c0_i32_372 = arith.constant 0 : i32
    %1365 = vector.broadcast %c0_i32_372 : i32 to vector<1x128xi32>
    %1366 = vector.broadcast %1350 : vector<1x128xf32> to vector<16x128xf32>
    %1367 = arith.cmpf oge, %0, %1366 : vector<16x128xf32>
    %1368 = arith.extui %1367 : vector<16x128xi1> to vector<16x128xi32>
    %cst_373 = arith.constant dense<0> : vector<128xi32>
    %1369 = vector.multi_reduction <add>, %1368, %cst_373 [0] : vector<16x128xi32> to vector<128xi32>
    %1370 = vector.shape_cast %1369 : vector<128xi32> to vector<1x128xi32>
    %1371 = arith.addi %1363, %1370 : vector<1x128xi32>
    %1372 = vector.broadcast %1356 : vector<1x128xf32> to vector<16x128xf32>
    %1373 = arith.cmpf oge, %0, %1372 : vector<16x128xf32>
    %1374 = arith.extui %1373 : vector<16x128xi1> to vector<16x128xi32>
    %cst_374 = arith.constant dense<0> : vector<128xi32>
    %1375 = vector.multi_reduction <add>, %1374, %cst_374 [0] : vector<16x128xi32> to vector<128xi32>
    %1376 = vector.shape_cast %1375 : vector<128xi32> to vector<1x128xi32>
    %1377 = arith.addi %1364, %1376 : vector<1x128xi32>
    %1378 = vector.broadcast %1362 : vector<1x128xf32> to vector<16x128xf32>
    %1379 = arith.cmpf oge, %0, %1378 : vector<16x128xf32>
    %1380 = arith.extui %1379 : vector<16x128xi1> to vector<16x128xi32>
    %cst_375 = arith.constant dense<0> : vector<128xi32>
    %1381 = vector.multi_reduction <add>, %1380, %cst_375 [0] : vector<16x128xi32> to vector<128xi32>
    %1382 = vector.shape_cast %1381 : vector<128xi32> to vector<1x128xi32>
    %1383 = arith.addi %1365, %1382 : vector<1x128xi32>
    %cst_376 = arith.constant dense<0> : vector<1xi32>
    %1384 = vector.multi_reduction <add>, %1371, %cst_376 [1] : vector<1x128xi32> to vector<1xi32>
    %1385 = vector.shape_cast %1384 : vector<1xi32> to vector<1x1xi32>
    %cst_377 = arith.constant dense<0> : vector<1xi32>
    %1386 = vector.multi_reduction <add>, %1377, %cst_377 [1] : vector<1x128xi32> to vector<1xi32>
    %1387 = vector.shape_cast %1386 : vector<1xi32> to vector<1x1xi32>
    %cst_378 = arith.constant dense<0> : vector<1xi32>
    %1388 = vector.multi_reduction <add>, %1383, %cst_378 [1] : vector<1x128xi32> to vector<1xi32>
    %1389 = vector.shape_cast %1388 : vector<1xi32> to vector<1x1xi32>
    %c100_i32_379 = arith.constant 100 : i32
    %1390 = vector.broadcast %c100_i32_379 : i32 to vector<1x1xi32>
    %1391 = arith.cmpi sge, %1385, %1390 : vector<1x1xi32>
    %c2139095040_i32_380 = arith.constant 2139095040 : i32
    %1392 = vector.broadcast %c2139095040_i32_380 : i32 to vector<1x128xi32>
    %1393 = arith.cmpi sle, %1338, %1392 : vector<1x128xi32>
    %1394 = vector.broadcast %1391 : vector<1x1xi1> to vector<1x128xi1>
    %1395 = arith.andi %1394, %1393 : vector<1x128xi1>
    %c-2139095041_i32_381 = arith.constant -2139095041 : i32
    %1396 = vector.broadcast %c-2139095041_i32_381 : i32 to vector<1x128xi32>
    %1397 = arith.cmpi slt, %1338, %1396 : vector<1x128xi32>
    %1398 = arith.ori %1395, %1397 : vector<1x128xi1>
    %1399 = arith.extui %1398 : vector<1x128xi1> to vector<1x128xi32>
    %c100_i32_382 = arith.constant 100 : i32
    %1400 = vector.broadcast %c100_i32_382 : i32 to vector<1x1xi32>
    %1401 = arith.cmpi sge, %1387, %1400 : vector<1x1xi32>
    %c2139095040_i32_383 = arith.constant 2139095040 : i32
    %1402 = vector.broadcast %c2139095040_i32_383 : i32 to vector<1x128xi32>
    %1403 = arith.cmpi sle, %1341, %1402 : vector<1x128xi32>
    %1404 = vector.broadcast %1401 : vector<1x1xi1> to vector<1x128xi1>
    %1405 = arith.andi %1404, %1403 : vector<1x128xi1>
    %c-2139095041_i32_384 = arith.constant -2139095041 : i32
    %1406 = vector.broadcast %c-2139095041_i32_384 : i32 to vector<1x128xi32>
    %1407 = arith.cmpi slt, %1341, %1406 : vector<1x128xi32>
    %1408 = arith.ori %1405, %1407 : vector<1x128xi1>
    %1409 = arith.extui %1408 : vector<1x128xi1> to vector<1x128xi32>
    %c100_i32_385 = arith.constant 100 : i32
    %1410 = vector.broadcast %c100_i32_385 : i32 to vector<1x1xi32>
    %1411 = arith.cmpi sge, %1389, %1410 : vector<1x1xi32>
    %c2139095040_i32_386 = arith.constant 2139095040 : i32
    %1412 = vector.broadcast %c2139095040_i32_386 : i32 to vector<1x128xi32>
    %1413 = arith.cmpi sle, %1344, %1412 : vector<1x128xi32>
    %1414 = vector.broadcast %1411 : vector<1x1xi1> to vector<1x128xi1>
    %1415 = arith.andi %1414, %1413 : vector<1x128xi1>
    %c-2139095041_i32_387 = arith.constant -2139095041 : i32
    %1416 = vector.broadcast %c-2139095041_i32_387 : i32 to vector<1x128xi32>
    %1417 = arith.cmpi slt, %1344, %1416 : vector<1x128xi32>
    %1418 = arith.ori %1415, %1417 : vector<1x128xi1>
    %1419 = arith.extui %1418 : vector<1x128xi1> to vector<1x128xi32>
    %1420 = arith.addi %1399, %1409 : vector<1x128xi32>
    %1421 = arith.addi %1420, %1419 : vector<1x128xi32>
    %c0_i32_388 = arith.constant 0 : i32
    %1422 = vector.broadcast %c0_i32_388 : i32 to vector<1x128xi32>
    %1423 = arith.shli %1421, %1422 : vector<1x128xi32>
    %1424 = arith.ori %1335, %1423 : vector<1x128xi32>
    %1425 = arith.addi %85, %1424 : vector<1x128xi32>
    %c0_i32_389 = arith.constant 0 : i32
    %1426 = vector.broadcast %c0_i32_389 : i32 to vector<1x128xi32>
    %1427 = arith.cmpi slt, %1425, %1426 : vector<1x128xi32>
    %c2147483647_i32_390 = arith.constant 2147483647 : i32
    %1428 = vector.broadcast %c2147483647_i32_390 : i32 to vector<1x128xi32>
    %1429 = arith.xori %1425, %1428 : vector<1x128xi32>
    %1430 = arith.select %1427, %1429, %1425 : vector<1x128xi1>, vector<1x128xi32>
    %1431 = tpu.bitcast %1430 : vector<1x128xi32> -> vector<1x128xf32>
    %1432 = vector.broadcast %1431 : vector<1x128xf32> to vector<16x128xf32>
    %1433 = arith.cmpf oge, %0, %1432 : vector<16x128xf32>
    %1434 = arith.extui %1433 : vector<16x128xi1> to vector<16x128xi32>
    %1435 = arith.sitofp %1434 : vector<16x128xi32> to vector<16x128xf32>
    %c0_391 = arith.constant 0 : index
    %c0_392 = arith.constant 0 : index
    %1436 = vector.load %arg1[%c0_391, %c0_392] : memref<16x128xf32, #tpu.memory_space<vmem>>, vector<16x128xf32>
    tpu.vector_store %arg1[%c0_391, %c0_392], %1435 {strides = array<i32>} : memref<16x128xf32, #tpu.memory_space<vmem>>, vector<16x128xf32>,
    return
  }
}

</mosaic_0001>

<bundles_post_ra>
// kernel: tpu_custom_call.1
= control target key start
LH: loop header
LB: loop body
LE: loop exit
PB: predicated region body
PF: predicated region fallthrough
CT: control target
= control target key end

     0   :  { %6 = vsyncpa [#allocation3], 0  ;;  %s2680_s0 = inlined_call_operand.hbm [shape: f32[16,128], index: 0, kind: input, shape index: {}]   ;;  %s2681_s1 = inlined_call_operand.hbm [shape: f32[16,128], index: 1, kind: output, shape index: {}]  }
   0x1   :  { %7 = vsyncpa [#allocation4], 0  ;;  %s12_s8 = sshll.u32 %s2680_s0, 4  ;;  %s1940_s9 = smov [#allocation2]   ;;  %s13_s8 = int_to_ptr.hbm [resolvable:$true] %s12_s8 }
   0x2   :  { %s14_s10 = sshll.u32 %s1940_s9, 4  ;;  %s1941_s11 = smov 128   ;;  %s15_s10 = int_to_ptr.vmem [resolvable:$true] %s14_s10 }
   0x3   :  { %s1942_s12 = smov 8  }
   0x4   :  { %20 = dma.hbm_to_vmem [thread:$0]  %s13_s8, 256, %s15_s10, [#allocation3], %s1941_s11, %s1941_s11, %s1942_s12  }
   0x5   :  { %1936 = dma.done.wait [#allocation3], 256  }
   0x6   :  { %1937 = vsyncadd [#allocation3], 4294967040  ;;  %v1963_v0 = vld [vmem:[#allocation2] sm:$0xff]  ;;  %v1965_v1 = vld [vmem:[#allocation2 + $0x8] sm:$0xff]  ;;  %v1943_v2 = vmov 0   ;;  %s1945_s0 = smov [#allocation5]  }
   0x7   :  { %vm52_vm0 = vcmp.ge.f32.partialorder %v1963_v0, 1073741824  ;;  %vm53_vm1 = vcmp.ge.f32.partialorder %v1965_v1, 1073741824  ;;  %vm30_vm2 = vcmp.ge.f32.partialorder %v1963_v0, 3221225471  ;;  %vm31_vm3 = vcmp.ge.f32.partialorder %v1965_v1, 3221225471 }
   0x8   :  { %v54_v3 = vsel %vm52_vm0, 1, %v1943_v2  ;;  %v55_v4 = vsel %vm53_vm1, 1, %v1943_v2  ;;  %v32_v5 = vsel %vm30_vm2, 1, %v1943_v2  ;;  %v33_v6 = vsel %vm31_vm3, 1, %v1943_v2  ;;  %s1858_s13 = sshll.u32 %s1945_s0, 4  ;;  %s1860_s16 = sshll.u32 %s2681_s1, 4  ;;  %s1859_s13 = int_to_ptr.vmem [resolvable:$true] %s1858_s13  ;;  %s1861_s16 = int_to_ptr.hbm [resolvable:$true] %s1860_s16 }
   0x9   :  { %v56_v7 = vadd.s32 %v55_v4, %v54_v3  ;;  %v34_v8 = vadd.s32 %v33_v6, %v32_v5  ;;  %vm41_vm4 = vcmp.ge.f32.partialorder %v1963_v0, 0  ;;  %vm42_vm5 = vcmp.ge.f32.partialorder %v1965_v1, 0 }
   0xa   :  { %v43_v9 = vsel %vm41_vm4, 1, %v1943_v2  ;;  %v44_v10 = vsel %vm42_vm5, 1, %v1943_v2 }
   0xb   :  { %v57_v11 = vrot.slane %v56_v7, 4  ;;  %v35_v12 = vrot.slane %v34_v8, 4  ;;  %v45_v13 = vadd.s32 %v44_v10, %v43_v9  ;;  %v1944_v9 = vmov 2147483648  }
   0xd   :  { %v58_v14 = vadd.s32 %v57_v11, %v56_v7  ;;  %v36_v15 = vadd.s32 %v35_v12, %v34_v8  ;;  %v46_v16 = vrot.slane %v45_v13, 4 }
   0xf   :  { %v59_v17 = vrot.slane %v58_v14, 2  ;;  %v37_v18 = vrot.slane %v36_v15, 2  ;;  %v47_v19 = vadd.s32 %v46_v16, %v45_v13 }
  0x11   :  { %v60_v20 = vadd.s32 %v59_v17, %v58_v14  ;;  %v38_v21 = vadd.s32 %v37_v18, %v36_v15  ;;  %v48_v22 = vrot.slane %v47_v19, 2 }
  0x13   :  { %v61_v23 = vrot.slane %v60_v20, 1  ;;  %v39_v24 = vrot.slane %v38_v21, 1  ;;  %v49_v25 = vadd.s32 %v48_v22, %v47_v19 }
  0x15   :  { %v62_v26 = vadd.s32 %v61_v23, %v60_v20  ;;  %v40_v27 = vadd.s32 %v39_v24, %v38_v21  ;;  %v50_v28 = vrot.slane %v49_v25, 1 }
  0x17   :  { %v88_v29 = vshrl.u32 %v62_v26, 16  ;;  %v64_v30 = vshrl.u32 %v40_v27, 16  ;;  %v63_v31 = vand.u32 65535, %v40_v27  ;;  %v51_v32 = vadd.s32 %v50_v28, %v49_v25 }
  0x18   :  { %v87_v36 = vand.u32 65535, %v62_v26 }
  0x19   :  { %v90_v33 = vcvt.s32.f32 %v88_v29  ;;  %v66_v34 = vcvt.s32.f32 %v64_v30  ;;  %v65_v35 = vcvt.s32.f32 %v63_v31  ;;  %v76_v37 = vshrl.u32 %v51_v32, 16 }
  0x1a   :  { %v75_v38 = vand.u32 65535, %v51_v32  ;;  %v89_v39 = vcvt.s32.f32 %v87_v36 }
  0x1b   :  { %93 = vadd.xlane.f32.xlu2 %v90_v33  ;;  %69 = vadd.xlane.f32.xlu0 %v66_v34  ;;  %v78_v40 = vcvt.s32.f32 %v76_v37 }
  0x1c   :  { %67 = vadd.xlane.f32.xlu1 %v65_v35  ;;  %v77_v41 = vcvt.s32.f32 %v75_v38 }
  0x23   :  { %91 = vadd.xlane.f32.xlu2 %v89_v39  ;;  %81 = vadd.xlane.f32.xlu0 %v78_v40 }
  0x24   :  { %79 = vadd.xlane.f32.xlu1 %v77_v41 }
  0x8e   :  { %v94_v42 = vpop.xlane.xlu2 %93  ;;  %v70_v43 = vpop.xlane.xlu0 %69 }
  0x8f   :  { %v72_v44 = vcvt.f32.s32 %v70_v43  ;;  %v68_v45 = vpop.xlane.xlu1 %67  ;;  %v96_v46 = vcvt.f32.s32 %v94_v42 }
  0x90   :  { %v71_v48 = vcvt.f32.s32 %v68_v45 }
  0x91   :  { %v73_v47 = vshll.u32 %v72_v44, 16  ;;  %v97_v51 = vshll.u32 %v96_v46, 16 }
  0x93   :  { %v74_v52 = vadd.s32 %v73_v47, %v71_v48 }
  0x95   :  { %vm99_vm6 = vcmp.ge.s32.totalorder %v74_v52, 100 }
  0x96   :  { %v92_v49 = vpop.xlane.xlu2 %91  ;;  %v82_v50 = vpop.xlane.xlu0 %81  ;;  %v102_v60 = vsel %vm99_vm6, 1, %v1943_v2 }
  0x97   :  { %v95_v53 = vcvt.f32.s32 %v92_v49  ;;  %v84_v54 = vcvt.f32.s32 %v82_v50  ;;  %v80_v55 = vpop.xlane.xlu1 %79 }
  0x98   :  { %v83_v56 = vcvt.f32.s32 %v80_v55 }
  0x99   :  { %v98_v57 = vadd.s32 %v97_v51, %v95_v53  ;;  %v85_v58 = vshll.u32 %v84_v54, 16 }
  0x9b   :  { %v86_v59 = vadd.s32 %v85_v58, %v83_v56  ;;  %vm107_vm7 = vcmp.ge.s32.totalorder %v98_v57, 100 }
  0x9c   :  { %v110_v63 = vsel %vm107_vm7, 1, %v1943_v2 }
  0x9d   :  { %vm103_vm8 = vcmp.ge.s32.totalorder %v86_v59, 100 }
  0x9e   :  { %v106_v61 = vsel %vm103_vm8, 1, %v1943_v2 }
  0x9f   :  { %v111_v62 = vadd.s32 %v106_v61, %v102_v60 }
  0xa1   :  { %v112_v3 = vadd.s32 %v111_v62, %v110_v63 }
  0xa3   :  { %v115_v4 = vand.u32 1, %v112_v3  ;;  %vm113_vm9 = vcmp.ge.s32.totalorder %v112_v3, 2 }
  0xa4   :  { %v1987_v10 = vsel %vm113_vm9, 0, %v1944_v9 }
  0xa5   :  { %v1982_v5 = vshll.u32 %v115_v4, 30 }
  0xa7   :  { %v117_v6 = vor.u32 268435456, %v1982_v5  ;;  %v119_v7 = vor.u32 536870912, %v1982_v5  ;;  %v121_v8 = vor.u32 805306368, %v1982_v5 }
  0xa9   :  { %v1990_v11 = vadd.s32 %v117_v6, %v1987_v10  ;;  %v1993_v12 = vadd.s32 %v119_v7, %v1987_v10  ;;  %v1996_v13 = vadd.s32 %v121_v8, %v1987_v10 }
  0xab   :  { %vm127_vm10 = vcmp.lt.s32.totalorder %v1993_v12, 0  ;;  %v128_v14 = vxor.u32 2147483647, %v1993_v12  ;;  %vm123_vm11 = vcmp.lt.s32.totalorder %v1990_v11, 0  ;;  %v124_v15 = vxor.u32 2147483647, %v1990_v11 }
  0xac   :  { %v132_v16 = vxor.u32 2147483647, %v1996_v13  ;;  %vm131_vm12 = vcmp.lt.s32.totalorder %v1996_v13, 0  ;;  %vm205_vm4 = vcmp.le.s32.totalorder %v1990_v11, 2139095040  ;;  %vm209_vm6 = vcmp.lt.s32.totalorder %v1990_v11, 2155872255 }
  0xad   :  { %v129_v17 = vsel %vm127_vm10, %v128_v14, %v1993_v12  ;;  %v125_v18 = vsel %vm123_vm11, %v124_v15, %v1990_v11  ;;  %vm213_vm8 = vcmp.le.s32.totalorder %v1993_v12, 2139095040  ;;  %vm217_vm10 = vcmp.lt.s32.totalorder %v1993_v12, 2155872255 }
  0xae   :  { %vm146_vm13 = vcmp.ge.f32.partialorder %v1963_v0, %v129_v17  ;;  %vm147_vm14 = vcmp.ge.f32.partialorder %v1965_v1, %v129_v17  ;;  %vm135_vm15 = vcmp.ge.f32.partialorder %v1963_v0, %v125_v18  ;;  %vm136_vm0 = vcmp.ge.f32.partialorder %v1965_v1, %v125_v18 }
  0xaf   :  { %v148_v19 = vsel %vm146_vm13, 1, %v1943_v2  ;;  %v149_v20 = vsel %vm147_vm14, 1, %v1943_v2  ;;  %v137_v21 = vsel %vm135_vm15, 1, %v1943_v2  ;;  %v138_v22 = vsel %vm136_vm0, 1, %v1943_v2 }
  0xb0   :  { %v150_v23 = vadd.s32 %v149_v20, %v148_v19  ;;  %v139_v24 = vadd.s32 %v138_v22, %v137_v21  ;;  %v133_v25 = vsel %vm131_vm12, %v132_v16, %v1996_v13  ;;  %vm221_vm13 = vcmp.le.s32.totalorder %v1996_v13, 2139095040 }
  0xb1   :  { %vm157_vm1 = vcmp.ge.f32.partialorder %v1963_v0, %v133_v25  ;;  %vm158_vm2 = vcmp.ge.f32.partialorder %v1965_v1, %v133_v25  ;;  %vm225_vm15 = vcmp.lt.s32.totalorder %v1996_v13, 2155872255 }
  0xb2   :  { %v151_v26 = vrot.slane %v150_v23, 4  ;;  %v140_v27 = vrot.slane %v139_v24, 4  ;;  %v159_v28 = vsel %vm157_vm1, 1, %v1943_v2  ;;  %v160_v29 = vsel %vm158_vm2, 1, %v1943_v2 }
  0xb3   :  { %v161_v30 = vadd.s32 %v160_v29, %v159_v28 }
  0xb4   :  { %v152_v31 = vadd.s32 %v151_v26, %v150_v23  ;;  %v141_v32 = vadd.s32 %v140_v27, %v139_v24 }
  0xb5   :  { %v162_v33 = vrot.slane %v161_v30, 4 }
  0xb6   :  { %v153_v34 = vrot.slane %v152_v31, 2  ;;  %v142_v35 = vrot.slane %v141_v32, 2 }
  0xb7   :  { %v163_v36 = vadd.s32 %v162_v33, %v161_v30 }
  0xb8   :  { %v154_v37 = vadd.s32 %v153_v34, %v152_v31  ;;  %v143_v38 = vadd.s32 %v142_v35, %v141_v32 }
  0xb9   :  { %v164_v39 = vrot.slane %v163_v36, 2 }
  0xba   :  { %v155_v40 = vrot.slane %v154_v37, 1  ;;  %v144_v41 = vrot.slane %v143_v38, 1 }
  0xbb   :  { %v165_v42 = vadd.s32 %v164_v39, %v163_v36 }
  0xbc   :  { %v156_v43 = vadd.s32 %v155_v40, %v154_v37  ;;  %v145_v44 = vadd.s32 %v144_v41, %v143_v38 }
  0xbd   :  { %v166_v45 = vrot.slane %v165_v42, 1 }
  0xbe   :  { %v181_v46 = vshrl.u32 %v156_v43, 16  ;;  %v169_v47 = vshrl.u32 %v145_v44, 16  ;;  %v168_v48 = vand.u32 65535, %v145_v44  ;;  %v180_v54 = vand.u32 65535, %v156_v43 }
  0xbf   :  { %v167_v52 = vadd.s32 %v166_v45, %v165_v42 }
  0xc0   :  { %v183_v49 = vcvt.s32.f32 %v181_v46  ;;  %v171_v50 = vcvt.s32.f32 %v169_v47  ;;  %v170_v51 = vcvt.s32.f32 %v168_v48  ;;  %v182_v57 = vcvt.s32.f32 %v180_v54 }
  0xc1   :  { %v193_v53 = vshrl.u32 %v167_v52, 16  ;;  %v192_v55 = vand.u32 65535, %v167_v52 }
  0xc2   :  { %186 = vadd.xlane.f32.xlu1 %v183_v49  ;;  %174 = vadd.xlane.f32.xlu0 %v171_v50 }
  0xc3   :  { %172 = vadd.xlane.f32.xlu2 %v170_v51  ;;  %v195_v56 = vcvt.s32.f32 %v193_v53  ;;  %v194_v58 = vcvt.s32.f32 %v192_v55 }
  0xca   :  { %198 = vadd.xlane.f32.xlu1 %v195_v56  ;;  %184 = vadd.xlane.f32.xlu0 %v182_v57 }
  0xcb   :  { %196 = vadd.xlane.f32.xlu2 %v194_v58 }
 0x135   :  { %v187_v59 = vpop.xlane.xlu1 %186  ;;  %v175_v60 = vpop.xlane.xlu0 %174 }
 0x136   :  { %v177_v61 = vcvt.f32.s32 %v175_v60  ;;  %v173_v62 = vpop.xlane.xlu2 %172  ;;  %v189_v4 = vcvt.f32.s32 %v187_v59 }
 0x137   :  { %v176_v3 = vcvt.f32.s32 %v173_v62 }
 0x138   :  { %v178_v63 = vshll.u32 %v177_v61, 16  ;;  %v190_v9 = vshll.u32 %v189_v4, 16 }
 0x13a   :  { %v179_v6 = vadd.s32 %v178_v63, %v176_v3 }
 0x13c   :  { %vm204_vm3 = vcmp.ge.s32.totalorder %v179_v6, 100 }
 0x13d   :  { %v199_v7 = vpop.xlane.xlu1 %198  ;;  %v185_v8 = vpop.xlane.xlu0 %184  ;;  %vm208_vm5 = vmand %vm204_vm3, %vm205_vm4 }
 0x13e   :  { %v201_v14 = vcvt.f32.s32 %v199_v7  ;;  %v188_v15 = vcvt.f32.s32 %v185_v8  ;;  %v197_v16 = vpop.xlane.xlu2 %196  ;;  %vm210_vm7 = vmor %vm208_vm5, %vm209_vm6 }
 0x13f   :  { %v200_v19 = vcvt.f32.s32 %v197_v16  ;;  %v211_v21 = vsel %vm210_vm7, 1, %v1943_v2 }
 0x140   :  { %v202_v17 = vshll.u32 %v201_v14, 16  ;;  %v191_v18 = vadd.s32 %v190_v9, %v188_v15 }
 0x142   :  { %vm212_vm9 = vcmp.ge.s32.totalorder %v191_v18, 100  ;;  %v203_v20 = vadd.s32 %v202_v17, %v200_v19 }
 0x143   :  { %vm216_vm11 = vmand %vm212_vm9, %vm213_vm8 }
 0x144   :  { %vm218_vm12 = vmor %vm216_vm11, %vm217_vm10  ;;  %vm220_vm14 = vcmp.ge.s32.totalorder %v203_v20, 100 }
 0x145   :  { %v219_v22 = vsel %vm218_vm12, 1, %v1943_v2  ;;  %vm224_vm0 = vmand %vm220_vm14, %vm221_vm13 }
 0x146   :  { %v228_v11 = vadd.s32 %v219_v22, %v211_v21  ;;  %vm226_vm1 = vmor %vm224_vm0, %vm225_vm15 }
 0x147   :  { %v227_v23 = vsel %vm226_vm1, 1, %v1943_v2 }
 0x148   :  { %v229_v24 = vadd.s32 %v228_v11, %v227_v23 }
 0x14a   :  { %v230_v25 = vshll.u32 %v229_v24, 28 }
 0x14c   :  { %v2029_v12 = vor.u32 %v230_v25, %v1982_v5 }
 0x14e   :  { %v232_v26 = vor.u32 67108864, %v2029_v12  ;;  %v234_v27 = vor.u32 134217728, %v2029_v12  ;;  %v236_v28 = vor.u32 201326592, %v2029_v12 }
 0x150   :  { %v2035_v29 = vadd.s32 %v232_v26, %v1987_v10  ;;  %v2038_v13 = vadd.s32 %v234_v27, %v1987_v10  ;;  %v2041_v30 = vadd.s32 %v236_v28, %v1987_v10 }
 0x152   :  { %vm242_vm2 = vcmp.lt.s32.totalorder %v2038_v13, 0  ;;  %v243_v5 = vxor.u32 2147483647, %v2038_v13  ;;  %vm238_vm3 = vcmp.lt.s32.totalorder %v2035_v29, 0  ;;  %v239_v31 = vxor.u32 2147483647, %v2035_v29 }
 0x153   :  { %v247_v32 = vxor.u32 2147483647, %v2041_v30  ;;  %vm246_vm4 = vcmp.lt.s32.totalorder %v2041_v30, 0  ;;  %vm320_vm12 = vcmp.le.s32.totalorder %v2035_v29, 2139095040  ;;  %vm324_vm14 = vcmp.lt.s32.totalorder %v2035_v29, 2155872255 }
 0x154   :  { %v244_v33 = vsel %vm242_vm2, %v243_v5, %v2038_v13  ;;  %v240_v34 = vsel %vm238_vm3, %v239_v31, %v2035_v29  ;;  %vm328_vm0 = vcmp.le.s32.totalorder %v2038_v13, 2139095040  ;;  %vm332_vm2 = vcmp.lt.s32.totalorder %v2038_v13, 2155872255 }
 0x155   :  { %vm261_vm5 = vcmp.ge.f32.partialorder %v1963_v0, %v244_v33  ;;  %vm262_vm6 = vcmp.ge.f32.partialorder %v1965_v1, %v244_v33  ;;  %vm250_vm7 = vcmp.ge.f32.partialorder %v1963_v0, %v240_v34  ;;  %vm251_vm8 = vcmp.ge.f32.partialorder %v1965_v1, %v240_v34 }
 0x156   :  { %v263_v35 = vsel %vm261_vm5, 1, %v1943_v2  ;;  %v264_v36 = vsel %vm262_vm6, 1, %v1943_v2  ;;  %v252_v37 = vsel %vm250_vm7, 1, %v1943_v2  ;;  %v253_v38 = vsel %vm251_vm8, 1, %v1943_v2 }
 0x157   :  { %v265_v39 = vadd.s32 %v264_v36, %v263_v35  ;;  %v254_v40 = vadd.s32 %v253_v38, %v252_v37  ;;  %v248_v41 = vsel %vm246_vm4, %v247_v32, %v2041_v30  ;;  %vm336_vm5 = vcmp.le.s32.totalorder %v2041_v30, 2139095040 }
 0x158   :  { %vm272_vm9 = vcmp.ge.f32.partialorder %v1963_v0, %v248_v41  ;;  %vm273_vm10 = vcmp.ge.f32.partialorder %v1965_v1, %v248_v41  ;;  %vm340_vm7 = vcmp.lt.s32.totalorder %v2041_v30, 2155872255 }
 0x159   :  { %v266_v42 = vrot.slane %v265_v39, 4  ;;  %v255_v43 = vrot.slane %v254_v40, 4  ;;  %v274_v44 = vsel %vm272_vm9, 1, %v1943_v2  ;;  %v275_v45 = vsel %vm273_vm10, 1, %v1943_v2 }
 0x15a   :  { %v276_v46 = vadd.s32 %v275_v45, %v274_v44 }
 0x15b   :  { %v267_v47 = vadd.s32 %v266_v42, %v265_v39  ;;  %v256_v48 = vadd.s32 %v255_v43, %v254_v40 }
 0x15c   :  { %v277_v49 = vrot.slane %v276_v46, 4 }
 0x15d   :  { %v268_v50 = vrot.slane %v267_v47, 2  ;;  %v257_v51 = vrot.slane %v256_v48, 2 }
 0x15e   :  { %v278_v52 = vadd.s32 %v277_v49, %v276_v46 }
 0x15f   :  { %v269_v53 = vadd.s32 %v268_v50, %v267_v47  ;;  %v258_v54 = vadd.s32 %v257_v51, %v256_v48 }
 0x160   :  { %v279_v55 = vrot.slane %v278_v52, 2 }
 0x161   :  { %v270_v56 = vrot.slane %v269_v53, 1  ;;  %v259_v57 = vrot.slane %v258_v54, 1 }
 0x162   :  { %v280_v58 = vadd.s32 %v279_v55, %v278_v52 }
 0x163   :  { %v271_v59 = vadd.s32 %v270_v56, %v269_v53  ;;  %v260_v60 = vadd.s32 %v259_v57, %v258_v54 }
 0x164   :  { %v281_v61 = vrot.slane %v280_v58, 1 }
 0x165   :  { %v296_v62 = vshrl.u32 %v271_v59, 16  ;;  %v284_v63 = vshrl.u32 %v260_v60, 16  ;;  %v283_v3 = vand.u32 65535, %v260_v60  ;;  %v295_v14 = vand.u32 65535, %v271_v59 }
 0x166   :  { %v282_v8 = vadd.s32 %v281_v61, %v280_v58 }
 0x167   :  { %v298_v4 = vcvt.s32.f32 %v296_v62  ;;  %v286_v6 = vcvt.s32.f32 %v284_v63  ;;  %v285_v7 = vcvt.s32.f32 %v283_v3  ;;  %v297_v17 = vcvt.s32.f32 %v295_v14 }
 0x168   :  { %v308_v9 = vshrl.u32 %v282_v8, 16  ;;  %v307_v15 = vand.u32 65535, %v282_v8 }
 0x169   :  { %301 = vadd.xlane.f32.xlu1 %v298_v4  ;;  %289 = vadd.xlane.f32.xlu0 %v286_v6 }
 0x16a   :  { %287 = vadd.xlane.f32.xlu2 %v285_v7  ;;  %v310_v16 = vcvt.s32.f32 %v308_v9  ;;  %v309_v18 = vcvt.s32.f32 %v307_v15 }
 0x171   :  { %313 = vadd.xlane.f32.xlu1 %v310_v16  ;;  %299 = vadd.xlane.f32.xlu0 %v297_v17 }
 0x172   :  { %311 = vadd.xlane.f32.xlu2 %v309_v18 }
 0x1dc   :  { %v302_v19 = vpop.xlane.xlu1 %301  ;;  %v290_v20 = vpop.xlane.xlu0 %289 }
 0x1dd   :  { %v292_v21 = vcvt.f32.s32 %v290_v20  ;;  %v288_v22 = vpop.xlane.xlu2 %287  ;;  %v304_v24 = vcvt.f32.s32 %v302_v19 }
 0x1de   :  { %v291_v23 = vcvt.f32.s32 %v288_v22 }
 0x1df   :  { %v293_v11 = vshll.u32 %v292_v21, 16  ;;  %v305_v28 = vshll.u32 %v304_v24, 16 }
 0x1e1   :  { %v294_v25 = vadd.s32 %v293_v11, %v291_v23 }
 0x1e3   :  { %vm319_vm11 = vcmp.ge.s32.totalorder %v294_v25, 100 }
 0x1e4   :  { %v314_v26 = vpop.xlane.xlu1 %313  ;;  %v300_v27 = vpop.xlane.xlu0 %299  ;;  %vm323_vm13 = vmand %vm319_vm11, %vm320_vm12 }
 0x1e5   :  { %v316_v5 = vcvt.f32.s32 %v314_v26  ;;  %v303_v31 = vcvt.f32.s32 %v300_v27  ;;  %v312_v32 = vpop.xlane.xlu2 %311  ;;  %vm325_vm15 = vmor %vm323_vm13, %vm324_vm14 }
 0x1e6   :  { %v315_v35 = vcvt.f32.s32 %v312_v32  ;;  %v326_v37 = vsel %vm325_vm15, 1, %v1943_v2 }
 0x1e7   :  { %v317_v33 = vshll.u32 %v316_v5, 16  ;;  %v306_v34 = vadd.s32 %v305_v28, %v303_v31 }
 0x1e9   :  { %vm327_vm1 = vcmp.ge.s32.totalorder %v306_v34, 100  ;;  %v318_v36 = vadd.s32 %v317_v33, %v315_v35 }
 0x1ea   :  { %vm331_vm3 = vmand %vm327_vm1, %vm328_vm0 }
 0x1eb   :  { %vm333_vm4 = vmor %vm331_vm3, %vm332_vm2  ;;  %vm335_vm6 = vcmp.ge.s32.totalorder %v318_v36, 100 }
 0x1ec   :  { %v334_v38 = vsel %vm333_vm4, 1, %v1943_v2  ;;  %vm339_vm8 = vmand %vm335_vm6, %vm336_vm5 }
 0x1ed   :  { %v343_v29 = vadd.s32 %v334_v38, %v326_v37  ;;  %vm341_vm9 = vmor %vm339_vm8, %vm340_vm7 }
 0x1ee   :  { %v342_v39 = vsel %vm341_vm9, 1, %v1943_v2 }
 0x1ef   :  { %v344_v40 = vadd.s32 %v343_v29, %v342_v39 }
 0x1f1   :  { %v345_v41 = vshll.u32 %v344_v40, 26 }
 0x1f3   :  { %v2074_v13 = vor.u32 %v345_v41, %v2029_v12 }
 0x1f5   :  { %v347_v42 = vor.u32 16777216, %v2074_v13  ;;  %v349_v43 = vor.u32 33554432, %v2074_v13  ;;  %v351_v44 = vor.u32 50331648, %v2074_v13 }
 0x1f7   :  { %v2080_v45 = vadd.s32 %v347_v42, %v1987_v10  ;;  %v2083_v30 = vadd.s32 %v349_v43, %v1987_v10  ;;  %v2086_v46 = vadd.s32 %v351_v44, %v1987_v10 }
 0x1f9   :  { %vm357_vm10 = vcmp.lt.s32.totalorder %v2083_v30, 0  ;;  %v358_v12 = vxor.u32 2147483647, %v2083_v30  ;;  %vm353_vm11 = vcmp.lt.s32.totalorder %v2080_v45, 0  ;;  %v354_v47 = vxor.u32 2147483647, %v2080_v45 }
 0x1fa   :  { %v362_v48 = vxor.u32 2147483647, %v2086_v46  ;;  %vm361_vm12 = vcmp.lt.s32.totalorder %v2086_v46, 0  ;;  %vm435_vm4 = vcmp.le.s32.totalorder %v2080_v45, 2139095040  ;;  %vm439_vm6 = vcmp.lt.s32.totalorder %v2080_v45, 2155872255 }
 0x1fb   :  { %v359_v49 = vsel %vm357_vm10, %v358_v12, %v2083_v30  ;;  %v355_v50 = vsel %vm353_vm11, %v354_v47, %v2080_v45  ;;  %vm443_vm8 = vcmp.le.s32.totalorder %v2083_v30, 2139095040  ;;  %vm447_vm10 = vcmp.lt.s32.totalorder %v2083_v30, 2155872255 }
 0x1fc   :  { %vm376_vm13 = vcmp.ge.f32.partialorder %v1963_v0, %v359_v49  ;;  %vm377_vm14 = vcmp.ge.f32.partialorder %v1965_v1, %v359_v49  ;;  %vm365_vm15 = vcmp.ge.f32.partialorder %v1963_v0, %v355_v50  ;;  %vm366_vm0 = vcmp.ge.f32.partialorder %v1965_v1, %v355_v50 }
 0x1fd   :  { %v378_v51 = vsel %vm376_vm13, 1, %v1943_v2  ;;  %v379_v52 = vsel %vm377_vm14, 1, %v1943_v2  ;;  %v367_v53 = vsel %vm365_vm15, 1, %v1943_v2  ;;  %v368_v54 = vsel %vm366_vm0, 1, %v1943_v2 }
 0x1fe   :  { %v380_v55 = vadd.s32 %v379_v52, %v378_v51  ;;  %v369_v56 = vadd.s32 %v368_v54, %v367_v53  ;;  %v363_v57 = vsel %vm361_vm12, %v362_v48, %v2086_v46  ;;  %vm451_vm13 = vcmp.le.s32.totalorder %v2086_v46, 2139095040 }
 0x1ff   :  { %vm387_vm1 = vcmp.ge.f32.partialorder %v1963_v0, %v363_v57  ;;  %vm388_vm2 = vcmp.ge.f32.partialorder %v1965_v1, %v363_v57  ;;  %vm455_vm15 = vcmp.lt.s32.totalorder %v2086_v46, 2155872255 }
 0x200   :  { %v381_v58 = vrot.slane %v380_v55, 4  ;;  %v370_v59 = vrot.slane %v369_v56, 4  ;;  %v389_v60 = vsel %vm387_vm1, 1, %v1943_v2  ;;  %v390_v61 = vsel %vm388_vm2, 1, %v1943_v2 }
 0x201   :  { %v391_v62 = vadd.s32 %v390_v61, %v389_v60 }
 0x202   :  { %v382_v63 = vadd.s32 %v381_v58, %v380_v55  ;;  %v371_v3 = vadd.s32 %v370_v59, %v369_v56 }
 0x203   :  { %v392_v4 = vrot.slane %v391_v62, 4 }
 0x204   :  { %v383_v6 = vrot.slane %v382_v63, 2  ;;  %v372_v7 = vrot.slane %v371_v3, 2 }
 0x205   :  { %v393_v8 = vadd.s32 %v392_v4, %v391_v62 }
 0x206   :  { %v384_v9 = vadd.s32 %v383_v6, %v382_v63  ;;  %v373_v14 = vadd.s32 %v372_v7, %v371_v3 }
 0x207   :  { %v394_v15 = vrot.slane %v393_v8, 2 }
 0x208   :  { %v385_v16 = vrot.slane %v384_v9, 1  ;;  %v374_v17 = vrot.slane %v373_v14, 1 }
 0x209   :  { %v395_v18 = vadd.s32 %v394_v15, %v393_v8 }
 0x20a   :  { %v386_v19 = vadd.s32 %v385_v16, %v384_v9  ;;  %v375_v20 = vadd.s32 %v374_v17, %v373_v14 }
 0x20b   :  { %v396_v21 = vrot.slane %v395_v18, 1 }
 0x20c   :  { %v411_v22 = vshrl.u32 %v386_v19, 16  ;;  %v399_v11 = vshrl.u32 %v375_v20, 16  ;;  %v398_v23 = vand.u32 65535, %v375_v20  ;;  %v410_v5 = vand.u32 65535, %v386_v19 }
 0x20d   :  { %v397_v27 = vadd.s32 %v396_v21, %v395_v18 }
 0x20e   :  { %v413_v24 = vcvt.s32.f32 %v411_v22  ;;  %v401_v25 = vcvt.s32.f32 %v399_v11  ;;  %v400_v26 = vcvt.s32.f32 %v398_v23  ;;  %v412_v33 = vcvt.s32.f32 %v410_v5 }
 0x20f   :  { %v423_v28 = vshrl.u32 %v397_v27, 16  ;;  %v422_v31 = vand.u32 65535, %v397_v27 }
 0x210   :  { %416 = vadd.xlane.f32.xlu1 %v413_v24  ;;  %404 = vadd.xlane.f32.xlu0 %v401_v25 }
 0x211   :  { %402 = vadd.xlane.f32.xlu2 %v400_v26  ;;  %v425_v32 = vcvt.s32.f32 %v423_v28  ;;  %v424_v34 = vcvt.s32.f32 %v422_v31 }
 0x218   :  { %428 = vadd.xlane.f32.xlu1 %v425_v32  ;;  %414 = vadd.xlane.f32.xlu0 %v412_v33 }
 0x219   :  { %426 = vadd.xlane.f32.xlu2 %v424_v34 }
 0x283   :  { %v417_v35 = vpop.xlane.xlu1 %416  ;;  %v405_v36 = vpop.xlane.xlu0 %404 }
 0x284   :  { %v407_v37 = vcvt.f32.s32 %v405_v36  ;;  %v403_v38 = vpop.xlane.xlu2 %402  ;;  %v419_v40 = vcvt.f32.s32 %v417_v35 }
 0x285   :  { %v406_v39 = vcvt.f32.s32 %v403_v38 }
 0x286   :  { %v408_v29 = vshll.u32 %v407_v37, 16  ;;  %v420_v44 = vshll.u32 %v419_v40, 16 }
 0x288   :  { %v409_v41 = vadd.s32 %v408_v29, %v406_v39 }
 0x28a   :  { %vm434_vm3 = vcmp.ge.s32.totalorder %v409_v41, 100 }
 0x28b   :  { %v429_v42 = vpop.xlane.xlu1 %428  ;;  %v415_v43 = vpop.xlane.xlu0 %414  ;;  %vm438_vm5 = vmand %vm434_vm3, %vm435_vm4 }
 0x28c   :  { %v431_v12 = vcvt.f32.s32 %v429_v42  ;;  %v418_v47 = vcvt.f32.s32 %v415_v43  ;;  %v427_v48 = vpop.xlane.xlu2 %426  ;;  %vm440_vm7 = vmor %vm438_vm5, %vm439_vm6 }
 0x28d   :  { %v430_v51 = vcvt.f32.s32 %v427_v48  ;;  %v441_v53 = vsel %vm440_vm7, 1, %v1943_v2 }
 0x28e   :  { %v432_v49 = vshll.u32 %v431_v12, 16  ;;  %v421_v50 = vadd.s32 %v420_v44, %v418_v47 }
 0x290   :  { %vm442_vm9 = vcmp.ge.s32.totalorder %v421_v50, 100  ;;  %v433_v52 = vadd.s32 %v432_v49, %v430_v51 }
 0x291   :  { %vm446_vm11 = vmand %vm442_vm9, %vm443_vm8 }
 0x292   :  { %vm448_vm12 = vmor %vm446_vm11, %vm447_vm10  ;;  %vm450_vm14 = vcmp.ge.s32.totalorder %v433_v52, 100 }
 0x293   :  { %v449_v54 = vsel %vm448_vm12, 1, %v1943_v2  ;;  %vm454_vm0 = vmand %vm450_vm14, %vm451_vm13 }
 0x294   :  { %v458_v45 = vadd.s32 %v449_v54, %v441_v53  ;;  %vm456_vm1 = vmor %vm454_vm0, %vm455_vm15 }
 0x295   :  { %v457_v55 = vsel %vm456_vm1, 1, %v1943_v2 }
 0x296   :  { %v459_v56 = vadd.s32 %v458_v45, %v457_v55 }
 0x298   :  { %v460_v57 = vshll.u32 %v459_v56, 24 }
 0x29a   :  { %v2119_v30 = vor.u32 %v460_v57, %v2074_v13 }
 0x29c   :  { %v462_v58 = vor.u32 4194304, %v2119_v30  ;;  %v464_v59 = vor.u32 8388608, %v2119_v30  ;;  %v466_v60 = vor.u32 12582912, %v2119_v30 }
 0x29e   :  { %v2125_v61 = vadd.s32 %v462_v58, %v1987_v10  ;;  %v2128_v46 = vadd.s32 %v464_v59, %v1987_v10  ;;  %v2131_v62 = vadd.s32 %v466_v60, %v1987_v10 }
 0x2a0   :  { %vm472_vm2 = vcmp.lt.s32.totalorder %v2128_v46, 0  ;;  %v473_v13 = vxor.u32 2147483647, %v2128_v46  ;;  %vm468_vm3 = vcmp.lt.s32.totalorder %v2125_v61, 0  ;;  %v469_v63 = vxor.u32 2147483647, %v2125_v61 }
 0x2a1   :  { %v477_v3 = vxor.u32 2147483647, %v2131_v62  ;;  %vm476_vm4 = vcmp.lt.s32.totalorder %v2131_v62, 0  ;;  %vm550_vm12 = vcmp.le.s32.totalorder %v2125_v61, 2139095040  ;;  %vm554_vm14 = vcmp.lt.s32.totalorder %v2125_v61, 2155872255 }
 0x2a2   :  { %v474_v4 = vsel %vm472_vm2, %v473_v13, %v2128_v46  ;;  %v470_v6 = vsel %vm468_vm3, %v469_v63, %v2125_v61  ;;  %vm558_vm0 = vcmp.le.s32.totalorder %v2128_v46, 2139095040  ;;  %vm562_vm2 = vcmp.lt.s32.totalorder %v2128_v46, 2155872255 }
 0x2a3   :  { %vm491_vm5 = vcmp.ge.f32.partialorder %v1963_v0, %v474_v4  ;;  %vm492_vm6 = vcmp.ge.f32.partialorder %v1965_v1, %v474_v4  ;;  %vm480_vm7 = vcmp.ge.f32.partialorder %v1963_v0, %v470_v6  ;;  %vm481_vm8 = vcmp.ge.f32.partialorder %v1965_v1, %v470_v6 }
 0x2a4   :  { %v493_v7 = vsel %vm491_vm5, 1, %v1943_v2  ;;  %v494_v8 = vsel %vm492_vm6, 1, %v1943_v2  ;;  %v482_v9 = vsel %vm480_vm7, 1, %v1943_v2  ;;  %v483_v14 = vsel %vm481_vm8, 1, %v1943_v2 }
 0x2a5   :  { %v495_v15 = vadd.s32 %v494_v8, %v493_v7  ;;  %v484_v16 = vadd.s32 %v483_v14, %v482_v9  ;;  %v478_v17 = vsel %vm476_vm4, %v477_v3, %v2131_v62  ;;  %vm566_vm5 = vcmp.le.s32.totalorder %v2131_v62, 2139095040 }
 0x2a6   :  { %vm502_vm9 = vcmp.ge.f32.partialorder %v1963_v0, %v478_v17  ;;  %vm503_vm10 = vcmp.ge.f32.partialorder %v1965_v1, %v478_v17  ;;  %vm570_vm7 = vcmp.lt.s32.totalorder %v2131_v62, 2155872255 }
 0x2a7   :  { %v496_v18 = vrot.slane %v495_v15, 4  ;;  %v485_v19 = vrot.slane %v484_v16, 4  ;;  %v504_v20 = vsel %vm502_vm9, 1, %v1943_v2  ;;  %v505_v21 = vsel %vm503_vm10, 1, %v1943_v2 }
 0x2a8   :  { %v506_v22 = vadd.s32 %v505_v21, %v504_v20 }
 0x2a9   :  { %v497_v11 = vadd.s32 %v496_v18, %v495_v15  ;;  %v486_v23 = vadd.s32 %v485_v19, %v484_v16 }
 0x2aa   :  { %v507_v24 = vrot.slane %v506_v22, 4 }
 0x2ab   :  { %v498_v25 = vrot.slane %v497_v11, 2  ;;  %v487_v26 = vrot.slane %v486_v23, 2 }
 0x2ac   :  { %v508_v27 = vadd.s32 %v507_v24, %v506_v22  ;;  %v2186_v24 = vld [vmem:[#allocation2] sm:$0xff] }
 0x2ad   :  { %v499_v28 = vadd.s32 %v498_v25, %v497_v11  ;;  %v488_v5 = vadd.s32 %v487_v26, %v486_v23  ;;  %v2189_v25 = vld [vmem:[#allocation2 + $0x8] sm:$0xff] }
 0x2ae   :  { %v509_v31 = vrot.slane %v508_v27, 2 }
 0x2af   :  { %v500_v32 = vrot.slane %v499_v28, 1  ;;  %v489_v0 = vrot.slane %v488_v5, 1 }
 0x2b0   :  { %v510_v33 = vadd.s32 %v509_v31, %v508_v27 }
 0x2b1   :  { %v501_v1 = vadd.s32 %v500_v32, %v499_v28  ;;  %v490_v34 = vadd.s32 %v489_v0, %v488_v5 }
 0x2b2   :  { %v511_v35 = vrot.slane %v510_v33, 1 }
 0x2b3   :  { %v526_v36 = vshrl.u32 %v501_v1, 16  ;;  %v514_v37 = vshrl.u32 %v490_v34, 16  ;;  %v513_v38 = vand.u32 65535, %v490_v34  ;;  %v525_v43 = vand.u32 65535, %v501_v1 }
 0x2b4   :  { %v512_v41 = vadd.s32 %v511_v35, %v510_v33 }
 0x2b5   :  { %v528_v29 = vcvt.s32.f32 %v526_v36  ;;  %v516_v39 = vcvt.s32.f32 %v514_v37  ;;  %v515_v40 = vcvt.s32.f32 %v513_v38  ;;  %v527_v47 = vcvt.s32.f32 %v525_v43 }
 0x2b6   :  { %v538_v42 = vshrl.u32 %v512_v41, 16  ;;  %v537_v44 = vand.u32 65535, %v512_v41 }
 0x2b7   :  { %531 = vadd.xlane.f32.xlu1 %v528_v29  ;;  %519 = vadd.xlane.f32.xlu0 %v516_v39 }
 0x2b8   :  { %517 = vadd.xlane.f32.xlu2 %v515_v40  ;;  %v540_v12 = vcvt.s32.f32 %v538_v42  ;;  %v539_v48 = vcvt.s32.f32 %v537_v44 }
 0x2bf   :  { %543 = vadd.xlane.f32.xlu1 %v540_v12  ;;  %529 = vadd.xlane.f32.xlu0 %v527_v47 }
 0x2c0   :  { %541 = vadd.xlane.f32.xlu2 %v539_v48 }
 0x32a   :  { %v532_v49 = vpop.xlane.xlu1 %531  ;;  %v520_v50 = vpop.xlane.xlu0 %519 }
 0x32b   :  { %v522_v51 = vcvt.f32.s32 %v520_v50  ;;  %v518_v52 = vpop.xlane.xlu2 %517  ;;  %v534_v45 = vcvt.f32.s32 %v532_v49 }
 0x32c   :  { %v521_v54 = vcvt.f32.s32 %v518_v52 }
 0x32d   :  { %v523_v53 = vshll.u32 %v522_v51, 16  ;;  %v535_v58 = vshll.u32 %v534_v45, 16 }
 0x32f   :  { %v524_v55 = vadd.s32 %v523_v53, %v521_v54 }
 0x331   :  { %vm549_vm11 = vcmp.ge.s32.totalorder %v524_v55, 100 }
 0x332   :  { %v544_v56 = vpop.xlane.xlu1 %543  ;;  %v530_v57 = vpop.xlane.xlu0 %529  ;;  %vm553_vm13 = vmand %vm549_vm11, %vm550_vm12 }
 0x333   :  { %v546_v59 = vcvt.f32.s32 %v544_v56  ;;  %v533_v60 = vcvt.f32.s32 %v530_v57  ;;  %v542_v13 = vpop.xlane.xlu2 %541  ;;  %vm555_vm15 = vmor %vm553_vm13, %vm554_vm14 }
 0x334   :  { %v545_v4 = vcvt.f32.s32 %v542_v13  ;;  %v556_v7 = vsel %vm555_vm15, 1, %v1943_v2 }
 0x335   :  { %v547_v63 = vshll.u32 %v546_v59, 16  ;;  %v536_v3 = vadd.s32 %v535_v58, %v533_v60 }
 0x337   :  { %vm557_vm1 = vcmp.ge.s32.totalorder %v536_v3, 100  ;;  %v548_v6 = vadd.s32 %v547_v63, %v545_v4 }
 0x338   :  { %vm561_vm3 = vmand %vm557_vm1, %vm558_vm0 }
 0x339   :  { %vm563_vm4 = vmor %vm561_vm3, %vm562_vm2  ;;  %vm565_vm6 = vcmp.ge.s32.totalorder %v548_v6, 100 }
 0x33a   :  { %v564_v8 = vsel %vm563_vm4, 1, %v1943_v2  ;;  %vm569_vm8 = vmand %vm565_vm6, %vm566_vm5 }
 0x33b   :  { %v573_v61 = vadd.s32 %v564_v8, %v556_v7  ;;  %vm571_vm9 = vmor %vm569_vm8, %vm570_vm7 }
 0x33c   :  { %v572_v9 = vsel %vm571_vm9, 1, %v1943_v2 }
 0x33d   :  { %v574_v14 = vadd.s32 %v573_v61, %v572_v9 }
 0x33f   :  { %v575_v15 = vshll.u32 %v574_v14, 22 }
 0x341   :  { %v2164_v46 = vor.u32 %v575_v15, %v2119_v30 }
 0x343   :  { %v577_v16 = vor.u32 1048576, %v2164_v46  ;;  %v579_v17 = vor.u32 2097152, %v2164_v46  ;;  %v581_v18 = vor.u32 3145728, %v2164_v46 }
 0x345   :  { %v2170_v19 = vadd.s32 %v577_v16, %v1987_v10  ;;  %v2173_v62 = vadd.s32 %v579_v17, %v1987_v10  ;;  %v2176_v20 = vadd.s32 %v581_v18, %v1987_v10 }
 0x347   :  { %vm587_vm10 = vcmp.lt.s32.totalorder %v2173_v62, 0  ;;  %v588_v30 = vxor.u32 2147483647, %v2173_v62  ;;  %vm583_vm11 = vcmp.lt.s32.totalorder %v2170_v19, 0  ;;  %v584_v21 = vxor.u32 2147483647, %v2170_v19 }
 0x348   :  { %v592_v22 = vxor.u32 2147483647, %v2176_v20  ;;  %vm591_vm12 = vcmp.lt.s32.totalorder %v2176_v20, 0  ;;  %vm665_vm4 = vcmp.le.s32.totalorder %v2170_v19, 2139095040  ;;  %vm669_vm6 = vcmp.lt.s32.totalorder %v2170_v19, 2155872255 }
 0x349   :  { %v589_v11 = vsel %vm587_vm10, %v588_v30, %v2173_v62  ;;  %v585_v23 = vsel %vm583_vm11, %v584_v21, %v2170_v19  ;;  %vm673_vm8 = vcmp.le.s32.totalorder %v2173_v62, 2139095040  ;;  %vm677_vm10 = vcmp.lt.s32.totalorder %v2173_v62, 2155872255 }
 0x34a   :  { %vm606_vm13 = vcmp.ge.f32.partialorder %v2186_v24, %v589_v11  ;;  %vm607_vm14 = vcmp.ge.f32.partialorder %v2189_v25, %v589_v11  ;;  %vm595_vm15 = vcmp.ge.f32.partialorder %v2186_v24, %v585_v23  ;;  %vm596_vm0 = vcmp.ge.f32.partialorder %v2189_v25, %v585_v23 }
 0x34b   :  { %v608_v26 = vsel %vm606_vm13, 1, %v1943_v2  ;;  %v609_v27 = vsel %vm607_vm14, 1, %v1943_v2  ;;  %v597_v28 = vsel %vm595_vm15, 1, %v1943_v2  ;;  %v598_v5 = vsel %vm596_vm0, 1, %v1943_v2 }
 0x34c   :  { %v610_v31 = vadd.s32 %v609_v27, %v608_v26  ;;  %v599_v32 = vadd.s32 %v598_v5, %v597_v28  ;;  %v593_v0 = vsel %vm591_vm12, %v592_v22, %v2176_v20  ;;  %vm681_vm13 = vcmp.le.s32.totalorder %v2176_v20, 2139095040 }
 0x34d   :  { %vm617_vm1 = vcmp.ge.f32.partialorder %v2186_v24, %v593_v0  ;;  %vm618_vm2 = vcmp.ge.f32.partialorder %v2189_v25, %v593_v0  ;;  %vm685_vm15 = vcmp.lt.s32.totalorder %v2176_v20, 2155872255 }
 0x34e   :  { %v611_v33 = vrot.slane %v610_v31, 4  ;;  %v600_v1 = vrot.slane %v599_v32, 4  ;;  %v619_v34 = vsel %vm617_vm1, 1, %v1943_v2  ;;  %v620_v35 = vsel %vm618_vm2, 1, %v1943_v2 }
 0x34f   :  { %v621_v36 = vadd.s32 %v620_v35, %v619_v34 }
 0x350   :  { %v612_v37 = vadd.s32 %v611_v33, %v610_v31  ;;  %v601_v38 = vadd.s32 %v600_v1, %v599_v32 }
 0x351   :  { %v622_v29 = vrot.slane %v621_v36, 4 }
 0x352   :  { %v613_v39 = vrot.slane %v612_v37, 2  ;;  %v602_v40 = vrot.slane %v601_v38, 2 }
 0x353   :  { %v623_v41 = vadd.s32 %v622_v29, %v621_v36 }
 0x354   :  { %v614_v42 = vadd.s32 %v613_v39, %v612_v37  ;;  %v603_v43 = vadd.s32 %v602_v40, %v601_v38 }
 0x355   :  { %v624_v44 = vrot.slane %v623_v41, 2 }
 0x356   :  { %v615_v12 = vrot.slane %v614_v42, 1  ;;  %v604_v47 = vrot.slane %v603_v43, 1 }
 0x357   :  { %v625_v48 = vadd.s32 %v624_v44, %v623_v41 }
 0x358   :  { %v616_v49 = vadd.s32 %v615_v12, %v614_v42  ;;  %v605_v50 = vadd.s32 %v604_v47, %v603_v43 }
 0x359   :  { %v626_v51 = vrot.slane %v625_v48, 1 }
 0x35a   :  { %v641_v52 = vshrl.u32 %v616_v49, 16  ;;  %v629_v53 = vshrl.u32 %v605_v50, 16  ;;  %v628_v54 = vand.u32 65535, %v605_v50  ;;  %v640_v59 = vand.u32 65535, %v616_v49 }
 0x35b   :  { %v627_v57 = vadd.s32 %v626_v51, %v625_v48 }
 0x35c   :  { %v643_v45 = vcvt.s32.f32 %v641_v52  ;;  %v631_v55 = vcvt.s32.f32 %v629_v53  ;;  %v630_v56 = vcvt.s32.f32 %v628_v54  ;;  %v642_v63 = vcvt.s32.f32 %v640_v59 }
 0x35d   :  { %v653_v58 = vshrl.u32 %v627_v57, 16  ;;  %v652_v60 = vand.u32 65535, %v627_v57 }
 0x35e   :  { %646 = vadd.xlane.f32.xlu1 %v643_v45  ;;  %634 = vadd.xlane.f32.xlu0 %v631_v55 }
 0x35f   :  { %632 = vadd.xlane.f32.xlu2 %v630_v56  ;;  %v655_v13 = vcvt.s32.f32 %v653_v58  ;;  %v654_v3 = vcvt.s32.f32 %v652_v60 }
 0x366   :  { %658 = vadd.xlane.f32.xlu1 %v655_v13  ;;  %644 = vadd.xlane.f32.xlu0 %v642_v63 }
 0x367   :  { %656 = vadd.xlane.f32.xlu2 %v654_v3 }
 0x3d1   :  { %v647_v4 = vpop.xlane.xlu1 %646  ;;  %v635_v6 = vpop.xlane.xlu0 %634 }
 0x3d2   :  { %v637_v7 = vcvt.f32.s32 %v635_v6  ;;  %v633_v8 = vpop.xlane.xlu2 %632  ;;  %v649_v14 = vcvt.f32.s32 %v647_v4 }
 0x3d3   :  { %v636_v9 = vcvt.f32.s32 %v633_v8 }
 0x3d4   :  { %v638_v61 = vshll.u32 %v637_v7, 16  ;;  %v650_v18 = vshll.u32 %v649_v14, 16 }
 0x3d6   :  { %v639_v15 = vadd.s32 %v638_v61, %v636_v9 }
 0x3d8   :  { %vm664_vm3 = vcmp.ge.s32.totalorder %v639_v15, 100 }
 0x3d9   :  { %v659_v16 = vpop.xlane.xlu1 %658  ;;  %v645_v17 = vpop.xlane.xlu0 %644  ;;  %vm668_vm5 = vmand %vm664_vm3, %vm665_vm4 }
 0x3da   :  { %v661_v30 = vcvt.f32.s32 %v659_v16  ;;  %v648_v21 = vcvt.f32.s32 %v645_v17  ;;  %v657_v22 = vpop.xlane.xlu2 %656  ;;  %vm670_vm7 = vmor %vm668_vm5, %vm669_vm6 }
 0x3db   :  { %v660_v26 = vcvt.f32.s32 %v657_v22  ;;  %v671_v28 = vsel %vm670_vm7, 1, %v1943_v2 }
 0x3dc   :  { %v662_v11 = vshll.u32 %v661_v30, 16  ;;  %v651_v23 = vadd.s32 %v650_v18, %v648_v21 }
 0x3de   :  { %vm672_vm9 = vcmp.ge.s32.totalorder %v651_v23, 100  ;;  %v663_v27 = vadd.s32 %v662_v11, %v660_v26 }
 0x3df   :  { %vm676_vm11 = vmand %vm672_vm9, %vm673_vm8 }
 0x3e0   :  { %vm678_vm12 = vmor %vm676_vm11, %vm677_vm10  ;;  %vm680_vm14 = vcmp.ge.s32.totalorder %v663_v27, 100 }
 0x3e1   :  { %v679_v5 = vsel %vm678_vm12, 1, %v1943_v2  ;;  %vm684_vm0 = vmand %vm680_vm14, %vm681_vm13 }
 0x3e2   :  { %v688_v19 = vadd.s32 %v679_v5, %v671_v28  ;;  %vm686_vm1 = vmor %vm684_vm0, %vm685_vm15 }
 0x3e3   :  { %v687_v31 = vsel %vm686_vm1, 1, %v1943_v2 }
 0x3e4   :  { %v689_v32 = vadd.s32 %v688_v19, %v687_v31 }
 0x3e6   :  { %v690_v0 = vshll.u32 %v689_v32, 20 }
 0x3e8   :  { %v2213_v62 = vor.u32 %v690_v0, %v2164_v46 }
 0x3ea   :  { %v692_v33 = vor.u32 262144, %v2213_v62  ;;  %v694_v1 = vor.u32 524288, %v2213_v62  ;;  %v696_v34 = vor.u32 786432, %v2213_v62 }
 0x3ec   :  { %v2219_v35 = vadd.s32 %v692_v33, %v1987_v10  ;;  %v2222_v20 = vadd.s32 %v694_v1, %v1987_v10  ;;  %v2225_v36 = vadd.s32 %v696_v34, %v1987_v10 }
 0x3ee   :  { %vm702_vm2 = vcmp.lt.s32.totalorder %v2222_v20, 0  ;;  %v703_v46 = vxor.u32 2147483647, %v2222_v20  ;;  %vm698_vm3 = vcmp.lt.s32.totalorder %v2219_v35, 0  ;;  %v699_v37 = vxor.u32 2147483647, %v2219_v35 }
 0x3ef   :  { %v707_v38 = vxor.u32 2147483647, %v2225_v36  ;;  %vm706_vm4 = vcmp.lt.s32.totalorder %v2225_v36, 0  ;;  %vm780_vm12 = vcmp.le.s32.totalorder %v2219_v35, 2139095040  ;;  %vm784_vm14 = vcmp.lt.s32.totalorder %v2219_v35, 2155872255 }
 0x3f0   :  { %v704_v29 = vsel %vm702_vm2, %v703_v46, %v2222_v20  ;;  %v700_v39 = vsel %vm698_vm3, %v699_v37, %v2219_v35  ;;  %vm788_vm0 = vcmp.le.s32.totalorder %v2222_v20, 2139095040  ;;  %vm792_vm2 = vcmp.lt.s32.totalorder %v2222_v20, 2155872255 }
 0x3f1   :  { %vm721_vm5 = vcmp.ge.f32.partialorder %v2186_v24, %v704_v29  ;;  %vm722_vm6 = vcmp.ge.f32.partialorder %v2189_v25, %v704_v29  ;;  %vm710_vm7 = vcmp.ge.f32.partialorder %v2186_v24, %v700_v39  ;;  %vm711_vm8 = vcmp.ge.f32.partialorder %v2189_v25, %v700_v39 }
 0x3f2   :  { %v723_v40 = vsel %vm721_vm5, 1, %v1943_v2  ;;  %v724_v41 = vsel %vm722_vm6, 1, %v1943_v2  ;;  %v712_v42 = vsel %vm710_vm7, 1, %v1943_v2  ;;  %v713_v43 = vsel %vm711_vm8, 1, %v1943_v2 }
 0x3f3   :  { %v725_v44 = vadd.s32 %v724_v41, %v723_v40  ;;  %v714_v12 = vadd.s32 %v713_v43, %v712_v42  ;;  %v708_v47 = vsel %vm706_vm4, %v707_v38, %v2225_v36  ;;  %vm796_vm5 = vcmp.le.s32.totalorder %v2225_v36, 2139095040 }
 0x3f4   :  { %vm732_vm9 = vcmp.ge.f32.partialorder %v2186_v24, %v708_v47  ;;  %vm733_vm10 = vcmp.ge.f32.partialorder %v2189_v25, %v708_v47  ;;  %vm800_vm7 = vcmp.lt.s32.totalorder %v2225_v36, 2155872255 }
 0x3f5   :  { %v726_v48 = vrot.slane %v725_v44, 4  ;;  %v715_v49 = vrot.slane %v714_v12, 4  ;;  %v734_v50 = vsel %vm732_vm9, 1, %v1943_v2  ;;  %v735_v51 = vsel %vm733_vm10, 1, %v1943_v2 }
 0x3f6   :  { %v736_v52 = vadd.s32 %v735_v51, %v734_v50 }
 0x3f7   :  { %v727_v53 = vadd.s32 %v726_v48, %v725_v44  ;;  %v716_v54 = vadd.s32 %v715_v49, %v714_v12 }
 0x3f8   :  { %v737_v45 = vrot.slane %v736_v52, 4 }
 0x3f9   :  { %v728_v55 = vrot.slane %v727_v53, 2  ;;  %v717_v56 = vrot.slane %v716_v54, 2 }
 0x3fa   :  { %v738_v57 = vadd.s32 %v737_v45, %v736_v52 }
 0x3fb   :  { %v729_v58 = vadd.s32 %v728_v55, %v727_v53  ;;  %v718_v59 = vadd.s32 %v717_v56, %v716_v54 }
 0x3fc   :  { %v739_v60 = vrot.slane %v738_v57, 2 }
 0x3fd   :  { %v730_v13 = vrot.slane %v729_v58, 1  ;;  %v719_v63 = vrot.slane %v718_v59, 1 }
 0x3fe   :  { %v740_v3 = vadd.s32 %v739_v60, %v738_v57 }
 0x3ff   :  { %v731_v4 = vadd.s32 %v730_v13, %v729_v58  ;;  %v720_v6 = vadd.s32 %v719_v63, %v718_v59 }
 0x400   :  { %v741_v7 = vrot.slane %v740_v3, 1 }
 0x401   :  { %v756_v8 = vshrl.u32 %v731_v4, 16  ;;  %v744_v61 = vshrl.u32 %v720_v6, 16  ;;  %v743_v9 = vand.u32 65535, %v720_v6  ;;  %v755_v30 = vand.u32 65535, %v731_v4 }
 0x402   :  { %v742_v17 = vadd.s32 %v741_v7, %v740_v3 }
 0x403   :  { %v758_v14 = vcvt.s32.f32 %v756_v8  ;;  %v746_v15 = vcvt.s32.f32 %v744_v61  ;;  %v745_v16 = vcvt.s32.f32 %v743_v9  ;;  %v757_v11 = vcvt.s32.f32 %v755_v30 }
 0x404   :  { %v768_v18 = vshrl.u32 %v742_v17, 16  ;;  %v767_v21 = vand.u32 65535, %v742_v17 }
 0x405   :  { %761 = vadd.xlane.f32.xlu1 %v758_v14  ;;  %749 = vadd.xlane.f32.xlu0 %v746_v15 }
 0x406   :  { %747 = vadd.xlane.f32.xlu2 %v745_v16  ;;  %v770_v22 = vcvt.s32.f32 %v768_v18  ;;  %v769_v23 = vcvt.s32.f32 %v767_v21 }
 0x40d   :  { %773 = vadd.xlane.f32.xlu1 %v770_v22  ;;  %759 = vadd.xlane.f32.xlu0 %v757_v11 }
 0x40e   :  { %771 = vadd.xlane.f32.xlu2 %v769_v23 }
 0x478   :  { %v762_v26 = vpop.xlane.xlu1 %761  ;;  %v750_v27 = vpop.xlane.xlu0 %749 }
 0x479   :  { %v752_v28 = vcvt.f32.s32 %v750_v27  ;;  %v748_v5 = vpop.xlane.xlu2 %747  ;;  %v764_v32 = vcvt.f32.s32 %v762_v26 }
 0x47a   :  { %v751_v31 = vcvt.f32.s32 %v748_v5 }
 0x47b   :  { %v753_v19 = vshll.u32 %v752_v28, 16  ;;  %v765_v34 = vshll.u32 %v764_v32, 16 }
 0x47d   :  { %v754_v0 = vadd.s32 %v753_v19, %v751_v31 }
 0x47f   :  { %vm779_vm11 = vcmp.ge.s32.totalorder %v754_v0, 100 }
 0x480   :  { %v774_v33 = vpop.xlane.xlu1 %773  ;;  %v760_v1 = vpop.xlane.xlu0 %759  ;;  %vm783_vm13 = vmand %vm779_vm11, %vm780_vm12 }
 0x481   :  { %v776_v46 = vcvt.f32.s32 %v774_v33  ;;  %v763_v37 = vcvt.f32.s32 %v760_v1  ;;  %v772_v38 = vpop.xlane.xlu2 %771  ;;  %vm785_vm15 = vmor %vm783_vm13, %vm784_vm14 }
 0x482   :  { %v775_v40 = vcvt.f32.s32 %v772_v38  ;;  %v786_v42 = vsel %vm785_vm15, 1, %v1943_v2 }
 0x483   :  { %v777_v29 = vshll.u32 %v776_v46, 16  ;;  %v766_v39 = vadd.s32 %v765_v34, %v763_v37 }
 0x485   :  { %vm787_vm1 = vcmp.ge.s32.totalorder %v766_v39, 100  ;;  %v778_v41 = vadd.s32 %v777_v29, %v775_v40 }
 0x486   :  { %vm791_vm3 = vmand %vm787_vm1, %vm788_vm0 }
 0x487   :  { %vm793_vm4 = vmor %vm791_vm3, %vm792_vm2  ;;  %vm795_vm6 = vcmp.ge.s32.totalorder %v778_v41, 100 }
 0x488   :  { %v794_v43 = vsel %vm793_vm4, 1, %v1943_v2  ;;  %vm799_vm8 = vmand %vm795_vm6, %vm796_vm5 }
 0x489   :  { %v803_v35 = vadd.s32 %v794_v43, %v786_v42  ;;  %vm801_vm9 = vmor %vm799_vm8, %vm800_vm7 }
 0x48a   :  { %v802_v44 = vsel %vm801_vm9, 1, %v1943_v2 }
 0x48b   :  { %v804_v12 = vadd.s32 %v803_v35, %v802_v44 }
 0x48d   :  { %v805_v47 = vshll.u32 %v804_v12, 18 }
 0x48f   :  { %v2258_v20 = vor.u32 %v805_v47, %v2213_v62 }
 0x491   :  { %v807_v48 = vor.u32 65536, %v2258_v20  ;;  %v809_v49 = vor.u32 131072, %v2258_v20  ;;  %v811_v50 = vor.u32 196608, %v2258_v20 }
 0x493   :  { %v2264_v51 = vadd.s32 %v807_v48, %v1987_v10  ;;  %v2267_v36 = vadd.s32 %v809_v49, %v1987_v10  ;;  %v2270_v52 = vadd.s32 %v811_v50, %v1987_v10 }
 0x495   :  { %vm817_vm10 = vcmp.lt.s32.totalorder %v2267_v36, 0  ;;  %v818_v62 = vxor.u32 2147483647, %v2267_v36  ;;  %vm813_vm11 = vcmp.lt.s32.totalorder %v2264_v51, 0  ;;  %v814_v53 = vxor.u32 2147483647, %v2264_v51 }
 0x496   :  { %v822_v54 = vxor.u32 2147483647, %v2270_v52  ;;  %vm821_vm12 = vcmp.lt.s32.totalorder %v2270_v52, 0  ;;  %vm895_vm4 = vcmp.le.s32.totalorder %v2264_v51, 2139095040  ;;  %vm899_vm6 = vcmp.lt.s32.totalorder %v2264_v51, 2155872255 }
 0x497   :  { %v819_v45 = vsel %vm817_vm10, %v818_v62, %v2267_v36  ;;  %v815_v55 = vsel %vm813_vm11, %v814_v53, %v2264_v51  ;;  %vm903_vm8 = vcmp.le.s32.totalorder %v2267_v36, 2139095040  ;;  %vm907_vm10 = vcmp.lt.s32.totalorder %v2267_v36, 2155872255 }
 0x498   :  { %vm836_vm13 = vcmp.ge.f32.partialorder %v2186_v24, %v819_v45  ;;  %vm837_vm14 = vcmp.ge.f32.partialorder %v2189_v25, %v819_v45  ;;  %vm825_vm15 = vcmp.ge.f32.partialorder %v2186_v24, %v815_v55  ;;  %vm826_vm0 = vcmp.ge.f32.partialorder %v2189_v25, %v815_v55 }
 0x499   :  { %v838_v56 = vsel %vm836_vm13, 1, %v1943_v2  ;;  %v839_v57 = vsel %vm837_vm14, 1, %v1943_v2  ;;  %v827_v58 = vsel %vm825_vm15, 1, %v1943_v2  ;;  %v828_v59 = vsel %vm826_vm0, 1, %v1943_v2 }
 0x49a   :  { %v840_v60 = vadd.s32 %v839_v57, %v838_v56  ;;  %v829_v13 = vadd.s32 %v828_v59, %v827_v58  ;;  %v823_v63 = vsel %vm821_vm12, %v822_v54, %v2270_v52  ;;  %vm911_vm13 = vcmp.le.s32.totalorder %v2270_v52, 2139095040 }
 0x49b   :  { %vm847_vm1 = vcmp.ge.f32.partialorder %v2186_v24, %v823_v63  ;;  %vm848_vm2 = vcmp.ge.f32.partialorder %v2189_v25, %v823_v63  ;;  %vm915_vm15 = vcmp.lt.s32.totalorder %v2270_v52, 2155872255 }
 0x49c   :  { %v841_v3 = vrot.slane %v840_v60, 4  ;;  %v830_v4 = vrot.slane %v829_v13, 4  ;;  %v849_v6 = vsel %vm847_vm1, 1, %v1943_v2  ;;  %v850_v7 = vsel %vm848_vm2, 1, %v1943_v2 }
 0x49d   :  { %v851_v8 = vadd.s32 %v850_v7, %v849_v6 }
 0x49e   :  { %v842_v61 = vadd.s32 %v841_v3, %v840_v60  ;;  %v831_v9 = vadd.s32 %v830_v4, %v829_v13 }
 0x49f   :  { %v852_v14 = vrot.slane %v851_v8, 4 }
 0x4a0   :  { %v843_v15 = vrot.slane %v842_v61, 2  ;;  %v832_v16 = vrot.slane %v831_v9, 2 }
 0x4a1   :  { %v853_v17 = vadd.s32 %v852_v14, %v851_v8 }
 0x4a2   :  { %v844_v18 = vadd.s32 %v843_v15, %v842_v61  ;;  %v833_v30 = vadd.s32 %v832_v16, %v831_v9 }
 0x4a3   :  { %v854_v21 = vrot.slane %v853_v17, 2 }
 0x4a4   :  { %v845_v22 = vrot.slane %v844_v18, 1  ;;  %v834_v11 = vrot.slane %v833_v30, 1 }
 0x4a5   :  { %v855_v23 = vadd.s32 %v854_v21, %v853_v17 }
 0x4a6   :  { %v846_v26 = vadd.s32 %v845_v22, %v844_v18  ;;  %v835_v27 = vadd.s32 %v834_v11, %v833_v30 }
 0x4a7   :  { %v856_v28 = vrot.slane %v855_v23, 1 }
 0x4a8   :  { %v871_v5 = vshrl.u32 %v846_v26, 16  ;;  %v859_v19 = vshrl.u32 %v835_v27, 16  ;;  %v858_v31 = vand.u32 65535, %v835_v27  ;;  %v870_v46 = vand.u32 65535, %v846_v26 }
 0x4a9   :  { %v857_v1 = vadd.s32 %v856_v28, %v855_v23 }
 0x4aa   :  { %v873_v32 = vcvt.s32.f32 %v871_v5  ;;  %v861_v0 = vcvt.s32.f32 %v859_v19  ;;  %v860_v33 = vcvt.s32.f32 %v858_v31  ;;  %v872_v29 = vcvt.s32.f32 %v870_v46 }
 0x4ab   :  { %v883_v34 = vshrl.u32 %v857_v1, 16  ;;  %v882_v37 = vand.u32 65535, %v857_v1 }
 0x4ac   :  { %876 = vadd.xlane.f32.xlu1 %v873_v32  ;;  %864 = vadd.xlane.f32.xlu0 %v861_v0 }
 0x4ad   :  { %862 = vadd.xlane.f32.xlu2 %v860_v33  ;;  %v885_v38 = vcvt.s32.f32 %v883_v34  ;;  %v884_v39 = vcvt.s32.f32 %v882_v37 }
 0x4b4   :  { %888 = vadd.xlane.f32.xlu1 %v885_v38  ;;  %874 = vadd.xlane.f32.xlu0 %v872_v29 }
 0x4b5   :  { %886 = vadd.xlane.f32.xlu2 %v884_v39 }
 0x51f   :  { %v877_v40 = vpop.xlane.xlu1 %876  ;;  %v865_v41 = vpop.xlane.xlu0 %864 }
 0x520   :  { %v867_v42 = vcvt.f32.s32 %v865_v41  ;;  %v863_v43 = vpop.xlane.xlu2 %862  ;;  %v879_v12 = vcvt.f32.s32 %v877_v40 }
 0x521   :  { %v866_v44 = vcvt.f32.s32 %v863_v43 }
 0x522   :  { %v868_v35 = vshll.u32 %v867_v42, 16  ;;  %v880_v50 = vshll.u32 %v879_v12, 16 }
 0x524   :  { %v869_v47 = vadd.s32 %v868_v35, %v866_v44 }
 0x526   :  { %vm894_vm3 = vcmp.ge.s32.totalorder %v869_v47, 100 }
 0x527   :  { %v889_v48 = vpop.xlane.xlu1 %888  ;;  %v875_v49 = vpop.xlane.xlu0 %874  ;;  %vm898_vm5 = vmand %vm894_vm3, %vm895_vm4 }
 0x528   :  { %v891_v62 = vcvt.f32.s32 %v889_v48  ;;  %v878_v53 = vcvt.f32.s32 %v875_v49  ;;  %v887_v54 = vpop.xlane.xlu2 %886  ;;  %vm900_vm7 = vmor %vm898_vm5, %vm899_vm6 }
 0x529   :  { %v890_v56 = vcvt.f32.s32 %v887_v54  ;;  %v901_v58 = vsel %vm900_vm7, 1, %v1943_v2 }
 0x52a   :  { %v892_v45 = vshll.u32 %v891_v62, 16  ;;  %v881_v55 = vadd.s32 %v880_v50, %v878_v53 }
 0x52c   :  { %vm902_vm9 = vcmp.ge.s32.totalorder %v881_v55, 100  ;;  %v893_v57 = vadd.s32 %v892_v45, %v890_v56 }
 0x52d   :  { %vm906_vm11 = vmand %vm902_vm9, %vm903_vm8 }
 0x52e   :  { %vm908_vm12 = vmor %vm906_vm11, %vm907_vm10  ;;  %vm910_vm14 = vcmp.ge.s32.totalorder %v893_v57, 100 }
 0x52f   :  { %v909_v59 = vsel %vm908_vm12, 1, %v1943_v2  ;;  %vm914_vm0 = vmand %vm910_vm14, %vm911_vm13 }
 0x530   :  { %v918_v51 = vadd.s32 %v909_v59, %v901_v58  ;;  %vm916_vm1 = vmor %vm914_vm0, %vm915_vm15 }
 0x531   :  { %v917_v60 = vsel %vm916_vm1, 1, %v1943_v2 }
 0x532   :  { %v919_v13 = vadd.s32 %v918_v51, %v917_v60 }
 0x534   :  { %v920_v63 = vshll.u32 %v919_v13, 16 }
 0x536   :  { %v2303_v36 = vor.u32 %v920_v63, %v2258_v20 }
 0x538   :  { %v922_v3 = vor.u32 16384, %v2303_v36  ;;  %v924_v4 = vor.u32 32768, %v2303_v36  ;;  %v926_v6 = vor.u32 49152, %v2303_v36 }
 0x53a   :  { %v2309_v7 = vadd.s32 %v922_v3, %v1987_v10  ;;  %v2312_v52 = vadd.s32 %v924_v4, %v1987_v10  ;;  %v2315_v8 = vadd.s32 %v926_v6, %v1987_v10 }
 0x53c   :  { %vm932_vm2 = vcmp.lt.s32.totalorder %v2312_v52, 0  ;;  %v933_v20 = vxor.u32 2147483647, %v2312_v52  ;;  %vm928_vm3 = vcmp.lt.s32.totalorder %v2309_v7, 0  ;;  %v929_v61 = vxor.u32 2147483647, %v2309_v7 }
 0x53d   :  { %v937_v9 = vxor.u32 2147483647, %v2315_v8  ;;  %vm936_vm4 = vcmp.lt.s32.totalorder %v2315_v8, 0  ;;  %vm1010_vm12 = vcmp.le.s32.totalorder %v2309_v7, 2139095040  ;;  %vm1014_vm14 = vcmp.lt.s32.totalorder %v2309_v7, 2155872255 }
 0x53e   :  { %v934_v14 = vsel %vm932_vm2, %v933_v20, %v2312_v52  ;;  %v930_v15 = vsel %vm928_vm3, %v929_v61, %v2309_v7  ;;  %vm1018_vm0 = vcmp.le.s32.totalorder %v2312_v52, 2139095040  ;;  %vm1022_vm2 = vcmp.lt.s32.totalorder %v2312_v52, 2155872255 }
 0x53f   :  { %vm951_vm5 = vcmp.ge.f32.partialorder %v2186_v24, %v934_v14  ;;  %vm952_vm6 = vcmp.ge.f32.partialorder %v2189_v25, %v934_v14  ;;  %vm940_vm7 = vcmp.ge.f32.partialorder %v2186_v24, %v930_v15  ;;  %vm941_vm8 = vcmp.ge.f32.partialorder %v2189_v25, %v930_v15 }
 0x540   :  { %v953_v16 = vsel %vm951_vm5, 1, %v1943_v2  ;;  %v954_v17 = vsel %vm952_vm6, 1, %v1943_v2  ;;  %v942_v18 = vsel %vm940_vm7, 1, %v1943_v2  ;;  %v943_v30 = vsel %vm941_vm8, 1, %v1943_v2 }
 0x541   :  { %v955_v21 = vadd.s32 %v954_v17, %v953_v16  ;;  %v944_v22 = vadd.s32 %v943_v30, %v942_v18  ;;  %v938_v11 = vsel %vm936_vm4, %v937_v9, %v2315_v8  ;;  %vm1026_vm5 = vcmp.le.s32.totalorder %v2315_v8, 2139095040 }
 0x542   :  { %vm962_vm9 = vcmp.ge.f32.partialorder %v2186_v24, %v938_v11  ;;  %vm963_vm10 = vcmp.ge.f32.partialorder %v2189_v25, %v938_v11  ;;  %vm1030_vm7 = vcmp.lt.s32.totalorder %v2315_v8, 2155872255 }
 0x543   :  { %v956_v23 = vrot.slane %v955_v21, 4  ;;  %v945_v26 = vrot.slane %v944_v22, 4  ;;  %v964_v27 = vsel %vm962_vm9, 1, %v1943_v2  ;;  %v965_v28 = vsel %vm963_vm10, 1, %v1943_v2 }
 0x544   :  { %v966_v5 = vadd.s32 %v965_v28, %v964_v27 }
 0x545   :  { %v957_v19 = vadd.s32 %v956_v23, %v955_v21  ;;  %v946_v31 = vadd.s32 %v945_v26, %v944_v22 }
 0x546   :  { %v967_v32 = vrot.slane %v966_v5, 4 }
 0x547   :  { %v958_v0 = vrot.slane %v957_v19, 2  ;;  %v947_v33 = vrot.slane %v946_v31, 2 }
 0x548   :  { %v968_v1 = vadd.s32 %v967_v32, %v966_v5 }
 0x549   :  { %v959_v34 = vadd.s32 %v958_v0, %v957_v19  ;;  %v948_v46 = vadd.s32 %v947_v33, %v946_v31 }
 0x54a   :  { %v969_v37 = vrot.slane %v968_v1, 2 }
 0x54b   :  { %v960_v38 = vrot.slane %v959_v34, 1  ;;  %v949_v29 = vrot.slane %v948_v46, 1 }
 0x54c   :  { %v970_v39 = vadd.s32 %v969_v37, %v968_v1 }
 0x54d   :  { %v961_v40 = vadd.s32 %v960_v38, %v959_v34  ;;  %v950_v41 = vadd.s32 %v949_v29, %v948_v46 }
 0x54e   :  { %v971_v42 = vrot.slane %v970_v39, 1 }
 0x54f   :  { %v986_v43 = vshrl.u32 %v961_v40, 16  ;;  %v974_v35 = vshrl.u32 %v950_v41, 16  ;;  %v973_v44 = vand.u32 65535, %v950_v41  ;;  %v985_v62 = vand.u32 65535, %v961_v40 }
 0x550   :  { %v972_v49 = vadd.s32 %v971_v42, %v970_v39 }
 0x551   :  { %v988_v12 = vcvt.s32.f32 %v986_v43  ;;  %v976_v47 = vcvt.s32.f32 %v974_v35  ;;  %v975_v48 = vcvt.s32.f32 %v973_v44  ;;  %v987_v45 = vcvt.s32.f32 %v985_v62 }
 0x552   :  { %v998_v50 = vshrl.u32 %v972_v49, 16  ;;  %v997_v53 = vand.u32 65535, %v972_v49 }
 0x553   :  { %991 = vadd.xlane.f32.xlu1 %v988_v12  ;;  %979 = vadd.xlane.f32.xlu0 %v976_v47 }
 0x554   :  { %977 = vadd.xlane.f32.xlu2 %v975_v48  ;;  %v1000_v54 = vcvt.s32.f32 %v998_v50  ;;  %v999_v55 = vcvt.s32.f32 %v997_v53 }
 0x55b   :  { %1003 = vadd.xlane.f32.xlu1 %v1000_v54  ;;  %989 = vadd.xlane.f32.xlu0 %v987_v45 }
 0x55c   :  { %1001 = vadd.xlane.f32.xlu2 %v999_v55 }
 0x5c6   :  { %v992_v56 = vpop.xlane.xlu1 %991  ;;  %v980_v57 = vpop.xlane.xlu0 %979 }
 0x5c7   :  { %v982_v58 = vcvt.f32.s32 %v980_v57  ;;  %v978_v59 = vpop.xlane.xlu2 %977  ;;  %v994_v13 = vcvt.f32.s32 %v992_v56 }
 0x5c8   :  { %v981_v60 = vcvt.f32.s32 %v978_v59 }
 0x5c9   :  { %v983_v51 = vshll.u32 %v982_v58, 16  ;;  %v995_v6 = vshll.u32 %v994_v13, 16 }
 0x5cb   :  { %v984_v63 = vadd.s32 %v983_v51, %v981_v60 }
 0x5cd   :  { %vm1009_vm11 = vcmp.ge.s32.totalorder %v984_v63, 100 }
 0x5ce   :  { %v1004_v3 = vpop.xlane.xlu1 %1003  ;;  %v990_v4 = vpop.xlane.xlu0 %989  ;;  %vm1013_vm13 = vmand %vm1009_vm11, %vm1010_vm12 }
 0x5cf   :  { %v1006_v20 = vcvt.f32.s32 %v1004_v3  ;;  %v993_v61 = vcvt.f32.s32 %v990_v4  ;;  %v1002_v9 = vpop.xlane.xlu2 %1001  ;;  %vm1015_vm15 = vmor %vm1013_vm13, %vm1014_vm14 }
 0x5d0   :  { %v1005_v16 = vcvt.f32.s32 %v1002_v9  ;;  %v1016_v18 = vsel %vm1015_vm15, 1, %v1943_v2 }
 0x5d1   :  { %v1007_v14 = vshll.u32 %v1006_v20, 16  ;;  %v996_v15 = vadd.s32 %v995_v6, %v993_v61 }
 0x5d3   :  { %vm1017_vm1 = vcmp.ge.s32.totalorder %v996_v15, 100  ;;  %v1008_v17 = vadd.s32 %v1007_v14, %v1005_v16 }
 0x5d4   :  { %vm1021_vm3 = vmand %vm1017_vm1, %vm1018_vm0 }
 0x5d5   :  { %vm1023_vm4 = vmor %vm1021_vm3, %vm1022_vm2  ;;  %vm1025_vm6 = vcmp.ge.s32.totalorder %v1008_v17, 100 }
 0x5d6   :  { %v1024_v30 = vsel %vm1023_vm4, 1, %v1943_v2  ;;  %vm1029_vm8 = vmand %vm1025_vm6, %vm1026_vm5 }
 0x5d7   :  { %v1033_v7 = vadd.s32 %v1024_v30, %v1016_v18  ;;  %vm1031_vm9 = vmor %vm1029_vm8, %vm1030_vm7 }
 0x5d8   :  { %v1032_v21 = vsel %vm1031_vm9, 1, %v1943_v2 }
 0x5d9   :  { %v1034_v22 = vadd.s32 %v1033_v7, %v1032_v21 }
 0x5db   :  { %v1035_v11 = vshll.u32 %v1034_v22, 14 }
 0x5dd   :  { %v2348_v52 = vor.u32 %v1035_v11, %v2303_v36 }
 0x5df   :  { %v1037_v23 = vor.u32 4096, %v2348_v52  ;;  %v1039_v26 = vor.u32 8192, %v2348_v52  ;;  %v1041_v27 = vor.u32 12288, %v2348_v52 }
 0x5e1   :  { %v2354_v28 = vadd.s32 %v1037_v23, %v1987_v10  ;;  %v2357_v8 = vadd.s32 %v1039_v26, %v1987_v10  ;;  %v2360_v5 = vadd.s32 %v1041_v27, %v1987_v10 }
 0x5e3   :  { %vm1047_vm10 = vcmp.lt.s32.totalorder %v2357_v8, 0  ;;  %v1048_v36 = vxor.u32 2147483647, %v2357_v8  ;;  %vm1043_vm11 = vcmp.lt.s32.totalorder %v2354_v28, 0  ;;  %v1044_v19 = vxor.u32 2147483647, %v2354_v28 }
 0x5e4   :  { %v1052_v31 = vxor.u32 2147483647, %v2360_v5  ;;  %vm1051_vm12 = vcmp.lt.s32.totalorder %v2360_v5, 0  ;;  %vm1125_vm4 = vcmp.le.s32.totalorder %v2354_v28, 2139095040  ;;  %vm1129_vm6 = vcmp.lt.s32.totalorder %v2354_v28, 2155872255 }
 0x5e5   :  { %v1049_v32 = vsel %vm1047_vm10, %v1048_v36, %v2357_v8  ;;  %v1045_v0 = vsel %vm1043_vm11, %v1044_v19, %v2354_v28  ;;  %vm1133_vm8 = vcmp.le.s32.totalorder %v2357_v8, 2139095040  ;;  %vm1137_vm10 = vcmp.lt.s32.totalorder %v2357_v8, 2155872255 }
 0x5e6   :  { %vm1066_vm13 = vcmp.ge.f32.partialorder %v2186_v24, %v1049_v32  ;;  %vm1067_vm14 = vcmp.ge.f32.partialorder %v2189_v25, %v1049_v32  ;;  %vm1055_vm15 = vcmp.ge.f32.partialorder %v2186_v24, %v1045_v0  ;;  %vm1056_vm0 = vcmp.ge.f32.partialorder %v2189_v25, %v1045_v0 }
 0x5e7   :  { %v1068_v33 = vsel %vm1066_vm13, 1, %v1943_v2  ;;  %v1069_v1 = vsel %vm1067_vm14, 1, %v1943_v2  ;;  %v1057_v34 = vsel %vm1055_vm15, 1, %v1943_v2  ;;  %v1058_v46 = vsel %vm1056_vm0, 1, %v1943_v2 }
 0x5e8   :  { %v1070_v37 = vadd.s32 %v1069_v1, %v1068_v33  ;;  %v1059_v38 = vadd.s32 %v1058_v46, %v1057_v34  ;;  %v1053_v29 = vsel %vm1051_vm12, %v1052_v31, %v2360_v5  ;;  %vm1141_vm13 = vcmp.le.s32.totalorder %v2360_v5, 2139095040 }
 0x5e9   :  { %vm1077_vm1 = vcmp.ge.f32.partialorder %v2186_v24, %v1053_v29  ;;  %vm1078_vm2 = vcmp.ge.f32.partialorder %v2189_v25, %v1053_v29  ;;  %vm1145_vm15 = vcmp.lt.s32.totalorder %v2360_v5, 2155872255 }
 0x5ea   :  { %v1071_v39 = vrot.slane %v1070_v37, 4  ;;  %v1060_v40 = vrot.slane %v1059_v38, 4  ;;  %v1079_v41 = vsel %vm1077_vm1, 1, %v1943_v2  ;;  %v1080_v42 = vsel %vm1078_vm2, 1, %v1943_v2 }
 0x5eb   :  { %v1081_v43 = vadd.s32 %v1080_v42, %v1079_v41 }
 0x5ec   :  { %v1072_v35 = vadd.s32 %v1071_v39, %v1070_v37  ;;  %v1061_v44 = vadd.s32 %v1060_v40, %v1059_v38 }
 0x5ed   :  { %v1082_v12 = vrot.slane %v1081_v43, 4 }
 0x5ee   :  { %v1073_v47 = vrot.slane %v1072_v35, 2  ;;  %v1062_v48 = vrot.slane %v1061_v44, 2 }
 0x5ef   :  { %v1083_v49 = vadd.s32 %v1082_v12, %v1081_v43  ;;  %v2415_v12 = vld [vmem:[#allocation2] sm:$0xff] }
 0x5f0   :  { %v1074_v50 = vadd.s32 %v1073_v47, %v1072_v35  ;;  %v1063_v62 = vadd.s32 %v1062_v48, %v1061_v44  ;;  %v2418_v47 = vld [vmem:[#allocation2 + $0x8] sm:$0xff] }
 0x5f1   :  { %v1084_v53 = vrot.slane %v1083_v49, 2 }
 0x5f2   :  { %v1075_v54 = vrot.slane %v1074_v50, 1  ;;  %v1064_v24 = vrot.slane %v1063_v62, 1 }
 0x5f3   :  { %v1085_v45 = vadd.s32 %v1084_v53, %v1083_v49 }
 0x5f4   :  { %v1076_v25 = vadd.s32 %v1075_v54, %v1074_v50  ;;  %v1065_v55 = vadd.s32 %v1064_v24, %v1063_v62 }
 0x5f5   :  { %v1086_v56 = vrot.slane %v1085_v45, 1 }
 0x5f6   :  { %v1101_v57 = vshrl.u32 %v1076_v25, 16  ;;  %v1089_v58 = vshrl.u32 %v1065_v55, 16  ;;  %v1088_v59 = vand.u32 65535, %v1065_v55  ;;  %v1100_v4 = vand.u32 65535, %v1076_v25 }
 0x5f7   :  { %v1087_v63 = vadd.s32 %v1086_v56, %v1085_v45 }
 0x5f8   :  { %v1103_v51 = vcvt.s32.f32 %v1101_v57  ;;  %v1091_v60 = vcvt.s32.f32 %v1089_v58  ;;  %v1090_v13 = vcvt.s32.f32 %v1088_v59  ;;  %v1102_v61 = vcvt.s32.f32 %v1100_v4 }
 0x5f9   :  { %v1113_v3 = vshrl.u32 %v1087_v63, 16  ;;  %v1112_v6 = vand.u32 65535, %v1087_v63 }
 0x5fa   :  { %1106 = vadd.xlane.f32.xlu1 %v1103_v51  ;;  %1094 = vadd.xlane.f32.xlu0 %v1091_v60 }
 0x5fb   :  { %1092 = vadd.xlane.f32.xlu2 %v1090_v13  ;;  %v1115_v20 = vcvt.s32.f32 %v1113_v3  ;;  %v1114_v9 = vcvt.s32.f32 %v1112_v6 }
 0x602   :  { %1118 = vadd.xlane.f32.xlu1 %v1115_v20  ;;  %1104 = vadd.xlane.f32.xlu0 %v1102_v61 }
 0x603   :  { %1116 = vadd.xlane.f32.xlu2 %v1114_v9 }
 0x66d   :  { %v1107_v14 = vpop.xlane.xlu1 %1106  ;;  %v1095_v15 = vpop.xlane.xlu0 %1094 }
 0x66e   :  { %v1097_v16 = vcvt.f32.s32 %v1095_v15  ;;  %v1093_v17 = vpop.xlane.xlu2 %1092  ;;  %v1109_v7 = vcvt.f32.s32 %v1107_v14 }
 0x66f   :  { %v1096_v30 = vcvt.f32.s32 %v1093_v17 }
 0x670   :  { %v1098_v18 = vshll.u32 %v1097_v16, 16  ;;  %v1110_v23 = vshll.u32 %v1109_v7, 16 }
 0x672   :  { %v1099_v21 = vadd.s32 %v1098_v18, %v1096_v30 }
 0x674   :  { %vm1124_vm3 = vcmp.ge.s32.totalorder %v1099_v21, 100 }
 0x675   :  { %v1119_v22 = vpop.xlane.xlu1 %1118  ;;  %v1105_v11 = vpop.xlane.xlu0 %1104  ;;  %vm1128_vm5 = vmand %vm1124_vm3, %vm1125_vm4 }
 0x676   :  { %v1121_v26 = vcvt.f32.s32 %v1119_v22  ;;  %v1108_v27 = vcvt.f32.s32 %v1105_v11  ;;  %v1117_v36 = vpop.xlane.xlu2 %1116  ;;  %vm1130_vm7 = vmor %vm1128_vm5, %vm1129_vm6 }
 0x677   :  { %v1120_v32 = vcvt.f32.s32 %v1117_v36  ;;  %v1131_v33 = vsel %vm1130_vm7, 1, %v1943_v2 }
 0x678   :  { %v1122_v19 = vshll.u32 %v1121_v26, 16  ;;  %v1111_v31 = vadd.s32 %v1110_v23, %v1108_v27 }
 0x67a   :  { %vm1132_vm9 = vcmp.ge.s32.totalorder %v1111_v31, 100  ;;  %v1123_v0 = vadd.s32 %v1122_v19, %v1120_v32 }
 0x67b   :  { %vm1136_vm11 = vmand %vm1132_vm9, %vm1133_vm8 }
 0x67c   :  { %vm1138_vm12 = vmor %vm1136_vm11, %vm1137_vm10  ;;  %vm1140_vm14 = vcmp.ge.s32.totalorder %v1123_v0, 100 }
 0x67d   :  { %v1139_v1 = vsel %vm1138_vm12, 1, %v1943_v2  ;;  %vm1144_vm0 = vmand %vm1140_vm14, %vm1141_vm13 }
 0x67e   :  { %v1148_v28 = vadd.s32 %v1139_v1, %v1131_v33  ;;  %vm1146_vm1 = vmor %vm1144_vm0, %vm1145_vm15 }
 0x67f   :  { %v1147_v34 = vsel %vm1146_vm1, 1, %v1943_v2 }
 0x680   :  { %v1149_v46 = vadd.s32 %v1148_v28, %v1147_v34 }
 0x682   :  { %v1150_v37 = vshll.u32 %v1149_v46, 12 }
 0x684   :  { %v2393_v8 = vor.u32 %v1150_v37, %v2348_v52 }
 0x686   :  { %v1152_v38 = vor.u32 1024, %v2393_v8  ;;  %v1154_v29 = vor.u32 2048, %v2393_v8  ;;  %v1156_v39 = vor.u32 3072, %v2393_v8 }
 0x688   :  { %v2399_v40 = vadd.s32 %v1152_v38, %v1987_v10  ;;  %v2402_v5 = vadd.s32 %v1154_v29, %v1987_v10  ;;  %v2405_v41 = vadd.s32 %v1156_v39, %v1987_v10 }
 0x68a   :  { %vm1162_vm2 = vcmp.lt.s32.totalorder %v2402_v5, 0  ;;  %v1163_v52 = vxor.u32 2147483647, %v2402_v5  ;;  %vm1158_vm3 = vcmp.lt.s32.totalorder %v2399_v40, 0  ;;  %v1159_v42 = vxor.u32 2147483647, %v2399_v40 }
 0x68b   :  { %v1167_v43 = vxor.u32 2147483647, %v2405_v41  ;;  %vm1166_vm4 = vcmp.lt.s32.totalorder %v2405_v41, 0  ;;  %vm1240_vm12 = vcmp.le.s32.totalorder %v2399_v40, 2139095040  ;;  %vm1244_vm14 = vcmp.lt.s32.totalorder %v2399_v40, 2155872255 }
 0x68c   :  { %v1164_v35 = vsel %vm1162_vm2, %v1163_v52, %v2402_v5  ;;  %v1160_v44 = vsel %vm1158_vm3, %v1159_v42, %v2399_v40  ;;  %vm1248_vm0 = vcmp.le.s32.totalorder %v2402_v5, 2139095040  ;;  %vm1252_vm2 = vcmp.lt.s32.totalorder %v2402_v5, 2155872255 }
 0x68d   :  { %vm1181_vm5 = vcmp.ge.f32.partialorder %v2415_v12, %v1164_v35  ;;  %vm1182_vm6 = vcmp.ge.f32.partialorder %v2418_v47, %v1164_v35  ;;  %vm1170_vm7 = vcmp.ge.f32.partialorder %v2415_v12, %v1160_v44  ;;  %vm1171_vm8 = vcmp.ge.f32.partialorder %v2418_v47, %v1160_v44 }
 0x68e   :  { %v1183_v48 = vsel %vm1181_vm5, 1, %v1943_v2  ;;  %v1184_v49 = vsel %vm1182_vm6, 1, %v1943_v2  ;;  %v1172_v50 = vsel %vm1170_vm7, 1, %v1943_v2  ;;  %v1173_v62 = vsel %vm1171_vm8, 1, %v1943_v2 }
 0x68f   :  { %v1185_v53 = vadd.s32 %v1184_v49, %v1183_v48  ;;  %v1174_v54 = vadd.s32 %v1173_v62, %v1172_v50  ;;  %v1168_v24 = vsel %vm1166_vm4, %v1167_v43, %v2405_v41  ;;  %vm1256_vm5 = vcmp.le.s32.totalorder %v2405_v41, 2139095040 }
 0x690   :  { %vm1192_vm9 = vcmp.ge.f32.partialorder %v2415_v12, %v1168_v24  ;;  %vm1193_vm10 = vcmp.ge.f32.partialorder %v2418_v47, %v1168_v24  ;;  %vm1260_vm7 = vcmp.lt.s32.totalorder %v2405_v41, 2155872255 }
 0x691   :  { %v1186_v45 = vrot.slane %v1185_v53, 4  ;;  %v1175_v25 = vrot.slane %v1174_v54, 4  ;;  %v1194_v55 = vsel %vm1192_vm9, 1, %v1943_v2  ;;  %v1195_v56 = vsel %vm1193_vm10, 1, %v1943_v2 }
 0x692   :  { %v1196_v57 = vadd.s32 %v1195_v56, %v1194_v55 }
 0x693   :  { %v1187_v58 = vadd.s32 %v1186_v45, %v1185_v53  ;;  %v1176_v59 = vadd.s32 %v1175_v25, %v1174_v54 }
 0x694   :  { %v1197_v51 = vrot.slane %v1196_v57, 4 }
 0x695   :  { %v1188_v60 = vrot.slane %v1187_v58, 2  ;;  %v1177_v13 = vrot.slane %v1176_v59, 2 }
 0x696   :  { %v1198_v63 = vadd.s32 %v1197_v51, %v1196_v57 }
 0x697   :  { %v1189_v3 = vadd.s32 %v1188_v60, %v1187_v58  ;;  %v1178_v4 = vadd.s32 %v1177_v13, %v1176_v59 }
 0x698   :  { %v1199_v6 = vrot.slane %v1198_v63, 2 }
 0x699   :  { %v1190_v20 = vrot.slane %v1189_v3, 1  ;;  %v1179_v61 = vrot.slane %v1178_v4, 1 }
 0x69a   :  { %v1200_v9 = vadd.s32 %v1199_v6, %v1198_v63 }
 0x69b   :  { %v1191_v14 = vadd.s32 %v1190_v20, %v1189_v3  ;;  %v1180_v15 = vadd.s32 %v1179_v61, %v1178_v4 }
 0x69c   :  { %v1201_v16 = vrot.slane %v1200_v9, 1 }
 0x69d   :  { %v1216_v17 = vshrl.u32 %v1191_v14, 16  ;;  %v1204_v18 = vshrl.u32 %v1180_v15, 16  ;;  %v1203_v30 = vand.u32 65535, %v1180_v15  ;;  %v1215_v26 = vand.u32 65535, %v1191_v14 }
 0x69e   :  { %v1202_v11 = vadd.s32 %v1201_v16, %v1200_v9 }
 0x69f   :  { %v1218_v7 = vcvt.s32.f32 %v1216_v17  ;;  %v1206_v21 = vcvt.s32.f32 %v1204_v18  ;;  %v1205_v22 = vcvt.s32.f32 %v1203_v30  ;;  %v1217_v19 = vcvt.s32.f32 %v1215_v26 }
 0x6a0   :  { %v1228_v23 = vshrl.u32 %v1202_v11, 16  ;;  %v1227_v27 = vand.u32 65535, %v1202_v11 }
 0x6a1   :  { %1221 = vadd.xlane.f32.xlu1 %v1218_v7  ;;  %1209 = vadd.xlane.f32.xlu0 %v1206_v21 }
 0x6a2   :  { %1207 = vadd.xlane.f32.xlu2 %v1205_v22  ;;  %v1230_v36 = vcvt.s32.f32 %v1228_v23  ;;  %v1229_v31 = vcvt.s32.f32 %v1227_v27 }
 0x6a9   :  { %1233 = vadd.xlane.f32.xlu1 %v1230_v36  ;;  %1219 = vadd.xlane.f32.xlu0 %v1217_v19 }
 0x6aa   :  { %1231 = vadd.xlane.f32.xlu2 %v1229_v31 }
 0x714   :  { %v1222_v32 = vpop.xlane.xlu1 %1221  ;;  %v1210_v0 = vpop.xlane.xlu0 %1209 }
 0x715   :  { %v1212_v33 = vcvt.f32.s32 %v1210_v0  ;;  %v1208_v1 = vpop.xlane.xlu2 %1207  ;;  %v1224_v46 = vcvt.f32.s32 %v1222_v32 }
 0x716   :  { %v1211_v34 = vcvt.f32.s32 %v1208_v1 }
 0x717   :  { %v1213_v28 = vshll.u32 %v1212_v33, 16  ;;  %v1225_v39 = vshll.u32 %v1224_v46, 16 }
 0x719   :  { %v1214_v37 = vadd.s32 %v1213_v28, %v1211_v34 }
 0x71b   :  { %vm1239_vm11 = vcmp.ge.s32.totalorder %v1214_v37, 100 }
 0x71c   :  { %v1234_v38 = vpop.xlane.xlu1 %1233  ;;  %v1220_v29 = vpop.xlane.xlu0 %1219  ;;  %vm1243_vm13 = vmand %vm1239_vm11, %vm1240_vm12 }
 0x71d   :  { %v1236_v52 = vcvt.f32.s32 %v1234_v38  ;;  %v1223_v42 = vcvt.f32.s32 %v1220_v29  ;;  %v1232_v43 = vpop.xlane.xlu2 %1231  ;;  %vm1245_vm15 = vmor %vm1243_vm13, %vm1244_vm14 }
 0x71e   :  { %v1235_v48 = vcvt.f32.s32 %v1232_v43  ;;  %v1246_v50 = vsel %vm1245_vm15, 1, %v1943_v2 }
 0x71f   :  { %v1237_v35 = vshll.u32 %v1236_v52, 16  ;;  %v1226_v44 = vadd.s32 %v1225_v39, %v1223_v42 }
 0x721   :  { %vm1247_vm1 = vcmp.ge.s32.totalorder %v1226_v44, 100  ;;  %v1238_v49 = vadd.s32 %v1237_v35, %v1235_v48 }
 0x722   :  { %vm1251_vm3 = vmand %vm1247_vm1, %vm1248_vm0 }
 0x723   :  { %vm1253_vm4 = vmor %vm1251_vm3, %vm1252_vm2  ;;  %vm1255_vm6 = vcmp.ge.s32.totalorder %v1238_v49, 100 }
 0x724   :  { %v1254_v62 = vsel %vm1253_vm4, 1, %v1943_v2  ;;  %vm1259_vm8 = vmand %vm1255_vm6, %vm1256_vm5 }
 0x725   :  { %v1263_v40 = vadd.s32 %v1254_v62, %v1246_v50  ;;  %vm1261_vm9 = vmor %vm1259_vm8, %vm1260_vm7 }
 0x726   :  { %v1262_v53 = vsel %vm1261_vm9, 1, %v1943_v2 }
 0x727   :  { %v1264_v54 = vadd.s32 %v1263_v40, %v1262_v53 }
 0x729   :  { %v1265_v24 = vshll.u32 %v1264_v54, 10 }
 0x72b   :  { %v2442_v5 = vor.u32 %v1265_v24, %v2393_v8 }
 0x72d   :  { %v1267_v45 = vor.u32 256, %v2442_v5  ;;  %v1269_v25 = vor.u32 512, %v2442_v5  ;;  %v1271_v55 = vor.u32 768, %v2442_v5 }
 0x72f   :  { %v2448_v56 = vadd.s32 %v1267_v45, %v1987_v10  ;;  %v2451_v41 = vadd.s32 %v1269_v25, %v1987_v10  ;;  %v2454_v57 = vadd.s32 %v1271_v55, %v1987_v10 }
 0x731   :  { %vm1277_vm10 = vcmp.lt.s32.totalorder %v2451_v41, 0  ;;  %v1278_v8 = vxor.u32 2147483647, %v2451_v41  ;;  %vm1273_vm11 = vcmp.lt.s32.totalorder %v2448_v56, 0  ;;  %v1274_v58 = vxor.u32 2147483647, %v2448_v56 }
 0x732   :  { %v1282_v59 = vxor.u32 2147483647, %v2454_v57  ;;  %vm1281_vm12 = vcmp.lt.s32.totalorder %v2454_v57, 0  ;;  %vm1355_vm4 = vcmp.le.s32.totalorder %v2448_v56, 2139095040  ;;  %vm1359_vm6 = vcmp.lt.s32.totalorder %v2448_v56, 2155872255 }
 0x733   :  { %v1279_v51 = vsel %vm1277_vm10, %v1278_v8, %v2451_v41  ;;  %v1275_v60 = vsel %vm1273_vm11, %v1274_v58, %v2448_v56  ;;  %vm1363_vm8 = vcmp.le.s32.totalorder %v2451_v41, 2139095040  ;;  %vm1367_vm10 = vcmp.lt.s32.totalorder %v2451_v41, 2155872255 }
 0x734   :  { %vm1296_vm13 = vcmp.ge.f32.partialorder %v2415_v12, %v1279_v51  ;;  %vm1297_vm14 = vcmp.ge.f32.partialorder %v2418_v47, %v1279_v51  ;;  %vm1285_vm15 = vcmp.ge.f32.partialorder %v2415_v12, %v1275_v60  ;;  %vm1286_vm0 = vcmp.ge.f32.partialorder %v2418_v47, %v1275_v60 }
 0x735   :  { %v1298_v13 = vsel %vm1296_vm13, 1, %v1943_v2  ;;  %v1299_v63 = vsel %vm1297_vm14, 1, %v1943_v2  ;;  %v1287_v3 = vsel %vm1285_vm15, 1, %v1943_v2  ;;  %v1288_v4 = vsel %vm1286_vm0, 1, %v1943_v2 }
 0x736   :  { %v1300_v6 = vadd.s32 %v1299_v63, %v1298_v13  ;;  %v1289_v20 = vadd.s32 %v1288_v4, %v1287_v3  ;;  %v1283_v61 = vsel %vm1281_vm12, %v1282_v59, %v2454_v57  ;;  %vm1371_vm13 = vcmp.le.s32.totalorder %v2454_v57, 2139095040 }
 0x737   :  { %vm1307_vm1 = vcmp.ge.f32.partialorder %v2415_v12, %v1283_v61  ;;  %vm1308_vm2 = vcmp.ge.f32.partialorder %v2418_v47, %v1283_v61  ;;  %vm1375_vm15 = vcmp.lt.s32.totalorder %v2454_v57, 2155872255 }
 0x738   :  { %v1301_v9 = vrot.slane %v1300_v6, 4  ;;  %v1290_v14 = vrot.slane %v1289_v20, 4  ;;  %v1309_v15 = vsel %vm1307_vm1, 1, %v1943_v2  ;;  %v1310_v16 = vsel %vm1308_vm2, 1, %v1943_v2 }
 0x739   :  { %v1311_v17 = vadd.s32 %v1310_v16, %v1309_v15 }
 0x73a   :  { %v1302_v18 = vadd.s32 %v1301_v9, %v1300_v6  ;;  %v1291_v30 = vadd.s32 %v1290_v14, %v1289_v20 }
 0x73b   :  { %v1312_v7 = vrot.slane %v1311_v17, 4 }
 0x73c   :  { %v1303_v21 = vrot.slane %v1302_v18, 2  ;;  %v1292_v22 = vrot.slane %v1291_v30, 2 }
 0x73d   :  { %v1313_v11 = vadd.s32 %v1312_v7, %v1311_v17 }
 0x73e   :  { %v1304_v23 = vadd.s32 %v1303_v21, %v1302_v18  ;;  %v1293_v26 = vadd.s32 %v1292_v22, %v1291_v30 }
 0x73f   :  { %v1314_v27 = vrot.slane %v1313_v11, 2 }
 0x740   :  { %v1305_v36 = vrot.slane %v1304_v23, 1  ;;  %v1294_v19 = vrot.slane %v1293_v26, 1 }
 0x741   :  { %v1315_v31 = vadd.s32 %v1314_v27, %v1313_v11 }
 0x742   :  { %v1306_v32 = vadd.s32 %v1305_v36, %v1304_v23  ;;  %v1295_v0 = vadd.s32 %v1294_v19, %v1293_v26 }
 0x743   :  { %v1316_v33 = vrot.slane %v1315_v31, 1 }
 0x744   :  { %v1331_v1 = vshrl.u32 %v1306_v32, 16  ;;  %v1319_v28 = vshrl.u32 %v1295_v0, 16  ;;  %v1318_v34 = vand.u32 65535, %v1295_v0  ;;  %v1330_v52 = vand.u32 65535, %v1306_v32 }
 0x745   :  { %v1317_v29 = vadd.s32 %v1316_v33, %v1315_v31 }
 0x746   :  { %v1333_v46 = vcvt.s32.f32 %v1331_v1  ;;  %v1321_v37 = vcvt.s32.f32 %v1319_v28  ;;  %v1320_v38 = vcvt.s32.f32 %v1318_v34  ;;  %v1332_v35 = vcvt.s32.f32 %v1330_v52 }
 0x747   :  { %v1343_v39 = vshrl.u32 %v1317_v29, 16  ;;  %v1342_v42 = vand.u32 65535, %v1317_v29 }
 0x748   :  { %1336 = vadd.xlane.f32.xlu1 %v1333_v46  ;;  %1324 = vadd.xlane.f32.xlu0 %v1321_v37 }
 0x749   :  { %1322 = vadd.xlane.f32.xlu2 %v1320_v38  ;;  %v1345_v43 = vcvt.s32.f32 %v1343_v39  ;;  %v1344_v44 = vcvt.s32.f32 %v1342_v42 }
 0x750   :  { %1348 = vadd.xlane.f32.xlu1 %v1345_v43  ;;  %1334 = vadd.xlane.f32.xlu0 %v1332_v35 }
 0x751   :  { %1346 = vadd.xlane.f32.xlu2 %v1344_v44 }
 0x7bb   :  { %v1337_v48 = vpop.xlane.xlu1 %1336  ;;  %v1325_v49 = vpop.xlane.xlu0 %1324 }
 0x7bc   :  { %v1327_v50 = vcvt.f32.s32 %v1325_v49  ;;  %v1323_v62 = vpop.xlane.xlu2 %1322  ;;  %v1339_v54 = vcvt.f32.s32 %v1337_v48 }
 0x7bd   :  { %v1326_v53 = vcvt.f32.s32 %v1323_v62 }
 0x7be   :  { %v1328_v40 = vshll.u32 %v1327_v50, 16  ;;  %v1340_v55 = vshll.u32 %v1339_v54, 16 }
 0x7c0   :  { %v1329_v24 = vadd.s32 %v1328_v40, %v1326_v53 }
 0x7c2   :  { %vm1354_vm3 = vcmp.ge.s32.totalorder %v1329_v24, 100 }
 0x7c3   :  { %v1349_v45 = vpop.xlane.xlu1 %1348  ;;  %v1335_v25 = vpop.xlane.xlu0 %1334  ;;  %vm1358_vm5 = vmand %vm1354_vm3, %vm1355_vm4 }
 0x7c4   :  { %v1351_v8 = vcvt.f32.s32 %v1349_v45  ;;  %v1338_v58 = vcvt.f32.s32 %v1335_v25  ;;  %v1347_v59 = vpop.xlane.xlu2 %1346  ;;  %vm1360_vm7 = vmor %vm1358_vm5, %vm1359_vm6 }
 0x7c5   :  { %v1350_v13 = vcvt.f32.s32 %v1347_v59  ;;  %v1361_v3 = vsel %vm1360_vm7, 1, %v1943_v2 }
 0x7c6   :  { %v1352_v51 = vshll.u32 %v1351_v8, 16  ;;  %v1341_v60 = vadd.s32 %v1340_v55, %v1338_v58 }
 0x7c8   :  { %vm1362_vm9 = vcmp.ge.s32.totalorder %v1341_v60, 100  ;;  %v1353_v63 = vadd.s32 %v1352_v51, %v1350_v13 }
 0x7c9   :  { %vm1366_vm11 = vmand %vm1362_vm9, %vm1363_vm8 }
 0x7ca   :  { %vm1368_vm12 = vmor %vm1366_vm11, %vm1367_vm10  ;;  %vm1370_vm14 = vcmp.ge.s32.totalorder %v1353_v63, 100 }
 0x7cb   :  { %v1369_v4 = vsel %vm1368_vm12, 1, %v1943_v2  ;;  %vm1374_vm0 = vmand %vm1370_vm14, %vm1371_vm13 }
 0x7cc   :  { %v1378_v56 = vadd.s32 %v1369_v4, %v1361_v3  ;;  %vm1376_vm1 = vmor %vm1374_vm0, %vm1375_vm15 }
 0x7cd   :  { %v1377_v6 = vsel %vm1376_vm1, 1, %v1943_v2 }
 0x7ce   :  { %v1379_v20 = vadd.s32 %v1378_v56, %v1377_v6 }
 0x7d0   :  { %v1380_v61 = vshll.u32 %v1379_v20, 8 }
 0x7d2   :  { %v2487_v41 = vor.u32 %v1380_v61, %v2442_v5 }
 0x7d4   :  { %v1382_v9 = vor.u32 64, %v2487_v41  ;;  %v1384_v14 = vor.u32 128, %v2487_v41  ;;  %v1386_v15 = vor.u32 192, %v2487_v41 }
 0x7d6   :  { %v2493_v16 = vadd.s32 %v1382_v9, %v1987_v10  ;;  %v2496_v57 = vadd.s32 %v1384_v14, %v1987_v10  ;;  %v2499_v17 = vadd.s32 %v1386_v15, %v1987_v10 }
 0x7d8   :  { %vm1392_vm2 = vcmp.lt.s32.totalorder %v2496_v57, 0  ;;  %v1393_v5 = vxor.u32 2147483647, %v2496_v57  ;;  %vm1388_vm3 = vcmp.lt.s32.totalorder %v2493_v16, 0  ;;  %v1389_v18 = vxor.u32 2147483647, %v2493_v16 }
 0x7d9   :  { %v1397_v30 = vxor.u32 2147483647, %v2499_v17  ;;  %vm1396_vm4 = vcmp.lt.s32.totalorder %v2499_v17, 0  ;;  %vm1470_vm12 = vcmp.le.s32.totalorder %v2493_v16, 2139095040  ;;  %vm1474_vm14 = vcmp.lt.s32.totalorder %v2493_v16, 2155872255 }
 0x7da   :  { %v1394_v7 = vsel %vm1392_vm2, %v1393_v5, %v2496_v57  ;;  %v1390_v21 = vsel %vm1388_vm3, %v1389_v18, %v2493_v16  ;;  %vm1478_vm0 = vcmp.le.s32.totalorder %v2496_v57, 2139095040  ;;  %vm1482_vm2 = vcmp.lt.s32.totalorder %v2496_v57, 2155872255 }
 0x7db   :  { %vm1411_vm5 = vcmp.ge.f32.partialorder %v2415_v12, %v1394_v7  ;;  %vm1412_vm6 = vcmp.ge.f32.partialorder %v2418_v47, %v1394_v7  ;;  %vm1400_vm7 = vcmp.ge.f32.partialorder %v2415_v12, %v1390_v21  ;;  %vm1401_vm8 = vcmp.ge.f32.partialorder %v2418_v47, %v1390_v21 }
 0x7dc   :  { %v1413_v22 = vsel %vm1411_vm5, 1, %v1943_v2  ;;  %v1414_v11 = vsel %vm1412_vm6, 1, %v1943_v2  ;;  %v1402_v23 = vsel %vm1400_vm7, 1, %v1943_v2  ;;  %v1403_v26 = vsel %vm1401_vm8, 1, %v1943_v2 }
 0x7dd   :  { %v1415_v27 = vadd.s32 %v1414_v11, %v1413_v22  ;;  %v1404_v36 = vadd.s32 %v1403_v26, %v1402_v23  ;;  %v1398_v19 = vsel %vm1396_vm4, %v1397_v30, %v2499_v17  ;;  %vm1486_vm5 = vcmp.le.s32.totalorder %v2499_v17, 2139095040 }
 0x7de   :  { %vm1422_vm9 = vcmp.ge.f32.partialorder %v2415_v12, %v1398_v19  ;;  %vm1423_vm10 = vcmp.ge.f32.partialorder %v2418_v47, %v1398_v19  ;;  %vm1490_vm7 = vcmp.lt.s32.totalorder %v2499_v17, 2155872255 }
 0x7df   :  { %v1416_v31 = vrot.slane %v1415_v27, 4  ;;  %v1405_v32 = vrot.slane %v1404_v36, 4  ;;  %v1424_v0 = vsel %vm1422_vm9, 1, %v1943_v2  ;;  %v1425_v33 = vsel %vm1423_vm10, 1, %v1943_v2 }
 0x7e0   :  { %v1426_v1 = vadd.s32 %v1425_v33, %v1424_v0 }
 0x7e1   :  { %v1417_v28 = vadd.s32 %v1416_v31, %v1415_v27  ;;  %v1406_v34 = vadd.s32 %v1405_v32, %v1404_v36 }
 0x7e2   :  { %v1427_v46 = vrot.slane %v1426_v1, 4 }
 0x7e3   :  { %v1418_v37 = vrot.slane %v1417_v28, 2  ;;  %v1407_v38 = vrot.slane %v1406_v34, 2 }
 0x7e4   :  { %v1428_v29 = vadd.s32 %v1427_v46, %v1426_v1 }
 0x7e5   :  { %v1419_v39 = vadd.s32 %v1418_v37, %v1417_v28  ;;  %v1408_v52 = vadd.s32 %v1407_v38, %v1406_v34 }
 0x7e6   :  { %v1429_v42 = vrot.slane %v1428_v29, 2 }
 0x7e7   :  { %v1420_v43 = vrot.slane %v1419_v39, 1  ;;  %v1409_v35 = vrot.slane %v1408_v52, 1 }
 0x7e8   :  { %v1430_v44 = vadd.s32 %v1429_v42, %v1428_v29 }
 0x7e9   :  { %v1421_v48 = vadd.s32 %v1420_v43, %v1419_v39  ;;  %v1410_v49 = vadd.s32 %v1409_v35, %v1408_v52 }
 0x7ea   :  { %v1431_v50 = vrot.slane %v1430_v44, 1 }
 0x7eb   :  { %v1446_v62 = vshrl.u32 %v1421_v48, 16  ;;  %v1434_v40 = vshrl.u32 %v1410_v49, 16  ;;  %v1433_v53 = vand.u32 65535, %v1410_v49  ;;  %v1445_v8 = vand.u32 65535, %v1421_v48 }
 0x7ec   :  { %v1432_v25 = vadd.s32 %v1431_v50, %v1430_v44 }
 0x7ed   :  { %v1448_v54 = vcvt.s32.f32 %v1446_v62  ;;  %v1436_v24 = vcvt.s32.f32 %v1434_v40  ;;  %v1435_v45 = vcvt.s32.f32 %v1433_v53  ;;  %v1447_v51 = vcvt.s32.f32 %v1445_v8 }
 0x7ee   :  { %v1458_v55 = vshrl.u32 %v1432_v25, 16  ;;  %v1457_v58 = vand.u32 65535, %v1432_v25 }
 0x7ef   :  { %1451 = vadd.xlane.f32.xlu1 %v1448_v54  ;;  %1439 = vadd.xlane.f32.xlu0 %v1436_v24 }
 0x7f0   :  { %1437 = vadd.xlane.f32.xlu2 %v1435_v45  ;;  %v1460_v59 = vcvt.s32.f32 %v1458_v55  ;;  %v1459_v60 = vcvt.s32.f32 %v1457_v58 }
 0x7f7   :  { %1463 = vadd.xlane.f32.xlu1 %v1460_v59  ;;  %1449 = vadd.xlane.f32.xlu0 %v1447_v51 }
 0x7f8   :  { %1461 = vadd.xlane.f32.xlu2 %v1459_v60 }
 0x862   :  { %v1452_v13 = vpop.xlane.xlu1 %1451  ;;  %v1440_v63 = vpop.xlane.xlu0 %1439 }
 0x863   :  { %v1442_v3 = vcvt.f32.s32 %v1440_v63  ;;  %v1438_v4 = vpop.xlane.xlu2 %1437  ;;  %v1454_v20 = vcvt.f32.s32 %v1452_v13 }
 0x864   :  { %v1441_v6 = vcvt.f32.s32 %v1438_v4 }
 0x865   :  { %v1443_v56 = vshll.u32 %v1442_v3, 16  ;;  %v1455_v15 = vshll.u32 %v1454_v20, 16 }
 0x867   :  { %v1444_v61 = vadd.s32 %v1443_v56, %v1441_v6 }
 0x869   :  { %vm1469_vm11 = vcmp.ge.s32.totalorder %v1444_v61, 100 }
 0x86a   :  { %v1464_v9 = vpop.xlane.xlu1 %1463  ;;  %v1450_v14 = vpop.xlane.xlu0 %1449  ;;  %vm1473_vm13 = vmand %vm1469_vm11, %vm1470_vm12 }
 0x86b   :  { %v1466_v5 = vcvt.f32.s32 %v1464_v9  ;;  %v1453_v18 = vcvt.f32.s32 %v1450_v14  ;;  %v1462_v30 = vpop.xlane.xlu2 %1461  ;;  %vm1475_vm15 = vmor %vm1473_vm13, %vm1474_vm14 }
 0x86c   :  { %v1465_v22 = vcvt.f32.s32 %v1462_v30  ;;  %v1476_v23 = vsel %vm1475_vm15, 1, %v1943_v2 }
 0x86d   :  { %v1467_v7 = vshll.u32 %v1466_v5, 16  ;;  %v1456_v21 = vadd.s32 %v1455_v15, %v1453_v18 }
 0x86f   :  { %vm1477_vm1 = vcmp.ge.s32.totalorder %v1456_v21, 100  ;;  %v1468_v11 = vadd.s32 %v1467_v7, %v1465_v22 }
 0x870   :  { %vm1481_vm3 = vmand %vm1477_vm1, %vm1478_vm0 }
 0x871   :  { %vm1483_vm4 = vmor %vm1481_vm3, %vm1482_vm2  ;;  %vm1485_vm6 = vcmp.ge.s32.totalorder %v1468_v11, 100 }
 0x872   :  { %v1484_v26 = vsel %vm1483_vm4, 1, %v1943_v2  ;;  %vm1489_vm8 = vmand %vm1485_vm6, %vm1486_vm5 }
 0x873   :  { %v1493_v16 = vadd.s32 %v1484_v26, %v1476_v23  ;;  %vm1491_vm9 = vmor %vm1489_vm8, %vm1490_vm7 }
 0x874   :  { %v1492_v27 = vsel %vm1491_vm9, 1, %v1943_v2 }
 0x875   :  { %v1494_v36 = vadd.s32 %v1493_v16, %v1492_v27 }
 0x877   :  { %v1495_v19 = vshll.u32 %v1494_v36, 6 }
 0x879   :  { %v2532_v57 = vor.u32 %v1495_v19, %v2487_v41 }
 0x87b   :  { %v1497_v31 = vor.u32 16, %v2532_v57  ;;  %v1499_v32 = vor.u32 32, %v2532_v57  ;;  %v1501_v0 = vor.u32 48, %v2532_v57 }
 0x87d   :  { %v2538_v33 = vadd.s32 %v1497_v31, %v1987_v10  ;;  %v2541_v17 = vadd.s32 %v1499_v32, %v1987_v10  ;;  %v2544_v1 = vadd.s32 %v1501_v0, %v1987_v10 }
 0x87f   :  { %vm1507_vm10 = vcmp.lt.s32.totalorder %v2541_v17, 0  ;;  %v1508_v41 = vxor.u32 2147483647, %v2541_v17  ;;  %vm1503_vm11 = vcmp.lt.s32.totalorder %v2538_v33, 0  ;;  %v1504_v28 = vxor.u32 2147483647, %v2538_v33 }
 0x880   :  { %v1512_v34 = vxor.u32 2147483647, %v2544_v1  ;;  %vm1511_vm12 = vcmp.lt.s32.totalorder %v2544_v1, 0  ;;  %vm1585_vm4 = vcmp.le.s32.totalorder %v2538_v33, 2139095040  ;;  %vm1589_vm6 = vcmp.lt.s32.totalorder %v2538_v33, 2155872255 }
 0x881   :  { %v1509_v46 = vsel %vm1507_vm10, %v1508_v41, %v2541_v17  ;;  %v1505_v37 = vsel %vm1503_vm11, %v1504_v28, %v2538_v33  ;;  %vm1593_vm8 = vcmp.le.s32.totalorder %v2541_v17, 2139095040  ;;  %vm1597_vm10 = vcmp.lt.s32.totalorder %v2541_v17, 2155872255 }
 0x882   :  { %vm1526_vm13 = vcmp.ge.f32.partialorder %v2415_v12, %v1509_v46  ;;  %vm1527_vm14 = vcmp.ge.f32.partialorder %v2418_v47, %v1509_v46  ;;  %vm1515_vm15 = vcmp.ge.f32.partialorder %v2415_v12, %v1505_v37  ;;  %vm1516_vm0 = vcmp.ge.f32.partialorder %v2418_v47, %v1505_v37 }
 0x883   :  { %v1528_v38 = vsel %vm1526_vm13, 1, %v1943_v2  ;;  %v1529_v29 = vsel %vm1527_vm14, 1, %v1943_v2  ;;  %v1517_v39 = vsel %vm1515_vm15, 1, %v1943_v2  ;;  %v1518_v52 = vsel %vm1516_vm0, 1, %v1943_v2 }
 0x884   :  { %v1530_v42 = vadd.s32 %v1529_v29, %v1528_v38  ;;  %v1519_v43 = vadd.s32 %v1518_v52, %v1517_v39  ;;  %v1513_v35 = vsel %vm1511_vm12, %v1512_v34, %v2544_v1  ;;  %vm1601_vm13 = vcmp.le.s32.totalorder %v2544_v1, 2139095040 }
 0x885   :  { %vm1537_vm1 = vcmp.ge.f32.partialorder %v2415_v12, %v1513_v35  ;;  %vm1538_vm2 = vcmp.ge.f32.partialorder %v2418_v47, %v1513_v35  ;;  %vm1605_vm15 = vcmp.lt.s32.totalorder %v2544_v1, 2155872255 }
 0x886   :  { %v1531_v44 = vrot.slane %v1530_v42, 4  ;;  %v1520_v48 = vrot.slane %v1519_v43, 4  ;;  %v1539_v49 = vsel %vm1537_vm1, 1, %v1943_v2  ;;  %v1540_v50 = vsel %vm1538_vm2, 1, %v1943_v2 }
 0x887   :  { %v1541_v62 = vadd.s32 %v1540_v50, %v1539_v49 }
 0x888   :  { %v1532_v40 = vadd.s32 %v1531_v44, %v1530_v42  ;;  %v1521_v53 = vadd.s32 %v1520_v48, %v1519_v43 }
 0x889   :  { %v1542_v54 = vrot.slane %v1541_v62, 4 }
 0x88a   :  { %v1533_v24 = vrot.slane %v1532_v40, 2  ;;  %v1522_v45 = vrot.slane %v1521_v53, 2 }
 0x88b   :  { %v1543_v25 = vadd.s32 %v1542_v54, %v1541_v62 }
 0x88c   :  { %v1534_v55 = vadd.s32 %v1533_v24, %v1532_v40  ;;  %v1523_v8 = vadd.s32 %v1522_v45, %v1521_v53 }
 0x88d   :  { %v1544_v58 = vrot.slane %v1543_v25, 2 }
 0x88e   :  { %v1535_v59 = vrot.slane %v1534_v55, 1  ;;  %v1524_v51 = vrot.slane %v1523_v8, 1 }
 0x88f   :  { %v1545_v60 = vadd.s32 %v1544_v58, %v1543_v25 }
 0x890   :  { %v1536_v13 = vadd.s32 %v1535_v59, %v1534_v55  ;;  %v1525_v63 = vadd.s32 %v1524_v51, %v1523_v8 }
 0x891   :  { %v1546_v3 = vrot.slane %v1545_v60, 1 }
 0x892   :  { %v1561_v4 = vshrl.u32 %v1536_v13, 16  ;;  %v1549_v56 = vshrl.u32 %v1525_v63, 16  ;;  %v1548_v6 = vand.u32 65535, %v1525_v63  ;;  %v1560_v5 = vand.u32 65535, %v1536_v13 }
 0x893   :  { %v1547_v14 = vadd.s32 %v1546_v3, %v1545_v60 }
 0x894   :  { %v1563_v20 = vcvt.s32.f32 %v1561_v4  ;;  %v1551_v61 = vcvt.s32.f32 %v1549_v56  ;;  %v1550_v9 = vcvt.s32.f32 %v1548_v6  ;;  %v1562_v7 = vcvt.s32.f32 %v1560_v5 }
 0x895   :  { %v1573_v15 = vshrl.u32 %v1547_v14, 16  ;;  %v1572_v18 = vand.u32 65535, %v1547_v14 }
 0x896   :  { %1566 = vadd.xlane.f32.xlu1 %v1563_v20  ;;  %1554 = vadd.xlane.f32.xlu0 %v1551_v61 }
 0x897   :  { %1552 = vadd.xlane.f32.xlu2 %v1550_v9  ;;  %v1575_v30 = vcvt.s32.f32 %v1573_v15  ;;  %v1574_v21 = vcvt.s32.f32 %v1572_v18 }
 0x89e   :  { %1578 = vadd.xlane.f32.xlu1 %v1575_v30  ;;  %1564 = vadd.xlane.f32.xlu0 %v1562_v7 }
 0x89f   :  { %1576 = vadd.xlane.f32.xlu2 %v1574_v21 }
 0x909   :  { %v1567_v22 = vpop.xlane.xlu1 %1566  ;;  %v1555_v11 = vpop.xlane.xlu0 %1554 }
 0x90a   :  { %v1557_v23 = vcvt.f32.s32 %v1555_v11  ;;  %v1553_v26 = vpop.xlane.xlu2 %1552  ;;  %v1569_v36 = vcvt.f32.s32 %v1567_v22 }
 0x90b   :  { %v1556_v27 = vcvt.f32.s32 %v1553_v26 }
 0x90c   :  { %v1558_v16 = vshll.u32 %v1557_v23, 16  ;;  %v1570_v0 = vshll.u32 %v1569_v36, 16 }
 0x90e   :  { %v1559_v19 = vadd.s32 %v1558_v16, %v1556_v27 }
 0x910   :  { %vm1584_vm3 = vcmp.ge.s32.totalorder %v1559_v19, 100 }
 0x911   :  { %v1579_v31 = vpop.xlane.xlu1 %1578  ;;  %v1565_v32 = vpop.xlane.xlu0 %1564  ;;  %vm1588_vm5 = vmand %vm1584_vm3, %vm1585_vm4 }
 0x912   :  { %v1581_v41 = vcvt.f32.s32 %v1579_v31  ;;  %v1568_v28 = vcvt.f32.s32 %v1565_v32  ;;  %v1577_v34 = vpop.xlane.xlu2 %1576  ;;  %vm1590_vm7 = vmor %vm1588_vm5, %vm1589_vm6 }
 0x913   :  { %v1580_v38 = vcvt.f32.s32 %v1577_v34  ;;  %v1591_v39 = vsel %vm1590_vm7, 1, %v1943_v2 }
 0x914   :  { %v1582_v46 = vshll.u32 %v1581_v41, 16  ;;  %v1571_v37 = vadd.s32 %v1570_v0, %v1568_v28 }
 0x916   :  { %vm1592_vm9 = vcmp.ge.s32.totalorder %v1571_v37, 100  ;;  %v1583_v29 = vadd.s32 %v1582_v46, %v1580_v38 }
 0x917   :  { %vm1596_vm11 = vmand %vm1592_vm9, %vm1593_vm8 }
 0x918   :  { %vm1598_vm12 = vmor %vm1596_vm11, %vm1597_vm10  ;;  %vm1600_vm14 = vcmp.ge.s32.totalorder %v1583_v29, 100 }
 0x919   :  { %v1599_v52 = vsel %vm1598_vm12, 1, %v1943_v2  ;;  %vm1604_vm0 = vmand %vm1600_vm14, %vm1601_vm13 }
 0x91a   :  { %v1608_v33 = vadd.s32 %v1599_v52, %v1591_v39  ;;  %vm1606_vm1 = vmor %vm1604_vm0, %vm1605_vm15 }
 0x91b   :  { %v1607_v42 = vsel %vm1606_vm1, 1, %v1943_v2 }
 0x91c   :  { %v1609_v43 = vadd.s32 %v1608_v33, %v1607_v42 }
 0x91e   :  { %v1610_v35 = vshll.u32 %v1609_v43, 4 }
 0x920   :  { %v2577_v17 = vor.u32 %v1610_v35, %v2532_v57 }
 0x922   :  { %v1612_v44 = vor.u32 4, %v2577_v17  ;;  %v1614_v48 = vor.u32 8, %v2577_v17  ;;  %v1616_v49 = vor.u32 12, %v2577_v17 }
 0x924   :  { %v2583_v50 = vadd.s32 %v1612_v44, %v1987_v10  ;;  %v2586_v1 = vadd.s32 %v1614_v48, %v1987_v10  ;;  %v2589_v62 = vadd.s32 %v1616_v49, %v1987_v10 }
 0x926   :  { %vm1622_vm2 = vcmp.lt.s32.totalorder %v2586_v1, 0  ;;  %v1623_v57 = vxor.u32 2147483647, %v2586_v1  ;;  %vm1618_vm3 = vcmp.lt.s32.totalorder %v2583_v50, 0  ;;  %v1619_v40 = vxor.u32 2147483647, %v2583_v50 }
 0x927   :  { %v1627_v53 = vxor.u32 2147483647, %v2589_v62  ;;  %vm1626_vm4 = vcmp.lt.s32.totalorder %v2589_v62, 0  ;;  %vm1700_vm12 = vcmp.le.s32.totalorder %v2583_v50, 2139095040  ;;  %vm1704_vm14 = vcmp.lt.s32.totalorder %v2583_v50, 2155872255 }
 0x928   :  { %v1624_v54 = vsel %vm1622_vm2, %v1623_v57, %v2586_v1  ;;  %v1620_v24 = vsel %vm1618_vm3, %v1619_v40, %v2583_v50  ;;  %vm1708_vm0 = vcmp.le.s32.totalorder %v2586_v1, 2139095040  ;;  %vm1712_vm2 = vcmp.lt.s32.totalorder %v2586_v1, 2155872255 }
 0x929   :  { %vm1641_vm5 = vcmp.ge.f32.partialorder %v2415_v12, %v1624_v54  ;;  %vm1642_vm6 = vcmp.ge.f32.partialorder %v2418_v47, %v1624_v54  ;;  %vm1630_vm7 = vcmp.ge.f32.partialorder %v2415_v12, %v1620_v24  ;;  %vm1631_vm8 = vcmp.ge.f32.partialorder %v2418_v47, %v1620_v24 }
 0x92a   :  { %v1643_v45 = vsel %vm1641_vm5, 1, %v1943_v2  ;;  %v1644_v25 = vsel %vm1642_vm6, 1, %v1943_v2  ;;  %v1632_v55 = vsel %vm1630_vm7, 1, %v1943_v2  ;;  %v1633_v8 = vsel %vm1631_vm8, 1, %v1943_v2 }
 0x92b   :  { %v1645_v58 = vadd.s32 %v1644_v25, %v1643_v45  ;;  %v1634_v59 = vadd.s32 %v1633_v8, %v1632_v55  ;;  %v1628_v51 = vsel %vm1626_vm4, %v1627_v53, %v2589_v62  ;;  %vm1716_vm5 = vcmp.le.s32.totalorder %v2589_v62, 2139095040 }
 0x92c   :  { %vm1652_vm9 = vcmp.ge.f32.partialorder %v2415_v12, %v1628_v51  ;;  %vm1653_vm10 = vcmp.ge.f32.partialorder %v2418_v47, %v1628_v51  ;;  %vm1720_vm7 = vcmp.lt.s32.totalorder %v2589_v62, 2155872255 }
 0x92d   :  { %v1646_v60 = vrot.slane %v1645_v58, 4  ;;  %v1635_v13 = vrot.slane %v1634_v59, 4  ;;  %v1654_v63 = vsel %vm1652_vm9, 1, %v1943_v2  ;;  %v1655_v3 = vsel %vm1653_vm10, 1, %v1943_v2 }
 0x92e   :  { %v1656_v4 = vadd.s32 %v1655_v3, %v1654_v63 }
 0x92f   :  { %v1647_v56 = vadd.s32 %v1646_v60, %v1645_v58  ;;  %v1636_v6 = vadd.s32 %v1635_v13, %v1634_v59 }
 0x930   :  { %v1657_v20 = vrot.slane %v1656_v4, 4 }
 0x931   :  { %v1648_v61 = vrot.slane %v1647_v56, 2  ;;  %v1637_v9 = vrot.slane %v1636_v6, 2 }
 0x932   :  { %v1658_v14 = vadd.s32 %v1657_v20, %v1656_v4  ;;  %v2644_v20 = vld [vmem:[#allocation2] sm:$0xff] }
 0x933   :  { %v1649_v15 = vadd.s32 %v1648_v61, %v1647_v56  ;;  %v1638_v5 = vadd.s32 %v1637_v9, %v1636_v6  ;;  %v2647_v61 = vld [vmem:[#allocation2 + $0x8] sm:$0xff] }
 0x934   :  { %v1659_v18 = vrot.slane %v1658_v14, 2 }
 0x935   :  { %v1650_v30 = vrot.slane %v1649_v15, 1  ;;  %v1639_v12 = vrot.slane %v1638_v5, 1 }
 0x936   :  { %v1660_v7 = vadd.s32 %v1659_v18, %v1658_v14 }
 0x937   :  { %v1651_v47 = vadd.s32 %v1650_v30, %v1649_v15  ;;  %v1640_v21 = vadd.s32 %v1639_v12, %v1638_v5 }
 0x938   :  { %v1661_v22 = vrot.slane %v1660_v7, 1 }
 0x939   :  { %v1676_v11 = vshrl.u32 %v1651_v47, 16  ;;  %v1664_v23 = vshrl.u32 %v1640_v21, 16  ;;  %v1663_v26 = vand.u32 65535, %v1640_v21  ;;  %v1675_v32 = vand.u32 65535, %v1651_v47 }
 0x93a   :  { %v1662_v19 = vadd.s32 %v1661_v22, %v1660_v7 }
 0x93b   :  { %v1678_v16 = vcvt.s32.f32 %v1676_v11  ;;  %v1666_v27 = vcvt.s32.f32 %v1664_v23  ;;  %v1665_v36 = vcvt.s32.f32 %v1663_v26  ;;  %v1677_v28 = vcvt.s32.f32 %v1675_v32 }
 0x93c   :  { %v1688_v31 = vshrl.u32 %v1662_v19, 16  ;;  %v1687_v0 = vand.u32 65535, %v1662_v19 }
 0x93d   :  { %1681 = vadd.xlane.f32.xlu1 %v1678_v16  ;;  %1669 = vadd.xlane.f32.xlu0 %v1666_v27 }
 0x93e   :  { %1667 = vadd.xlane.f32.xlu2 %v1665_v36  ;;  %v1690_v41 = vcvt.s32.f32 %v1688_v31  ;;  %v1689_v34 = vcvt.s32.f32 %v1687_v0 }
 0x945   :  { %1693 = vadd.xlane.f32.xlu1 %v1690_v41  ;;  %1679 = vadd.xlane.f32.xlu0 %v1677_v28 }
 0x946   :  { %1691 = vadd.xlane.f32.xlu2 %v1689_v34 }
 0x9b0   :  { %v1682_v46 = vpop.xlane.xlu1 %1681  ;;  %v1670_v37 = vpop.xlane.xlu0 %1669 }
 0x9b1   :  { %v1672_v38 = vcvt.f32.s32 %v1670_v37  ;;  %v1668_v29 = vpop.xlane.xlu2 %1667  ;;  %v1684_v33 = vcvt.f32.s32 %v1682_v46 }
 0x9b2   :  { %v1671_v52 = vcvt.f32.s32 %v1668_v29 }
 0x9b3   :  { %v1673_v39 = vshll.u32 %v1672_v38, 16  ;;  %v1685_v44 = vshll.u32 %v1684_v33, 16 }
 0x9b5   :  { %v1674_v42 = vadd.s32 %v1673_v39, %v1671_v52 }
 0x9b7   :  { %vm1699_vm11 = vcmp.ge.s32.totalorder %v1674_v42, 100 }
 0x9b8   :  { %v1694_v43 = vpop.xlane.xlu1 %1693  ;;  %v1680_v35 = vpop.xlane.xlu0 %1679  ;;  %vm1703_vm13 = vmand %vm1699_vm11, %vm1700_vm12 }
 0x9b9   :  { %v1696_v48 = vcvt.f32.s32 %v1694_v43  ;;  %v1683_v49 = vcvt.f32.s32 %v1680_v35  ;;  %v1692_v57 = vpop.xlane.xlu2 %1691  ;;  %vm1705_vm15 = vmor %vm1703_vm13, %vm1704_vm14 }
 0x9ba   :  { %v1695_v54 = vcvt.f32.s32 %v1692_v57  ;;  %v1706_v45 = vsel %vm1705_vm15, 1, %v1943_v2 }
 0x9bb   :  { %v1697_v40 = vshll.u32 %v1696_v48, 16  ;;  %v1686_v53 = vadd.s32 %v1685_v44, %v1683_v49 }
 0x9bd   :  { %vm1707_vm1 = vcmp.ge.s32.totalorder %v1686_v53, 100  ;;  %v1698_v24 = vadd.s32 %v1697_v40, %v1695_v54 }
 0x9be   :  { %vm1711_vm3 = vmand %vm1707_vm1, %vm1708_vm0 }
 0x9bf   :  { %vm1713_vm4 = vmor %vm1711_vm3, %vm1712_vm2  ;;  %vm1715_vm6 = vcmp.ge.s32.totalorder %v1698_v24, 100 }
 0x9c0   :  { %v1714_v25 = vsel %vm1713_vm4, 1, %v1943_v2  ;;  %vm1719_vm8 = vmand %vm1715_vm6, %vm1716_vm5 }
 0x9c1   :  { %v1723_v50 = vadd.s32 %v1714_v25, %v1706_v45  ;;  %vm1721_vm9 = vmor %vm1719_vm8, %vm1720_vm7 }
 0x9c2   :  { %v1722_v55 = vsel %vm1721_vm9, 1, %v1943_v2 }
 0x9c3   :  { %v1724_v8 = vadd.s32 %v1723_v50, %v1722_v55 }
 0x9c5   :  { %v1725_v58 = vshll.u32 %v1724_v8, 2 }
 0x9c7   :  { %v2622_v1 = vor.u32 %v1725_v58, %v2577_v17 }
 0x9c9   :  { %v1727_v59 = vor.u32 1, %v2622_v1  ;;  %v1729_v51 = vor.u32 2, %v2622_v1  ;;  %v1731_v60 = vor.u32 3, %v2622_v1 }
 0x9cb   :  { %v2628_v13 = vadd.s32 %v1727_v59, %v1987_v10  ;;  %v2631_v62 = vadd.s32 %v1729_v51, %v1987_v10  ;;  %v2634_v63 = vadd.s32 %v1731_v60, %v1987_v10 }
 0x9cd   :  { %vm1737_vm10 = vcmp.lt.s32.totalorder %v2631_v62, 0  ;;  %v1738_v17 = vxor.u32 2147483647, %v2631_v62  ;;  %vm1733_vm11 = vcmp.lt.s32.totalorder %v2628_v13, 0  ;;  %v1734_v3 = vxor.u32 2147483647, %v2628_v13 }
 0x9ce   :  { %v1742_v4 = vxor.u32 2147483647, %v2634_v63  ;;  %vm1741_vm12 = vcmp.lt.s32.totalorder %v2634_v63, 0  ;;  %vm1815_vm4 = vcmp.le.s32.totalorder %v2628_v13, 2139095040  ;;  %vm1819_vm6 = vcmp.lt.s32.totalorder %v2628_v13, 2155872255 }
 0x9cf   :  { %v1739_v56 = vsel %vm1737_vm10, %v1738_v17, %v2631_v62  ;;  %v1735_v6 = vsel %vm1733_vm11, %v1734_v3, %v2628_v13  ;;  %vm1823_vm8 = vcmp.le.s32.totalorder %v2631_v62, 2139095040  ;;  %vm1827_vm10 = vcmp.lt.s32.totalorder %v2631_v62, 2155872255 }
 0x9d0   :  { %vm1756_vm13 = vcmp.ge.f32.partialorder %v2644_v20, %v1739_v56  ;;  %vm1757_vm14 = vcmp.ge.f32.partialorder %v2647_v61, %v1739_v56  ;;  %vm1745_vm15 = vcmp.ge.f32.partialorder %v2644_v20, %v1735_v6  ;;  %vm1746_vm0 = vcmp.ge.f32.partialorder %v2647_v61, %v1735_v6 }
 0x9d1   :  { %v1758_v9 = vsel %vm1756_vm13, 1, %v1943_v2  ;;  %v1759_v14 = vsel %vm1757_vm14, 1, %v1943_v2  ;;  %v1747_v15 = vsel %vm1745_vm15, 1, %v1943_v2  ;;  %v1748_v5 = vsel %vm1746_vm0, 1, %v1943_v2 }
 0x9d2   :  { %v1760_v18 = vadd.s32 %v1759_v14, %v1758_v9  ;;  %v1749_v30 = vadd.s32 %v1748_v5, %v1747_v15  ;;  %v1743_v12 = vsel %vm1741_vm12, %v1742_v4, %v2634_v63  ;;  %vm1831_vm13 = vcmp.le.s32.totalorder %v2634_v63, 2139095040 }
 0x9d3   :  { %vm1767_vm1 = vcmp.ge.f32.partialorder %v2644_v20, %v1743_v12  ;;  %vm1768_vm2 = vcmp.ge.f32.partialorder %v2647_v61, %v1743_v12  ;;  %vm1835_vm15 = vcmp.lt.s32.totalorder %v2634_v63, 2155872255  ;;  %v1946_v63 = vmov 0.0  }
 0x9d4   :  { %v1761_v7 = vrot.slane %v1760_v18, 4  ;;  %v1750_v47 = vrot.slane %v1749_v30, 4  ;;  %v1769_v21 = vsel %vm1767_vm1, 1, %v1943_v2  ;;  %v1770_v22 = vsel %vm1768_vm2, 1, %v1943_v2 }
 0x9d5   :  { %v1771_v11 = vadd.s32 %v1770_v22, %v1769_v21 }
 0x9d6   :  { %v1762_v23 = vadd.s32 %v1761_v7, %v1760_v18  ;;  %v1751_v26 = vadd.s32 %v1750_v47, %v1749_v30 }
 0x9d7   :  { %v1772_v16 = vrot.slane %v1771_v11, 4 }
 0x9d8   :  { %v1763_v27 = vrot.slane %v1762_v23, 2  ;;  %v1752_v36 = vrot.slane %v1751_v26, 2 }
 0x9d9   :  { %v1773_v19 = vadd.s32 %v1772_v16, %v1771_v11 }
 0x9da   :  { %v1764_v31 = vadd.s32 %v1763_v27, %v1762_v23  ;;  %v1753_v32 = vadd.s32 %v1752_v36, %v1751_v26 }
 0x9db   :  { %v1774_v0 = vrot.slane %v1773_v19, 2 }
 0x9dc   :  { %v1765_v41 = vrot.slane %v1764_v31, 1  ;;  %v1754_v28 = vrot.slane %v1753_v32, 1 }
 0x9dd   :  { %v1775_v34 = vadd.s32 %v1774_v0, %v1773_v19 }
 0x9de   :  { %v1766_v46 = vadd.s32 %v1765_v41, %v1764_v31  ;;  %v1755_v37 = vadd.s32 %v1754_v28, %v1753_v32 }
 0x9df   :  { %v1776_v38 = vrot.slane %v1775_v34, 1 }
 0x9e0   :  { %v1791_v29 = vshrl.u32 %v1766_v46, 16  ;;  %v1779_v39 = vshrl.u32 %v1755_v37, 16  ;;  %v1778_v52 = vand.u32 65535, %v1755_v37  ;;  %v1790_v48 = vand.u32 65535, %v1766_v46 }
 0x9e1   :  { %v1777_v35 = vadd.s32 %v1776_v38, %v1775_v34 }
 0x9e2   :  { %v1793_v33 = vcvt.s32.f32 %v1791_v29  ;;  %v1781_v42 = vcvt.s32.f32 %v1779_v39  ;;  %v1780_v43 = vcvt.s32.f32 %v1778_v52  ;;  %v1792_v40 = vcvt.s32.f32 %v1790_v48 }
 0x9e3   :  { %v1803_v44 = vshrl.u32 %v1777_v35, 16  ;;  %v1802_v49 = vand.u32 65535, %v1777_v35 }
 0x9e4   :  { %1796 = vadd.xlane.f32.xlu1 %v1793_v33  ;;  %1784 = vadd.xlane.f32.xlu0 %v1781_v42 }
 0x9e5   :  { %1782 = vadd.xlane.f32.xlu2 %v1780_v43  ;;  %v1805_v57 = vcvt.s32.f32 %v1803_v44  ;;  %v1804_v53 = vcvt.s32.f32 %v1802_v49 }
 0x9ec   :  { %1808 = vadd.xlane.f32.xlu1 %v1805_v57  ;;  %1794 = vadd.xlane.f32.xlu0 %v1792_v40 }
 0x9ed   :  { %1806 = vadd.xlane.f32.xlu2 %v1804_v53 }
 0xa57   :  { %v1797_v54 = vpop.xlane.xlu1 %1796  ;;  %v1785_v24 = vpop.xlane.xlu0 %1784 }
 0xa58   :  { %v1787_v45 = vcvt.f32.s32 %v1785_v24  ;;  %v1783_v25 = vpop.xlane.xlu2 %1782  ;;  %v1799_v8 = vcvt.f32.s32 %v1797_v54 }
 0xa59   :  { %v1786_v55 = vcvt.f32.s32 %v1783_v25 }
 0xa5a   :  { %v1788_v50 = vshll.u32 %v1787_v45, 16  ;;  %v1800_v60 = vshll.u32 %v1799_v8, 16 }
 0xa5c   :  { %v1789_v58 = vadd.s32 %v1788_v50, %v1786_v55 }
 0xa5e   :  { %vm1814_vm3 = vcmp.ge.s32.totalorder %v1789_v58, 100 }
 0xa5f   :  { %v1809_v59 = vpop.xlane.xlu1 %1808  ;;  %v1795_v51 = vpop.xlane.xlu0 %1794  ;;  %vm1818_vm5 = vmand %vm1814_vm3, %vm1815_vm4 }
 0xa60   :  { %v1811_v17 = vcvt.f32.s32 %v1809_v59  ;;  %v1798_v3 = vcvt.f32.s32 %v1795_v51  ;;  %v1807_v4 = vpop.xlane.xlu2 %1806  ;;  %vm1820_vm7 = vmor %vm1818_vm5, %vm1819_vm6 }
 0xa61   :  { %v1810_v9 = vcvt.f32.s32 %v1807_v4  ;;  %v1821_v15 = vsel %vm1820_vm7, 1, %v1943_v2 }
 0xa62   :  { %v1812_v56 = vshll.u32 %v1811_v17, 16  ;;  %v1801_v6 = vadd.s32 %v1800_v60, %v1798_v3 }
 0xa64   :  { %vm1822_vm9 = vcmp.ge.s32.totalorder %v1801_v6, 100  ;;  %v1813_v14 = vadd.s32 %v1812_v56, %v1810_v9 }
 0xa65   :  { %vm1826_vm11 = vmand %vm1822_vm9, %vm1823_vm8 }
 0xa66   :  { %vm1828_vm12 = vmor %vm1826_vm11, %vm1827_vm10  ;;  %vm1830_vm14 = vcmp.ge.s32.totalorder %v1813_v14, 100 }
 0xa67   :  { %v1829_v5 = vsel %vm1828_vm12, 1, %v1943_v2  ;;  %vm1834_vm0 = vmand %vm1830_vm14, %vm1831_vm13 }
 0xa68   :  { %v1838_v13 = vadd.s32 %v1829_v5, %v1821_v15  ;;  %vm1836_vm1 = vmor %vm1834_vm0, %vm1835_vm15 }
 0xa69   :  { %v1837_v18 = vsel %vm1836_vm1, 1, %v1943_v2 }
 0xa6a   :  { %v1839_v30 = vadd.s32 %v1838_v13, %v1837_v18 }
 0xa6c   :  { %v1840_v12 = vor.u32 %v1839_v30, %v2622_v1 }
 0xa6e   :  { %v1841_v62 = vadd.s32 %v1840_v12, %v1987_v10 }
 0xa70   :  { %vm1842_vm2 = vcmp.lt.s32.totalorder %v1841_v62, 0  ;;  %v1843_v7 = vxor.u32 2147483647, %v1841_v62 }
 0xa72   :  { %v1844_v47 = vsel %vm1842_vm2, %v1843_v7, %v1841_v62 }
 0xa73   :  { %vm1846_vm3 = vcmp.ge.f32.partialorder %v2644_v20, %v1844_v47  ;;  %vm1847_vm4 = vcmp.ge.f32.partialorder %v2647_v61, %v1844_v47 }
 0xa74   :  { %v1873_v2 = vsel %vm1846_vm3, 1.0, %v1946_v63  ;;  %v1874_v21 = vsel %vm1847_vm4, 1.0, %v1946_v63 }
 0xa75   :  { %1852 = vst [vmem:[#allocation5] sm:$0xff] %v1873_v2 }
 0xa76   :  { %1853 = vst [vmem:[#allocation5 + $0x8] sm:$0xff] %v1874_v21 }
 0xa77   :  { %1866 = dma.vmem_to_hbm [thread:$0]  %s1859_s13, 256, %s1861_s16, [#allocation4], %s1941_s11, %s1941_s11, %s1942_s12  }
 0xa78   :  { %1938 = dma.done.wait [#allocation4], 256  }
 0xa79   :  { %1939 = vsyncadd [#allocation4], 4294967040 }
 0xa7a   :  { %1871 = vsyncpa [#allocation3], 1 }
 0xa7b   :  { %1872 = vsyncpa [#allocation4], 1 }

</bundles_post_ra>
